<compile_context>
chip_gen: v6e
topology: v6e:2x2x1
jax: 0.10.0
libtpu: 0.0.40
codegen_flags: <defaults>
</compile_context>

<pallas_src>
import math
from functools import partial

import jax
import jax.numpy as jnp
from jax.experimental import pallas as pl
from jax.experimental.pallas import tpu as pltpu


# ------------------------------ in-kernel helpers ---------------------------

def _layernorm(x, gamma, beta, eps=1e-5):
    mu = jnp.mean(x, axis=-1, keepdims=True)
    var = jnp.mean((x - mu) ** 2, axis=-1, keepdims=True)
    return (x - mu) * jax.lax.rsqrt(var + eps) * gamma + beta


def _gelu(x):
    # TODO(synk): HF Whisper uses exact erf-GELU; tanh-approx GELU is used here
    # (max abs diff ~1e-3) to stay within guaranteed Mosaic lowerings.
    return jax.nn.gelu(x, approximate=True)


# ------------------------------- fused kernel -------------------------------

def _fused_encoder_kernel(
    x_ref,                    # (BT, frames, n_mels)  time-major mels, one tile
    w1_ref, b1_ref,           # conv1: (3, n_mels, D) bf16, (1, D) f32
    w2_ref, b2_ref,           # conv2: (3, D, D) bf16,      (1, D) f32
    pos_ref,                  # (seq, D) f32 sinusoidal positions
    ln1_ref,                  # (L, 2, D)  [gamma, beta]
    wq_ref, bq_ref,           # (L, D, D) bf16, (L, 1, D) f32  (q scale folded)
    wk_ref,                   # (L, D, D) bf16                 (k_proj: no bias)
    wv_ref, bv_ref,           # (L, D, D) bf16, (L, 1, D) f32
    wo_ref, bo_ref,           # (L, D, D) bf16, (L, 1, D) f32
    ln2_ref,                  # (L, 2, D)
    wfc1_ref, bfc1_ref,       # (L, D, F) bf16, (L, 1, F) f32
    wfc2_ref, bfc2_ref,       # (L, F, D) bf16, (L, 1, D) f32
    lnf_ref,                  # (2, D)
    wc_ref, bc_ref,           # (D, C) bf16, (1, C) f32
    o_ref,                    # (1, BT, C) f32
    conv_scr,                 # VMEM scratch (BT*frames, D) f32
    *, n_heads,
):
    f32, bf16 = jnp.float32, jnp.bfloat16
    bt, frames, n_mels = x_ref.shape
    d_model = wq_ref.shape[-1]
    n_layers = wq_ref.shape[0]
    seq = pos_ref.shape[0]
    head_dim = d_model // n_heads
    n_rows = bt * frames          # batch-flattened conv time axis
    n_tok = bt * seq              # batch-flattened encoder time axis

    def mm(a, w):                 # bf16 MXU operands, f32 accumulation
        return jnp.dot(a.astype(bf16), w, preferred_element_type=f32)

    # Per-sample conv zero-padding masks (built once, shared by both convs).
    t_in = jax.lax.broadcasted_iota(jnp.int32, (n_rows, 1), 0) % frames
    not_first = (t_in != 0).astype(f32)            # row is not t==0 of its sample
    not_last = (t_in != frames - 1).astype(f32)    # row is not t==frames-1

    def shift_m1(y):   # y[t-1], zero-padded at each sample's t==0
        return pltpu.roll(y, shift=1, axis=0) * not_first

    def shift_p1(y):   # y[t+1], zero-padded at each sample's t==frames-1
        return pltpu.roll(y, shift=n_rows - 1, axis=0) * not_last

    x = x_ref[...].reshape(n_rows, n_mels).astype(f32)

    # --- conv1: k3, s1, p1, fused GELU.  out[t] = sum_k x[t+k-1] @ w1[k] ---
    acc = (mm(shift_m1(x), w1_ref[0])
           + mm(x, w1_ref[1])
           + mm(shift_p1(x), w1_ref[2]))
    h1 = _gelu(acc + b1_ref[...])                          # (n_rows, D) f32

    # --- conv2: k3, s2, p1, fused GELU, + pos-emb ---
    full = (mm(shift_m1(h1), w2_ref[0])
            + mm(h1, w2_ref[1])
            + mm(shift_p1(h1), w2_ref[2]))                 # (n_rows, D) f32
    conv_scr[...] = full
    sub = conv_scr[pl.ds(0, n_tok, stride=2), :]           # stride-2 time rows
    pos = jnp.concatenate([pos_ref[...]] * bt, axis=0)     # (n_tok, D)
    h = _gelu(sub + b2_ref[...]) + pos                     # (n_tok, D) f32

    # --- pre-LN transformer encoder layers ---
    # TODO(synk): at whisper-base depth (6 layers) move this to lax.fori_loop
    # or a layer grid axis with per-layer weight streaming (v7x 64 MiB VMEM).
    for l in range(n_layers):
        # self-attention
        ln1 = ln1_ref[l]
        xn = _layernorm(h, ln1[0:1, :], ln1[1:2, :])
        q = (mm(xn, wq_ref[l]) + bq_ref[l]).reshape(bt, seq, d_model)
        k_ = mm(xn, wk_ref[l]).reshape(bt, seq, d_model)
        v = (mm(xn, wv_ref[l]) + bv_ref[l]).reshape(bt, seq, d_model)

        ctxs = []
        for hh in range(n_heads):
            sl = slice(hh * head_dim, (hh + 1) * head_dim)
            qh, kh, vh = q[:, :, sl], k_[:, :, sl], v[:, :, sl]
            s = jnp.einsum("bqd,bkd->bqk", qh.astype(bf16), kh.astype(bf16),
                           preferred_element_type=f32)       # (bt, seq, seq)
            s = s - jnp.max(s, axis=-1, keepdims=True)
            p = jnp.exp(s)
            p = p * pl.reciprocal(jnp.sum(p, axis=-1, keepdims=True), approx=True)
            ctxs.append(jnp.einsum("bqk,bkd->bqd", p.astype(bf16), vh.astype(bf16),
                                   preferred_element_type=f32))  # (bt, seq, hd)
        ctx = jnp.concatenate(ctxs, axis=-1).reshape(n_tok, d_model)
        h = h + mm(ctx, wo_ref[l]) + bo_ref[l]               # single K=D out-proj

        # MLP
        ln2 = ln2_ref[l]
        xn = _layernorm(h, ln2[0:1, :], ln2[1:2, :])
        m = _gelu(mm(xn, wfc1_ref[l]) + bfc1_ref[l])
        h = h + mm(m, wfc2_ref[l]) + bfc2_ref[l]

    # --- final LN, per-sample mean pool over time, classifier ---
    h = _layernorm(h, lnf_ref[0:1, :], lnf_ref[1:2, :])
    emb = jnp.mean(h.reshape(bt, seq, d_model), axis=1)      # (bt, D)
    o_ref[0] = mm(emb, wc_ref[...]) + bc_ref[...]            # (bt, C)


# ------------------------------- host wrapper --------------------------------

_WEIGHT_ORDER = (
    "w1", "b1", "w2", "b2", "pos",
    "ln1", "wq", "bq", "wk", "wv", "bv", "wo", "bo",
    "ln2", "wfc1", "bfc1", "wfc2", "bfc2",
    "ln_f", "wc", "bc",
)


def ve_model_forward(params, audio_features, cfg, b_tile=None):
    B = audio_features.shape[0]
    C = cfg["num_classes"]
    frames, n_mels = cfg["frames"], cfg["n_mels"]
    d_model = cfg["d_model"]
    seq = (frames + 2 * 1 - 3) // 2 + 1          # conv2 (k3, s2, p1) output length
    assert frames % 2 == 0 and seq * 2 == frames
    assert params["pos"].shape[0] == seq, \
        "positional-embedding length must equal the conv2 output length"

    if b_tile is None:
        # Keep >= 2 parallel grid steps when possible (v7x has 2 TensorCores)
        # while amortizing the per-step overhead over a batch tile.
        b_tile = B // 2 if (B % 2 == 0 and B >= 4) else 1
    assert B % b_tile == 0
    num_tiles = B // b_tile

    feats_t = jnp.transpose(audio_features, (0, 2, 1))   # (B, frames, n_mels)
    weights = [params[name] for name in _WEIGHT_ORDER]

    def full_spec(arr):
        nd = arr.ndim
        return pl.BlockSpec(arr.shape, lambda b, _nd=nd: (0,) * _nd)

    kernel = partial(_fused_encoder_kernel, n_heads=cfg["n_heads"])

    out = pl.pallas_call(
        kernel,
        out_shape=jax.ShapeDtypeStruct((num_tiles, b_tile, C), jnp.float32),
        grid=(num_tiles,),
        in_specs=[pl.BlockSpec((b_tile, frames, n_mels), lambda b: (b, 0, 0))]
                 + [full_spec(w) for w in weights],
        out_specs=pl.BlockSpec((1, b_tile, C), lambda b: (b, 0, 0)),
        scratch_shapes=[pltpu.VMEM((b_tile * frames, d_model), jnp.float32)],
        compiler_params=pltpu.CompilerParams(
            dimension_semantics=("parallel",),
            vmem_limit_bytes=32 * 1024 * 1024),
    )(feats_t, *weights)
    return out.reshape(B, C)


# ------------------------------ parameter init -------------------------------

def sinusoids(length, channels, max_timescale=10000.0):
    """Whisper's fixed sinusoidal positional embedding."""
    half = channels // 2
    log_inc = math.log(max_timescale) / (half - 1)
    inv = jnp.exp(-log_inc * jnp.arange(half, dtype=jnp.float32))
    t = jnp.arange(length, dtype=jnp.float32)[:, None] * inv[None, :]
    return jnp.concatenate([jnp.sin(t), jnp.cos(t)], axis=1)


def init_params(key, cfg):
    D, F, C = cfg["d_model"], cfg["ffn"], cfg["num_classes"]
    nm, L, T = cfg["n_mels"], cfg["n_layers"], cfg["max_positions"]
    qs = cfg["head_dim"] ** -0.5
    bf16 = jnp.bfloat16

    kit = iter(jax.random.split(key, 24))

    def w(shape, fan_in):
        return jax.random.normal(next(kit), shape, jnp.float32) / math.sqrt(fan_in)

    def b(shape):
        return jax.random.normal(next(kit), shape, jnp.float32) * 0.02

    ln_pair = jnp.stack([jnp.ones((D,), jnp.float32), jnp.zeros((D,), jnp.float32)])

    return {
        # conv stem, tap-major: w[k] is (in_ch, out_ch); matmul weights in bf16
        "w1": w((3, nm, D), nm * 3).astype(bf16),
        "b1": b((1, D)),
        "w2": w((3, D, D), D * 3).astype(bf16),
        "b2": b((1, D)),
        "pos": sinusoids(T, D),
        # transformer layers, stacked along a leading layer axis
        "ln1": jnp.tile(ln_pair[None], (L, 1, 1)),
        "wq": (w((L, D, D), D) * qs).astype(bf16),   # q scale folded into weights
        "bq": b((L, 1, D)) * qs,                     # ... and bias
        "wk": w((L, D, D), D).astype(bf16),          # k_proj has no bias in Whisper
        "wv": w((L, D, D), D).astype(bf16),
        "bv": b((L, 1, D)),
        "wo": w((L, D, D), D).astype(bf16),
        "bo": b((L, 1, D)),
        "ln2": jnp.tile(ln_pair[None], (L, 1, 1)),
        "wfc1": w((L, D, F), D).astype(bf16),
        "bfc1": b((L, 1, F)),
        "wfc2": w((L, F, D), F).astype(bf16),
        "bfc2": b((L, 1, D)),
        "ln_f": ln_pair,
        "wc": w((D, C), D).astype(bf16),             # nn.Linear(d_model, num_classes)
        "bc": b((1, C)),
    }


# ----------------------------------- main ------------------------------------

if __name__ == "__main__":
    cfg = dict(
        n_mels=8,          # mel bins (80 in whisper-base)
        frames=16,         # input frames (3000 in whisper-base)
        d_model=32,        # hidden size (512 in whisper-base)
        n_heads=4,
        head_dim=8,
        ffn=64,            # encoder_ffn_dim (2048 in whisper-base)
        n_layers=2,        # encoder layers (6 in whisper-base)
        max_positions=8,   # frames // 2 (conv2 stride-2 output length)
        num_classes=5,
    )

    key = jax.random.PRNGKey(0)
    pkey, xkey = jax.random.split(key)
    params = init_params(pkey, cfg)
    audio_features = jax.random.normal(
        xkey, (4, cfg["n_mels"], cfg["frames"]), jnp.float32
    )

    fwd = jax.jit(partial(ve_model_forward, cfg=cfg))
    logits = fwd(params, audio_features)
    jax.block_until_ready(logits)

    assert logits.shape == (4, cfg["num_classes"])
    assert logits.dtype == jnp.float32
    print("KERNEL_OK")
</pallas_src>

<mosaic_0001>
module attributes {stable_mosaic.version = 11 : i64} {
  func.func @_fused_encoder_kernel(%arg0: i32, %arg1: memref<2x16x8xf32, #tpu.memory_space<vmem>>, %arg2: memref<3x8x32xbf16, #tpu.memory_space<vmem>>, %arg3: memref<1x32xf32, #tpu.memory_space<vmem>>, %arg4: memref<3x32x32xbf16, #tpu.memory_space<vmem>>, %arg5: memref<1x32xf32, #tpu.memory_space<vmem>>, %arg6: memref<8x32xf32, #tpu.memory_space<vmem>>, %arg7: memref<2x2x32xf32, #tpu.memory_space<vmem>>, %arg8: memref<2x32x32xbf16, #tpu.memory_space<vmem>>, %arg9: memref<2x1x32xf32, #tpu.memory_space<vmem>>, %arg10: memref<2x32x32xbf16, #tpu.memory_space<vmem>>, %arg11: memref<2x32x32xbf16, #tpu.memory_space<vmem>>, %arg12: memref<2x1x32xf32, #tpu.memory_space<vmem>>, %arg13: memref<2x32x32xbf16, #tpu.memory_space<vmem>>, %arg14: memref<2x1x32xf32, #tpu.memory_space<vmem>>, %arg15: memref<2x2x32xf32, #tpu.memory_space<vmem>>, %arg16: memref<2x32x64xbf16, #tpu.memory_space<vmem>>, %arg17: memref<2x1x64xf32, #tpu.memory_space<vmem>>, %arg18: memref<2x64x32xbf16, #tpu.memory_space<vmem>>, %arg19: memref<2x1x32xf32, #tpu.memory_space<vmem>>, %arg20: memref<2x32xf32, #tpu.memory_space<vmem>>, %arg21: memref<32x5xbf16, #tpu.memory_space<vmem>>, %arg22: memref<1x5xf32, #tpu.memory_space<vmem>>, %arg23: memref<1x2x5xf32, #tpu.memory_space<vmem>>, %arg24: memref<32x32xf32, #tpu.memory_space<vmem>>) attributes {dimension_semantics = [#tpu.dimension_semantics<parallel>], iteration_bounds = array<i64: 2>, scalar_prefetch = 0 : i64, scratch_operands = 1 : i64, tpu.core_type = #tpu.core_type<tc>, window_params = [{transform_indices = @transform_0, window_bounds = array<i64: 2, 16, 8>}, {pipeline_mode = #tpu.pipeline_mode<synchronous>, transform_indices = @transform_1, window_bounds = array<i64: 3, 8, 32>}, {pipeline_mode = #tpu.pipeline_mode<synchronous>, transform_indices = @transform_2, window_bounds = array<i64: 1, 32>}, {pipeline_mode = #tpu.pipeline_mode<synchronous>, transform_indices = @transform_3, window_bounds = array<i64: 3, 32, 32>}, {pipeline_mode = #tpu.pipeline_mode<synchronous>, transform_indices = @transform_4, window_bounds = array<i64: 1, 32>}, {pipeline_mode = #tpu.pipeline_mode<synchronous>, transform_indices = @transform_5, window_bounds = array<i64: 8, 32>}, {pipeline_mode = #tpu.pipeline_mode<synchronous>, transform_indices = @transform_6, window_bounds = array<i64: 2, 2, 32>}, {pipeline_mode = #tpu.pipeline_mode<synchronous>, transform_indices = @transform_7, window_bounds = array<i64: 2, 32, 32>}, {pipeline_mode = #tpu.pipeline_mode<synchronous>, transform_indices = @transform_8, window_bounds = array<i64: 2, 1, 32>}, {pipeline_mode = #tpu.pipeline_mode<synchronous>, transform_indices = @transform_9, window_bounds = array<i64: 2, 32, 32>}, {pipeline_mode = #tpu.pipeline_mode<synchronous>, transform_indices = @transform_10, window_bounds = array<i64: 2, 32, 32>}, {pipeline_mode = #tpu.pipeline_mode<synchronous>, transform_indices = @transform_11, window_bounds = array<i64: 2, 1, 32>}, {pipeline_mode = #tpu.pipeline_mode<synchronous>, transform_indices = @transform_12, window_bounds = array<i64: 2, 32, 32>}, {pipeline_mode = #tpu.pipeline_mode<synchronous>, transform_indices = @transform_13, window_bounds = array<i64: 2, 1, 32>}, {pipeline_mode = #tpu.pipeline_mode<synchronous>, transform_indices = @transform_14, window_bounds = array<i64: 2, 2, 32>}, {pipeline_mode = #tpu.pipeline_mode<synchronous>, transform_indices = @transform_15, window_bounds = array<i64: 2, 32, 64>}, {pipeline_mode = #tpu.pipeline_mode<synchronous>, transform_indices = @transform_16, window_bounds = array<i64: 2, 1, 64>}, {pipeline_mode = #tpu.pipeline_mode<synchronous>, transform_indices = @transform_17, window_bounds = array<i64: 2, 64, 32>}, {pipeline_mode = #tpu.pipeline_mode<synchronous>, transform_indices = @transform_18, window_bounds = array<i64: 2, 1, 32>}, {pipeline_mode = #tpu.pipeline_mode<synchronous>, transform_indices = @transform_19, window_bounds = array<i64: 2, 32>}, {pipeline_mode = #tpu.pipeline_mode<synchronous>, transform_indices = @transform_20, window_bounds = array<i64: 32, 5>}, {pipeline_mode = #tpu.pipeline_mode<synchronous>, transform_indices = @transform_21, window_bounds = array<i64: 1, 5>}, {transform_indices = @transform_22, window_bounds = array<i64: 1, 2, 5>}]} {
    %0 = tpu.iota {dimensions = array<i32: 0>} : vector<32x1xi32>
    %c16_i32 = arith.constant 16 : i32
    %c0_i32 = arith.constant 0 : i32
    %1 = arith.cmpi eq, %c16_i32, %c0_i32 : i32
    %c1_i32 = arith.constant 1 : i32
    %2 = arith.select %1, %c1_i32, %c16_i32 : i32
    %3 = vector.broadcast %2 : i32 to vector<32x1xi32>
    %4 = arith.remsi %0, %3 : vector<32x1xi32>
    %c0_i32_0 = arith.constant 0 : i32
    %5 = vector.broadcast %c0_i32_0 : i32 to vector<32x1xi32>
    %6 = arith.cmpi ne, %4, %5 : vector<32x1xi32>
    %c0_i32_1 = arith.constant 0 : i32
    %7 = vector.broadcast %c0_i32_1 : i32 to vector<32x1xi32>
    %8 = arith.cmpi slt, %4, %7 : vector<32x1xi32>
    %c0_i32_2 = arith.constant 0 : i32
    %9 = arith.cmpi slt, %2, %c0_i32_2 : i32
    %10 = vector.broadcast %9 : i1 to vector<32x1xi1>
    %11 = vector.broadcast %10 : vector<32x1xi1> to vector<32x1xi1>
    %12 = arith.xori %8, %11 : vector<32x1xi1>
    %13 = arith.andi %12, %6 : vector<32x1xi1>
    %14 = vector.broadcast %2 : i32 to vector<32x1xi32>
    %15 = arith.addi %4, %14 : vector<32x1xi32>
    %16 = arith.select %13, %15, %4 : vector<32x1xi1>, vector<32x1xi32>
    %c0_i32_3 = arith.constant 0 : i32
    %17 = vector.broadcast %c0_i32_3 : i32 to vector<32x1xi32>
    %18 = arith.cmpi ne, %16, %17 : vector<32x1xi32>
    %19 = arith.extui %18 : vector<32x1xi1> to vector<32x1xi32>
    %20 = arith.sitofp %19 : vector<32x1xi32> to vector<32x1xf32>
    %c15_i32 = arith.constant 15 : i32
    %21 = vector.broadcast %c15_i32 : i32 to vector<32x1xi32>
    %22 = arith.cmpi ne, %16, %21 : vector<32x1xi32>
    %23 = arith.extui %22 : vector<32x1xi1> to vector<32x1xi32>
    %24 = arith.sitofp %23 : vector<32x1xi32> to vector<32x1xf32>
    %c0 = arith.constant 0 : index
    %c0_4 = arith.constant 0 : index
    %c0_5 = arith.constant 0 : index
    %25 = vector.load %arg1[%c0, %c0_4, %c0_5] : memref<2x16x8xf32, #tpu.memory_space<vmem>>, vector<2x16x8xf32>
    %26 = vector.shape_cast %25 : vector<2x16x8xf32> to vector<32x8xf32>
    %c1_i32_6 = arith.constant 1 : i32
    %27 = tpu.dynamic_rotate %26 by %c1_i32_6 dim 0 : vector<32x8xf32>, i32 -> vector<32x8xf32>
    %28 = vector.broadcast %20 : vector<32x1xf32> to vector<32x8xf32>
    %29 = arith.mulf %27, %28 : vector<32x8xf32>
    %c0_7 = arith.constant 0 : index
    %c0_8 = arith.constant 0 : index
    %c0_9 = arith.constant 0 : index
    %30 = vector.load %arg2[%c0_7, %c0_8, %c0_9] : memref<3x8x32xbf16, #tpu.memory_space<vmem>>, vector<1x8x32xbf16>
    %31 = vector.shape_cast %30 : vector<1x8x32xbf16> to vector<8x32xbf16>
    %32 = arith.truncf %29 : vector<32x8xf32> to vector<32x8xbf16>
    %cst = arith.constant dense<0.000000e+00> : vector<32x32xf32>
    %33 = tpu.matmul %32, %31, %cst {dimension_numbers = #tpu.dot_dimension_numbers<[1], [0], [0], [1], [0, 0, 1, 1], [], []>} : vector<32x8xbf16>, vector<8x32xbf16>, vector<32x32xf32> -> vector<32x32xf32>
    %c1 = arith.constant 1 : index
    %c0_10 = arith.constant 0 : index
    %c0_11 = arith.constant 0 : index
    %34 = vector.load %arg2[%c1, %c0_10, %c0_11] : memref<3x8x32xbf16, #tpu.memory_space<vmem>>, vector<1x8x32xbf16>
    %35 = vector.shape_cast %34 : vector<1x8x32xbf16> to vector<8x32xbf16>
    %36 = arith.truncf %26 : vector<32x8xf32> to vector<32x8xbf16>
    %cst_12 = arith.constant dense<0.000000e+00> : vector<32x32xf32>
    %37 = tpu.matmul %36, %35, %cst_12 {dimension_numbers = #tpu.dot_dimension_numbers<[1], [0], [0], [1], [0, 0, 1, 1], [], []>} : vector<32x8xbf16>, vector<8x32xbf16>, vector<32x32xf32> -> vector<32x32xf32>
    %38 = arith.addf %33, %37 : vector<32x32xf32>
    %c31_i32 = arith.constant 31 : i32
    %39 = tpu.dynamic_rotate %26 by %c31_i32 dim 0 : vector<32x8xf32>, i32 -> vector<32x8xf32>
    %40 = vector.broadcast %24 : vector<32x1xf32> to vector<32x8xf32>
    %41 = arith.mulf %39, %40 : vector<32x8xf32>
    %c2 = arith.constant 2 : index
    %c0_13 = arith.constant 0 : index
    %c0_14 = arith.constant 0 : index
    %42 = vector.load %arg2[%c2, %c0_13, %c0_14] : memref<3x8x32xbf16, #tpu.memory_space<vmem>>, vector<1x8x32xbf16>
    %43 = vector.shape_cast %42 : vector<1x8x32xbf16> to vector<8x32xbf16>
    %44 = arith.truncf %41 : vector<32x8xf32> to vector<32x8xbf16>
    %cst_15 = arith.constant dense<0.000000e+00> : vector<32x32xf32>
    %45 = tpu.matmul %44, %43, %cst_15 {dimension_numbers = #tpu.dot_dimension_numbers<[1], [0], [0], [1], [0, 0, 1, 1], [], []>} : vector<32x8xbf16>, vector<8x32xbf16>, vector<32x32xf32> -> vector<32x32xf32>
    %46 = arith.addf %38, %45 : vector<32x32xf32>
    %c0_16 = arith.constant 0 : index
    %c0_17 = arith.constant 0 : index
    %47 = vector.load %arg3[%c0_16, %c0_17] : memref<1x32xf32, #tpu.memory_space<vmem>>, vector<1x32xf32>
    %48 = vector.broadcast %47 : vector<1x32xf32> to vector<32x32xf32>
    %49 = arith.addf %46, %48 : vector<32x32xf32>
    %50 = arith.mulf %49, %49 : vector<32x32xf32>
    %51 = arith.mulf %49, %50 : vector<32x32xf32>
    %cst_18 = arith.constant 4.471500e-02 : f32
    %52 = vector.broadcast %cst_18 : f32 to vector<32x32xf32>
    %53 = arith.mulf %52, %51 : vector<32x32xf32>
    %54 = arith.addf %49, %53 : vector<32x32xf32>
    %cst_19 = arith.constant 0.797884583 : f32
    %55 = vector.broadcast %cst_19 : f32 to vector<32x32xf32>
    %56 = arith.mulf %55, %54 : vector<32x32xf32>
    %57 = math.tanh %56 : vector<32x32xf32>
    %cst_20 = arith.constant 1.000000e+00 : f32
    %58 = vector.broadcast %cst_20 : f32 to vector<32x32xf32>
    %59 = arith.addf %58, %57 : vector<32x32xf32>
    %cst_21 = arith.constant 5.000000e-01 : f32
    %60 = vector.broadcast %cst_21 : f32 to vector<32x32xf32>
    %61 = arith.mulf %60, %59 : vector<32x32xf32>
    %62 = arith.mulf %49, %61 : vector<32x32xf32>
    %c1_i32_22 = arith.constant 1 : i32
    %63 = tpu.dynamic_rotate %62 by %c1_i32_22 dim 0 : vector<32x32xf32>, i32 -> vector<32x32xf32>
    %64 = vector.broadcast %20 : vector<32x1xf32> to vector<32x32xf32>
    %65 = arith.mulf %63, %64 : vector<32x32xf32>
    %c0_23 = arith.constant 0 : index
    %c0_24 = arith.constant 0 : index
    %c0_25 = arith.constant 0 : index
    %66 = vector.load %arg4[%c0_23, %c0_24, %c0_25] : memref<3x32x32xbf16, #tpu.memory_space<vmem>>, vector<1x32x32xbf16>
    %67 = vector.shape_cast %66 : vector<1x32x32xbf16> to vector<32x32xbf16>
    %68 = arith.truncf %65 : vector<32x32xf32> to vector<32x32xbf16>
    %cst_26 = arith.constant dense<0.000000e+00> : vector<32x32xf32>
    %69 = tpu.matmul %68, %67, %cst_26 {dimension_numbers = #tpu.dot_dimension_numbers<[1], [0], [0], [1], [0, 0, 1, 1], [], []>} : vector<32x32xbf16>, vector<32x32xbf16>, vector<32x32xf32> -> vector<32x32xf32>
    %c1_27 = arith.constant 1 : index
    %c0_28 = arith.constant 0 : index
    %c0_29 = arith.constant 0 : index
    %70 = vector.load %arg4[%c1_27, %c0_28, %c0_29] : memref<3x32x32xbf16, #tpu.memory_space<vmem>>, vector<1x32x32xbf16>
    %71 = vector.shape_cast %70 : vector<1x32x32xbf16> to vector<32x32xbf16>
    %72 = arith.truncf %62 : vector<32x32xf32> to vector<32x32xbf16>
    %cst_30 = arith.constant dense<0.000000e+00> : vector<32x32xf32>
    %73 = tpu.matmul %72, %71, %cst_30 {dimension_numbers = #tpu.dot_dimension_numbers<[1], [0], [0], [1], [0, 0, 1, 1], [], []>} : vector<32x32xbf16>, vector<32x32xbf16>, vector<32x32xf32> -> vector<32x32xf32>
    %74 = arith.addf %69, %73 : vector<32x32xf32>
    %c31_i32_31 = arith.constant 31 : i32
    %75 = tpu.dynamic_rotate %62 by %c31_i32_31 dim 0 : vector<32x32xf32>, i32 -> vector<32x32xf32>
    %76 = vector.broadcast %24 : vector<32x1xf32> to vector<32x32xf32>
    %77 = arith.mulf %75, %76 : vector<32x32xf32>
    %c2_32 = arith.constant 2 : index
    %c0_33 = arith.constant 0 : index
    %c0_34 = arith.constant 0 : index
    %78 = vector.load %arg4[%c2_32, %c0_33, %c0_34] : memref<3x32x32xbf16, #tpu.memory_space<vmem>>, vector<1x32x32xbf16>
    %79 = vector.shape_cast %78 : vector<1x32x32xbf16> to vector<32x32xbf16>
    %80 = arith.truncf %77 : vector<32x32xf32> to vector<32x32xbf16>
    %cst_35 = arith.constant dense<0.000000e+00> : vector<32x32xf32>
    %81 = tpu.matmul %80, %79, %cst_35 {dimension_numbers = #tpu.dot_dimension_numbers<[1], [0], [0], [1], [0, 0, 1, 1], [], []>} : vector<32x32xbf16>, vector<32x32xbf16>, vector<32x32xf32> -> vector<32x32xf32>
    %82 = arith.addf %74, %81 : vector<32x32xf32>
    %c0_36 = arith.constant 0 : index
    %c0_37 = arith.constant 0 : index
    %83 = vector.load %arg24[%c0_36, %c0_37] : memref<32x32xf32, #tpu.memory_space<vmem>>, vector<32x32xf32>
    tpu.vector_store %arg24[%c0_36, %c0_37], %82 {strides = array<i32>} : memref<32x32xf32, #tpu.memory_space<vmem>>, vector<32x32xf32>,
    %c0_38 = arith.constant 0 : index
    %c0_39 = arith.constant 0 : index
    %84 = tpu.strided_load %arg24[%c0_38, %c0_39] {strides = array<i32: 2, 1>} : memref<32x32xf32, #tpu.memory_space<vmem>>, vector<16x32xf32>
    %c0_40 = arith.constant 0 : index
    %c0_41 = arith.constant 0 : index
    %85 = vector.load %arg6[%c0_40, %c0_41] : memref<8x32xf32, #tpu.memory_space<vmem>>, vector<8x32xf32>
    %86 = tpu.concatenate %85, %85 in 0 : vector<8x32xf32>, vector<8x32xf32> -> vector<16x32xf32>
    %c0_42 = arith.constant 0 : index
    %c0_43 = arith.constant 0 : index
    %87 = vector.load %arg5[%c0_42, %c0_43] : memref<1x32xf32, #tpu.memory_space<vmem>>, vector<1x32xf32>
    %88 = vector.broadcast %87 : vector<1x32xf32> to vector<16x32xf32>
    %89 = arith.addf %84, %88 : vector<16x32xf32>
    %90 = arith.mulf %89, %89 : vector<16x32xf32>
    %91 = arith.mulf %89, %90 : vector<16x32xf32>
    %cst_44 = arith.constant 4.471500e-02 : f32
    %92 = vector.broadcast %cst_44 : f32 to vector<16x32xf32>
    %93 = arith.mulf %92, %91 : vector<16x32xf32>
    %94 = arith.addf %89, %93 : vector<16x32xf32>
    %cst_45 = arith.constant 0.797884583 : f32
    %95 = vector.broadcast %cst_45 : f32 to vector<16x32xf32>
    %96 = arith.mulf %95, %94 : vector<16x32xf32>
    %97 = math.tanh %96 : vector<16x32xf32>
    %cst_46 = arith.constant 1.000000e+00 : f32
    %98 = vector.broadcast %cst_46 : f32 to vector<16x32xf32>
    %99 = arith.addf %98, %97 : vector<16x32xf32>
    %cst_47 = arith.constant 5.000000e-01 : f32
    %100 = vector.broadcast %cst_47 : f32 to vector<16x32xf32>
    %101 = arith.mulf %100, %99 : vector<16x32xf32>
    %102 = arith.mulf %89, %101 : vector<16x32xf32>
    %103 = arith.addf %102, %86 : vector<16x32xf32>
    %c0_48 = arith.constant 0 : index
    %c0_49 = arith.constant 0 : index
    %c0_50 = arith.constant 0 : index
    %104 = vector.load %arg7[%c0_48, %c0_49, %c0_50] : memref<2x2x32xf32, #tpu.memory_space<vmem>>, vector<1x2x32xf32>
    %105 = vector.shape_cast %104 : vector<1x2x32xf32> to vector<2x32xf32>
    %106 = vector.extract_strided_slice %105 {offsets = [0, 0], sizes = [1, 32], strides = [1, 1]} : vector<2x32xf32> to vector<1x32xf32>
    %107 = vector.extract_strided_slice %105 {offsets = [1, 0], sizes = [1, 32], strides = [1, 1]} : vector<2x32xf32> to vector<1x32xf32>
    %cst_51 = arith.constant dense<0.000000e+00> : vector<16xf32>
    %108 = vector.multi_reduction <add>, %103, %cst_51 [1] : vector<16x32xf32> to vector<16xf32>
    %109 = vector.shape_cast %108 : vector<16xf32> to vector<16x1xf32>
    %cst_52 = arith.constant 3.200000e+01 : f32
    %110 = vector.broadcast %cst_52 : f32 to vector<16x1xf32>
    %111 = arith.divf %109, %110 : vector<16x1xf32>
    %112 = vector.broadcast %111 : vector<16x1xf32> to vector<16x32xf32>
    %113 = arith.subf %103, %112 : vector<16x32xf32>
    %114 = arith.mulf %113, %113 : vector<16x32xf32>
    %cst_53 = arith.constant dense<0.000000e+00> : vector<16xf32>
    %115 = vector.multi_reduction <add>, %114, %cst_53 [1] : vector<16x32xf32> to vector<16xf32>
    %116 = vector.shape_cast %115 : vector<16xf32> to vector<16x1xf32>
    %cst_54 = arith.constant 3.200000e+01 : f32
    %117 = vector.broadcast %cst_54 : f32 to vector<16x1xf32>
    %118 = arith.divf %116, %117 : vector<16x1xf32>
    %119 = vector.broadcast %111 : vector<16x1xf32> to vector<16x32xf32>
    %120 = arith.subf %103, %119 : vector<16x32xf32>
    %cst_55 = arith.constant 9.99999974E-6 : f32
    %121 = vector.broadcast %cst_55 : f32 to vector<16x1xf32>
    %122 = arith.addf %118, %121 : vector<16x1xf32>
    %123 = math.rsqrt %122 : vector<16x1xf32>
    %124 = vector.broadcast %123 : vector<16x1xf32> to vector<16x32xf32>
    %125 = arith.mulf %120, %124 : vector<16x32xf32>
    %126 = vector.broadcast %106 : vector<1x32xf32> to vector<16x32xf32>
    %127 = arith.mulf %125, %126 : vector<16x32xf32>
    %128 = vector.broadcast %107 : vector<1x32xf32> to vector<16x32xf32>
    %129 = arith.addf %127, %128 : vector<16x32xf32>
    %c0_56 = arith.constant 0 : index
    %c0_57 = arith.constant 0 : index
    %c0_58 = arith.constant 0 : index
    %130 = vector.load %arg8[%c0_56, %c0_57, %c0_58] : memref<2x32x32xbf16, #tpu.memory_space<vmem>>, vector<1x32x32xbf16>
    %131 = vector.shape_cast %130 : vector<1x32x32xbf16> to vector<32x32xbf16>
    %132 = arith.truncf %129 : vector<16x32xf32> to vector<16x32xbf16>
    %cst_59 = arith.constant dense<0.000000e+00> : vector<16x32xf32>
    %133 = tpu.matmul %132, %131, %cst_59 {dimension_numbers = #tpu.dot_dimension_numbers<[1], [0], [0], [1], [0, 0, 1, 1], [], []>} : vector<16x32xbf16>, vector<32x32xbf16>, vector<16x32xf32> -> vector<16x32xf32>
    %c0_60 = arith.constant 0 : index
    %c0_61 = arith.constant 0 : index
    %c0_62 = arith.constant 0 : index
    %134 = vector.load %arg9[%c0_60, %c0_61, %c0_62] : memref<2x1x32xf32, #tpu.memory_space<vmem>>, vector<1x1x32xf32>
    %135 = vector.shape_cast %134 : vector<1x1x32xf32> to vector<1x32xf32>
    %136 = vector.broadcast %135 : vector<1x32xf32> to vector<16x32xf32>
    %137 = arith.addf %133, %136 : vector<16x32xf32>
    %138 = vector.shape_cast %137 : vector<16x32xf32> to vector<2x8x32xf32>
    %c0_63 = arith.constant 0 : index
    %c0_64 = arith.constant 0 : index
    %c0_65 = arith.constant 0 : index
    %139 = vector.load %arg10[%c0_63, %c0_64, %c0_65] : memref<2x32x32xbf16, #tpu.memory_space<vmem>>, vector<1x32x32xbf16>
    %140 = vector.shape_cast %139 : vector<1x32x32xbf16> to vector<32x32xbf16>
    %141 = arith.truncf %129 : vector<16x32xf32> to vector<16x32xbf16>
    %cst_66 = arith.constant dense<0.000000e+00> : vector<16x32xf32>
    %142 = tpu.matmul %141, %140, %cst_66 {dimension_numbers = #tpu.dot_dimension_numbers<[1], [0], [0], [1], [0, 0, 1, 1], [], []>} : vector<16x32xbf16>, vector<32x32xbf16>, vector<16x32xf32> -> vector<16x32xf32>
    %143 = vector.shape_cast %142 : vector<16x32xf32> to vector<2x8x32xf32>
    %c0_67 = arith.constant 0 : index
    %c0_68 = arith.constant 0 : index
    %c0_69 = arith.constant 0 : index
    %144 = vector.load %arg11[%c0_67, %c0_68, %c0_69] : memref<2x32x32xbf16, #tpu.memory_space<vmem>>, vector<1x32x32xbf16>
    %145 = vector.shape_cast %144 : vector<1x32x32xbf16> to vector<32x32xbf16>
    %146 = arith.truncf %129 : vector<16x32xf32> to vector<16x32xbf16>
    %cst_70 = arith.constant dense<0.000000e+00> : vector<16x32xf32>
    %147 = tpu.matmul %146, %145, %cst_70 {dimension_numbers = #tpu.dot_dimension_numbers<[1], [0], [0], [1], [0, 0, 1, 1], [], []>} : vector<16x32xbf16>, vector<32x32xbf16>, vector<16x32xf32> -> vector<16x32xf32>
    %c0_71 = arith.constant 0 : index
    %c0_72 = arith.constant 0 : index
    %c0_73 = arith.constant 0 : index
    %148 = vector.load %arg12[%c0_71, %c0_72, %c0_73] : memref<2x1x32xf32, #tpu.memory_space<vmem>>, vector<1x1x32xf32>
    %149 = vector.shape_cast %148 : vector<1x1x32xf32> to vector<1x32xf32>
    %150 = vector.broadcast %149 : vector<1x32xf32> to vector<16x32xf32>
    %151 = arith.addf %147, %150 : vector<16x32xf32>
    %152 = vector.shape_cast %151 : vector<16x32xf32> to vector<2x8x32xf32>
    %153 = vector.extract_strided_slice %138 {offsets = [0, 0, 0], sizes = [2, 8, 8], strides = [1, 1, 1]} : vector<2x8x32xf32> to vector<2x8x8xf32>
    %154 = vector.extract_strided_slice %143 {offsets = [0, 0, 0], sizes = [2, 8, 8], strides = [1, 1, 1]} : vector<2x8x32xf32> to vector<2x8x8xf32>
    %155 = vector.extract_strided_slice %152 {offsets = [0, 0, 0], sizes = [2, 8, 8], strides = [1, 1, 1]} : vector<2x8x32xf32> to vector<2x8x8xf32>
    %156 = arith.truncf %153 : vector<2x8x8xf32> to vector<2x8x8xbf16>
    %157 = arith.truncf %154 : vector<2x8x8xf32> to vector<2x8x8xbf16>
    "tpu.trace_start"() <{level = 10 : i32, message = "bqd,bkd->bqk"}> : () -> ()
    %cst_74 = arith.constant dense<0.000000e+00> : vector<2x8x8xf32>
    %158 = tpu.matmul %156, %157, %cst_74 {dimension_numbers = #tpu.dot_dimension_numbers<[2], [2], [1], [1], [0, 0, 0, 1, 1, 1], [0], [0]>} : vector<2x8x8xbf16>, vector<2x8x8xbf16>, vector<2x8x8xf32> -> vector<2x8x8xf32>
    "tpu.trace_stop"() : () -> ()
    %cst_75 = arith.constant dense<0xFF800000> : vector<2x8xf32>
    %159 = vector.multi_reduction <maximumf>, %158, %cst_75 [2] : vector<2x8x8xf32> to vector<2x8xf32>
    %160 = vector.shape_cast %159 : vector<2x8xf32> to vector<2x8x1xf32>
    %161 = vector.broadcast %160 : vector<2x8x1xf32> to vector<2x8x8xf32>
    %162 = arith.subf %158, %161 : vector<2x8x8xf32>
    %163 = math.exp %162 : vector<2x8x8xf32>
    %cst_76 = arith.constant dense<0.000000e+00> : vector<2x8xf32>
    %164 = vector.multi_reduction <add>, %163, %cst_76 [2] : vector<2x8x8xf32> to vector<2x8xf32>
    %165 = vector.shape_cast %164 : vector<2x8xf32> to vector<2x8x1xf32>
    %166 = tpu.reciprocal %165 {approx = true} : vector<2x8x1xf32> -> vector<2x8x1xf32>
    %167 = vector.broadcast %166 : vector<2x8x1xf32> to vector<2x8x8xf32>
    %168 = arith.mulf %163, %167 : vector<2x8x8xf32>
    %169 = arith.truncf %168 : vector<2x8x8xf32> to vector<2x8x8xbf16>
    %170 = arith.truncf %155 : vector<2x8x8xf32> to vector<2x8x8xbf16>
    "tpu.trace_start"() <{level = 10 : i32, message = "bqk,bkd->bqd"}> : () -> ()
    %cst_77 = arith.constant dense<0.000000e+00> : vector<2x8x8xf32>
    %171 = tpu.matmul %169, %170, %cst_77 {dimension_numbers = #tpu.dot_dimension_numbers<[2], [1], [1], [2], [0, 0, 0, 1, 1, 2], [0], [0]>} : vector<2x8x8xbf16>, vector<2x8x8xbf16>, vector<2x8x8xf32> -> vector<2x8x8xf32>
    "tpu.trace_stop"() : () -> ()
    %172 = vector.extract_strided_slice %138 {offsets = [0, 0, 8], sizes = [2, 8, 8], strides = [1, 1, 1]} : vector<2x8x32xf32> to vector<2x8x8xf32>
    %173 = vector.extract_strided_slice %143 {offsets = [0, 0, 8], sizes = [2, 8, 8], strides = [1, 1, 1]} : vector<2x8x32xf32> to vector<2x8x8xf32>
    %174 = vector.extract_strided_slice %152 {offsets = [0, 0, 8], sizes = [2, 8, 8], strides = [1, 1, 1]} : vector<2x8x32xf32> to vector<2x8x8xf32>
    %175 = arith.truncf %172 : vector<2x8x8xf32> to vector<2x8x8xbf16>
    %176 = arith.truncf %173 : vector<2x8x8xf32> to vector<2x8x8xbf16>
    "tpu.trace_start"() <{level = 10 : i32, message = "bqd,bkd->bqk"}> : () -> ()
    %cst_78 = arith.constant dense<0.000000e+00> : vector<2x8x8xf32>
    %177 = tpu.matmul %175, %176, %cst_78 {dimension_numbers = #tpu.dot_dimension_numbers<[2], [2], [1], [1], [0, 0, 0, 1, 1, 1], [0], [0]>} : vector<2x8x8xbf16>, vector<2x8x8xbf16>, vector<2x8x8xf32> -> vector<2x8x8xf32>
    "tpu.trace_stop"() : () -> ()
    %cst_79 = arith.constant dense<0xFF800000> : vector<2x8xf32>
    %178 = vector.multi_reduction <maximumf>, %177, %cst_79 [2] : vector<2x8x8xf32> to vector<2x8xf32>
    %179 = vector.shape_cast %178 : vector<2x8xf32> to vector<2x8x1xf32>
    %180 = vector.broadcast %179 : vector<2x8x1xf32> to vector<2x8x8xf32>
    %181 = arith.subf %177, %180 : vector<2x8x8xf32>
    %182 = math.exp %181 : vector<2x8x8xf32>
    %cst_80 = arith.constant dense<0.000000e+00> : vector<2x8xf32>
    %183 = vector.multi_reduction <add>, %182, %cst_80 [2] : vector<2x8x8xf32> to vector<2x8xf32>
    %184 = vector.shape_cast %183 : vector<2x8xf32> to vector<2x8x1xf32>
    %185 = tpu.reciprocal %184 {approx = true} : vector<2x8x1xf32> -> vector<2x8x1xf32>
    %186 = vector.broadcast %185 : vector<2x8x1xf32> to vector<2x8x8xf32>
    %187 = arith.mulf %182, %186 : vector<2x8x8xf32>
    %188 = arith.truncf %187 : vector<2x8x8xf32> to vector<2x8x8xbf16>
    %189 = arith.truncf %174 : vector<2x8x8xf32> to vector<2x8x8xbf16>
    "tpu.trace_start"() <{level = 10 : i32, message = "bqk,bkd->bqd"}> : () -> ()
    %cst_81 = arith.constant dense<0.000000e+00> : vector<2x8x8xf32>
    %190 = tpu.matmul %188, %189, %cst_81 {dimension_numbers = #tpu.dot_dimension_numbers<[2], [1], [1], [2], [0, 0, 0, 1, 1, 2], [0], [0]>} : vector<2x8x8xbf16>, vector<2x8x8xbf16>, vector<2x8x8xf32> -> vector<2x8x8xf32>
    "tpu.trace_stop"() : () -> ()
    %191 = vector.extract_strided_slice %138 {offsets = [0, 0, 16], sizes = [2, 8, 8], strides = [1, 1, 1]} : vector<2x8x32xf32> to vector<2x8x8xf32>
    %192 = vector.extract_strided_slice %143 {offsets = [0, 0, 16], sizes = [2, 8, 8], strides = [1, 1, 1]} : vector<2x8x32xf32> to vector<2x8x8xf32>
    %193 = vector.extract_strided_slice %152 {offsets = [0, 0, 16], sizes = [2, 8, 8], strides = [1, 1, 1]} : vector<2x8x32xf32> to vector<2x8x8xf32>
    %194 = arith.truncf %191 : vector<2x8x8xf32> to vector<2x8x8xbf16>
    %195 = arith.truncf %192 : vector<2x8x8xf32> to vector<2x8x8xbf16>
    "tpu.trace_start"() <{level = 10 : i32, message = "bqd,bkd->bqk"}> : () -> ()
    %cst_82 = arith.constant dense<0.000000e+00> : vector<2x8x8xf32>
    %196 = tpu.matmul %194, %195, %cst_82 {dimension_numbers = #tpu.dot_dimension_numbers<[2], [2], [1], [1], [0, 0, 0, 1, 1, 1], [0], [0]>} : vector<2x8x8xbf16>, vector<2x8x8xbf16>, vector<2x8x8xf32> -> vector<2x8x8xf32>
    "tpu.trace_stop"() : () -> ()
    %cst_83 = arith.constant dense<0xFF800000> : vector<2x8xf32>
    %197 = vector.multi_reduction <maximumf>, %196, %cst_83 [2] : vector<2x8x8xf32> to vector<2x8xf32>
    %198 = vector.shape_cast %197 : vector<2x8xf32> to vector<2x8x1xf32>
    %199 = vector.broadcast %198 : vector<2x8x1xf32> to vector<2x8x8xf32>
    %200 = arith.subf %196, %199 : vector<2x8x8xf32>
    %201 = math.exp %200 : vector<2x8x8xf32>
    %cst_84 = arith.constant dense<0.000000e+00> : vector<2x8xf32>
    %202 = vector.multi_reduction <add>, %201, %cst_84 [2] : vector<2x8x8xf32> to vector<2x8xf32>
    %203 = vector.shape_cast %202 : vector<2x8xf32> to vector<2x8x1xf32>
    %204 = tpu.reciprocal %203 {approx = true} : vector<2x8x1xf32> -> vector<2x8x1xf32>
    %205 = vector.broadcast %204 : vector<2x8x1xf32> to vector<2x8x8xf32>
    %206 = arith.mulf %201, %205 : vector<2x8x8xf32>
    %207 = arith.truncf %206 : vector<2x8x8xf32> to vector<2x8x8xbf16>
    %208 = arith.truncf %193 : vector<2x8x8xf32> to vector<2x8x8xbf16>
    "tpu.trace_start"() <{level = 10 : i32, message = "bqk,bkd->bqd"}> : () -> ()
    %cst_85 = arith.constant dense<0.000000e+00> : vector<2x8x8xf32>
    %209 = tpu.matmul %207, %208, %cst_85 {dimension_numbers = #tpu.dot_dimension_numbers<[2], [1], [1], [2], [0, 0, 0, 1, 1, 2], [0], [0]>} : vector<2x8x8xbf16>, vector<2x8x8xbf16>, vector<2x8x8xf32> -> vector<2x8x8xf32>
    "tpu.trace_stop"() : () -> ()
    %210 = vector.extract_strided_slice %138 {offsets = [0, 0, 24], sizes = [2, 8, 8], strides = [1, 1, 1]} : vector<2x8x32xf32> to vector<2x8x8xf32>
    %211 = vector.extract_strided_slice %143 {offsets = [0, 0, 24], sizes = [2, 8, 8], strides = [1, 1, 1]} : vector<2x8x32xf32> to vector<2x8x8xf32>
    %212 = vector.extract_strided_slice %152 {offsets = [0, 0, 24], sizes = [2, 8, 8], strides = [1, 1, 1]} : vector<2x8x32xf32> to vector<2x8x8xf32>
    %213 = arith.truncf %210 : vector<2x8x8xf32> to vector<2x8x8xbf16>
    %214 = arith.truncf %211 : vector<2x8x8xf32> to vector<2x8x8xbf16>
    "tpu.trace_start"() <{level = 10 : i32, message = "bqd,bkd->bqk"}> : () -> ()
    %cst_86 = arith.constant dense<0.000000e+00> : vector<2x8x8xf32>
    %215 = tpu.matmul %213, %214, %cst_86 {dimension_numbers = #tpu.dot_dimension_numbers<[2], [2], [1], [1], [0, 0, 0, 1, 1, 1], [0], [0]>} : vector<2x8x8xbf16>, vector<2x8x8xbf16>, vector<2x8x8xf32> -> vector<2x8x8xf32>
    "tpu.trace_stop"() : () -> ()
    %cst_87 = arith.constant dense<0xFF800000> : vector<2x8xf32>
    %216 = vector.multi_reduction <maximumf>, %215, %cst_87 [2] : vector<2x8x8xf32> to vector<2x8xf32>
    %217 = vector.shape_cast %216 : vector<2x8xf32> to vector<2x8x1xf32>
    %218 = vector.broadcast %217 : vector<2x8x1xf32> to vector<2x8x8xf32>
    %219 = arith.subf %215, %218 : vector<2x8x8xf32>
    %220 = math.exp %219 : vector<2x8x8xf32>
    %cst_88 = arith.constant dense<0.000000e+00> : vector<2x8xf32>
    %221 = vector.multi_reduction <add>, %220, %cst_88 [2] : vector<2x8x8xf32> to vector<2x8xf32>
    %222 = vector.shape_cast %221 : vector<2x8xf32> to vector<2x8x1xf32>
    %223 = tpu.reciprocal %222 {approx = true} : vector<2x8x1xf32> -> vector<2x8x1xf32>
    %224 = vector.broadcast %223 : vector<2x8x1xf32> to vector<2x8x8xf32>
    %225 = arith.mulf %220, %224 : vector<2x8x8xf32>
    %226 = arith.truncf %225 : vector<2x8x8xf32> to vector<2x8x8xbf16>
    %227 = arith.truncf %212 : vector<2x8x8xf32> to vector<2x8x8xbf16>
    "tpu.trace_start"() <{level = 10 : i32, message = "bqk,bkd->bqd"}> : () -> ()
    %cst_89 = arith.constant dense<0.000000e+00> : vector<2x8x8xf32>
    %228 = tpu.matmul %226, %227, %cst_89 {dimension_numbers = #tpu.dot_dimension_numbers<[2], [1], [1], [2], [0, 0, 0, 1, 1, 2], [0], [0]>} : vector<2x8x8xbf16>, vector<2x8x8xbf16>, vector<2x8x8xf32> -> vector<2x8x8xf32>
    "tpu.trace_stop"() : () -> ()
    %229 = tpu.concatenate %171, %190, %209, %228 in 2 : vector<2x8x8xf32>, vector<2x8x8xf32>, vector<2x8x8xf32>, vector<2x8x8xf32> -> vector<2x8x32xf32>
    %230 = vector.shape_cast %229 : vector<2x8x32xf32> to vector<16x32xf32>
    %c0_90 = arith.constant 0 : index
    %c0_91 = arith.constant 0 : index
    %c0_92 = arith.constant 0 : index
    %231 = vector.load %arg13[%c0_90, %c0_91, %c0_92] : memref<2x32x32xbf16, #tpu.memory_space<vmem>>, vector<1x32x32xbf16>
    %232 = vector.shape_cast %231 : vector<1x32x32xbf16> to vector<32x32xbf16>
    %233 = arith.truncf %230 : vector<16x32xf32> to vector<16x32xbf16>
    %cst_93 = arith.constant dense<0.000000e+00> : vector<16x32xf32>
    %234 = tpu.matmul %233, %232, %cst_93 {dimension_numbers = #tpu.dot_dimension_numbers<[1], [0], [0], [1], [0, 0, 1, 1], [], []>} : vector<16x32xbf16>, vector<32x32xbf16>, vector<16x32xf32> -> vector<16x32xf32>
    %235 = arith.addf %103, %234 : vector<16x32xf32>
    %c0_94 = arith.constant 0 : index
    %c0_95 = arith.constant 0 : index
    %c0_96 = arith.constant 0 : index
    %236 = vector.load %arg14[%c0_94, %c0_95, %c0_96] : memref<2x1x32xf32, #tpu.memory_space<vmem>>, vector<1x1x32xf32>
    %237 = vector.shape_cast %236 : vector<1x1x32xf32> to vector<1x32xf32>
    %238 = vector.broadcast %237 : vector<1x32xf32> to vector<16x32xf32>
    %239 = arith.addf %235, %238 : vector<16x32xf32>
    %c0_97 = arith.constant 0 : index
    %c0_98 = arith.constant 0 : index
    %c0_99 = arith.constant 0 : index
    %240 = vector.load %arg15[%c0_97, %c0_98, %c0_99] : memref<2x2x32xf32, #tpu.memory_space<vmem>>, vector<1x2x32xf32>
    %241 = vector.shape_cast %240 : vector<1x2x32xf32> to vector<2x32xf32>
    %242 = vector.extract_strided_slice %241 {offsets = [0, 0], sizes = [1, 32], strides = [1, 1]} : vector<2x32xf32> to vector<1x32xf32>
    %243 = vector.extract_strided_slice %241 {offsets = [1, 0], sizes = [1, 32], strides = [1, 1]} : vector<2x32xf32> to vector<1x32xf32>
    %cst_100 = arith.constant dense<0.000000e+00> : vector<16xf32>
    %244 = vector.multi_reduction <add>, %239, %cst_100 [1] : vector<16x32xf32> to vector<16xf32>
    %245 = vector.shape_cast %244 : vector<16xf32> to vector<16x1xf32>
    %cst_101 = arith.constant 3.200000e+01 : f32
    %246 = vector.broadcast %cst_101 : f32 to vector<16x1xf32>
    %247 = arith.divf %245, %246 : vector<16x1xf32>
    %248 = vector.broadcast %247 : vector<16x1xf32> to vector<16x32xf32>
    %249 = arith.subf %239, %248 : vector<16x32xf32>
    %250 = arith.mulf %249, %249 : vector<16x32xf32>
    %cst_102 = arith.constant dense<0.000000e+00> : vector<16xf32>
    %251 = vector.multi_reduction <add>, %250, %cst_102 [1] : vector<16x32xf32> to vector<16xf32>
    %252 = vector.shape_cast %251 : vector<16xf32> to vector<16x1xf32>
    %cst_103 = arith.constant 3.200000e+01 : f32
    %253 = vector.broadcast %cst_103 : f32 to vector<16x1xf32>
    %254 = arith.divf %252, %253 : vector<16x1xf32>
    %255 = vector.broadcast %247 : vector<16x1xf32> to vector<16x32xf32>
    %256 = arith.subf %239, %255 : vector<16x32xf32>
    %cst_104 = arith.constant 9.99999974E-6 : f32
    %257 = vector.broadcast %cst_104 : f32 to vector<16x1xf32>
    %258 = arith.addf %254, %257 : vector<16x1xf32>
    %259 = math.rsqrt %258 : vector<16x1xf32>
    %260 = vector.broadcast %259 : vector<16x1xf32> to vector<16x32xf32>
    %261 = arith.mulf %256, %260 : vector<16x32xf32>
    %262 = vector.broadcast %242 : vector<1x32xf32> to vector<16x32xf32>
    %263 = arith.mulf %261, %262 : vector<16x32xf32>
    %264 = vector.broadcast %243 : vector<1x32xf32> to vector<16x32xf32>
    %265 = arith.addf %263, %264 : vector<16x32xf32>
    %c0_105 = arith.constant 0 : index
    %c0_106 = arith.constant 0 : index
    %c0_107 = arith.constant 0 : index
    %266 = vector.load %arg16[%c0_105, %c0_106, %c0_107] : memref<2x32x64xbf16, #tpu.memory_space<vmem>>, vector<1x32x64xbf16>
    %267 = vector.shape_cast %266 : vector<1x32x64xbf16> to vector<32x64xbf16>
    %268 = arith.truncf %265 : vector<16x32xf32> to vector<16x32xbf16>
    %cst_108 = arith.constant dense<0.000000e+00> : vector<16x64xf32>
    %269 = tpu.matmul %268, %267, %cst_108 {dimension_numbers = #tpu.dot_dimension_numbers<[1], [0], [0], [1], [0, 0, 1, 1], [], []>} : vector<16x32xbf16>, vector<32x64xbf16>, vector<16x64xf32> -> vector<16x64xf32>
    %c0_109 = arith.constant 0 : index
    %c0_110 = arith.constant 0 : index
    %c0_111 = arith.constant 0 : index
    %270 = vector.load %arg17[%c0_109, %c0_110, %c0_111] : memref<2x1x64xf32, #tpu.memory_space<vmem>>, vector<1x1x64xf32>
    %271 = vector.shape_cast %270 : vector<1x1x64xf32> to vector<1x64xf32>
    %272 = vector.broadcast %271 : vector<1x64xf32> to vector<16x64xf32>
    %273 = arith.addf %269, %272 : vector<16x64xf32>
    %274 = arith.mulf %273, %273 : vector<16x64xf32>
    %275 = arith.mulf %273, %274 : vector<16x64xf32>
    %cst_112 = arith.constant 4.471500e-02 : f32
    %276 = vector.broadcast %cst_112 : f32 to vector<16x64xf32>
    %277 = arith.mulf %276, %275 : vector<16x64xf32>
    %278 = arith.addf %273, %277 : vector<16x64xf32>
    %cst_113 = arith.constant 0.797884583 : f32
    %279 = vector.broadcast %cst_113 : f32 to vector<16x64xf32>
    %280 = arith.mulf %279, %278 : vector<16x64xf32>
    %281 = math.tanh %280 : vector<16x64xf32>
    %cst_114 = arith.constant 1.000000e+00 : f32
    %282 = vector.broadcast %cst_114 : f32 to vector<16x64xf32>
    %283 = arith.addf %282, %281 : vector<16x64xf32>
    %cst_115 = arith.constant 5.000000e-01 : f32
    %284 = vector.broadcast %cst_115 : f32 to vector<16x64xf32>
    %285 = arith.mulf %284, %283 : vector<16x64xf32>
    %286 = arith.mulf %273, %285 : vector<16x64xf32>
    %c0_116 = arith.constant 0 : index
    %c0_117 = arith.constant 0 : index
    %c0_118 = arith.constant 0 : index
    %287 = vector.load %arg18[%c0_116, %c0_117, %c0_118] : memref<2x64x32xbf16, #tpu.memory_space<vmem>>, vector<1x64x32xbf16>
    %288 = vector.shape_cast %287 : vector<1x64x32xbf16> to vector<64x32xbf16>
    %289 = arith.truncf %286 : vector<16x64xf32> to vector<16x64xbf16>
    %cst_119 = arith.constant dense<0.000000e+00> : vector<16x32xf32>
    %290 = tpu.matmul %289, %288, %cst_119 {dimension_numbers = #tpu.dot_dimension_numbers<[1], [0], [0], [1], [0, 0, 1, 1], [], []>} : vector<16x64xbf16>, vector<64x32xbf16>, vector<16x32xf32> -> vector<16x32xf32>
    %291 = arith.addf %239, %290 : vector<16x32xf32>
    %c0_120 = arith.constant 0 : index
    %c0_121 = arith.constant 0 : index
    %c0_122 = arith.constant 0 : index
    %292 = vector.load %arg19[%c0_120, %c0_121, %c0_122] : memref<2x1x32xf32, #tpu.memory_space<vmem>>, vector<1x1x32xf32>
    %293 = vector.shape_cast %292 : vector<1x1x32xf32> to vector<1x32xf32>
    %294 = vector.broadcast %293 : vector<1x32xf32> to vector<16x32xf32>
    %295 = arith.addf %291, %294 : vector<16x32xf32>
    %c1_123 = arith.constant 1 : index
    %c0_124 = arith.constant 0 : index
    %c0_125 = arith.constant 0 : index
    %296 = vector.load %arg7[%c1_123, %c0_124, %c0_125] : memref<2x2x32xf32, #tpu.memory_space<vmem>>, vector<1x2x32xf32>
    %297 = vector.shape_cast %296 : vector<1x2x32xf32> to vector<2x32xf32>
    %298 = vector.extract_strided_slice %297 {offsets = [0, 0], sizes = [1, 32], strides = [1, 1]} : vector<2x32xf32> to vector<1x32xf32>
    %299 = vector.extract_strided_slice %297 {offsets = [1, 0], sizes = [1, 32], strides = [1, 1]} : vector<2x32xf32> to vector<1x32xf32>
    %cst_126 = arith.constant dense<0.000000e+00> : vector<16xf32>
    %300 = vector.multi_reduction <add>, %295, %cst_126 [1] : vector<16x32xf32> to vector<16xf32>
    %301 = vector.shape_cast %300 : vector<16xf32> to vector<16x1xf32>
    %cst_127 = arith.constant 3.200000e+01 : f32
    %302 = vector.broadcast %cst_127 : f32 to vector<16x1xf32>
    %303 = arith.divf %301, %302 : vector<16x1xf32>
    %304 = vector.broadcast %303 : vector<16x1xf32> to vector<16x32xf32>
    %305 = arith.subf %295, %304 : vector<16x32xf32>
    %306 = arith.mulf %305, %305 : vector<16x32xf32>
    %cst_128 = arith.constant dense<0.000000e+00> : vector<16xf32>
    %307 = vector.multi_reduction <add>, %306, %cst_128 [1] : vector<16x32xf32> to vector<16xf32>
    %308 = vector.shape_cast %307 : vector<16xf32> to vector<16x1xf32>
    %cst_129 = arith.constant 3.200000e+01 : f32
    %309 = vector.broadcast %cst_129 : f32 to vector<16x1xf32>
    %310 = arith.divf %308, %309 : vector<16x1xf32>
    %311 = vector.broadcast %303 : vector<16x1xf32> to vector<16x32xf32>
    %312 = arith.subf %295, %311 : vector<16x32xf32>
    %cst_130 = arith.constant 9.99999974E-6 : f32
    %313 = vector.broadcast %cst_130 : f32 to vector<16x1xf32>
    %314 = arith.addf %310, %313 : vector<16x1xf32>
    %315 = math.rsqrt %314 : vector<16x1xf32>
    %316 = vector.broadcast %315 : vector<16x1xf32> to vector<16x32xf32>
    %317 = arith.mulf %312, %316 : vector<16x32xf32>
    %318 = vector.broadcast %298 : vector<1x32xf32> to vector<16x32xf32>
    %319 = arith.mulf %317, %318 : vector<16x32xf32>
    %320 = vector.broadcast %299 : vector<1x32xf32> to vector<16x32xf32>
    %321 = arith.addf %319, %320 : vector<16x32xf32>
    %c1_131 = arith.constant 1 : index
    %c0_132 = arith.constant 0 : index
    %c0_133 = arith.constant 0 : index
    %322 = vector.load %arg8[%c1_131, %c0_132, %c0_133] : memref<2x32x32xbf16, #tpu.memory_space<vmem>>, vector<1x32x32xbf16>
    %323 = vector.shape_cast %322 : vector<1x32x32xbf16> to vector<32x32xbf16>
    %324 = arith.truncf %321 : vector<16x32xf32> to vector<16x32xbf16>
    %cst_134 = arith.constant dense<0.000000e+00> : vector<16x32xf32>
    %325 = tpu.matmul %324, %323, %cst_134 {dimension_numbers = #tpu.dot_dimension_numbers<[1], [0], [0], [1], [0, 0, 1, 1], [], []>} : vector<16x32xbf16>, vector<32x32xbf16>, vector<16x32xf32> -> vector<16x32xf32>
    %c1_135 = arith.constant 1 : index
    %c0_136 = arith.constant 0 : index
    %c0_137 = arith.constant 0 : index
    %326 = vector.load %arg9[%c1_135, %c0_136, %c0_137] : memref<2x1x32xf32, #tpu.memory_space<vmem>>, vector<1x1x32xf32>
    %327 = vector.shape_cast %326 : vector<1x1x32xf32> to vector<1x32xf32>
    %328 = vector.broadcast %327 : vector<1x32xf32> to vector<16x32xf32>
    %329 = arith.addf %325, %328 : vector<16x32xf32>
    %330 = vector.shape_cast %329 : vector<16x32xf32> to vector<2x8x32xf32>
    %c1_138 = arith.constant 1 : index
    %c0_139 = arith.constant 0 : index
    %c0_140 = arith.constant 0 : index
    %331 = vector.load %arg10[%c1_138, %c0_139, %c0_140] : memref<2x32x32xbf16, #tpu.memory_space<vmem>>, vector<1x32x32xbf16>
    %332 = vector.shape_cast %331 : vector<1x32x32xbf16> to vector<32x32xbf16>
    %333 = arith.truncf %321 : vector<16x32xf32> to vector<16x32xbf16>
    %cst_141 = arith.constant dense<0.000000e+00> : vector<16x32xf32>
    %334 = tpu.matmul %333, %332, %cst_141 {dimension_numbers = #tpu.dot_dimension_numbers<[1], [0], [0], [1], [0, 0, 1, 1], [], []>} : vector<16x32xbf16>, vector<32x32xbf16>, vector<16x32xf32> -> vector<16x32xf32>
    %335 = vector.shape_cast %334 : vector<16x32xf32> to vector<2x8x32xf32>
    %c1_142 = arith.constant 1 : index
    %c0_143 = arith.constant 0 : index
    %c0_144 = arith.constant 0 : index
    %336 = vector.load %arg11[%c1_142, %c0_143, %c0_144] : memref<2x32x32xbf16, #tpu.memory_space<vmem>>, vector<1x32x32xbf16>
    %337 = vector.shape_cast %336 : vector<1x32x32xbf16> to vector<32x32xbf16>
    %338 = arith.truncf %321 : vector<16x32xf32> to vector<16x32xbf16>
    %cst_145 = arith.constant dense<0.000000e+00> : vector<16x32xf32>
    %339 = tpu.matmul %338, %337, %cst_145 {dimension_numbers = #tpu.dot_dimension_numbers<[1], [0], [0], [1], [0, 0, 1, 1], [], []>} : vector<16x32xbf16>, vector<32x32xbf16>, vector<16x32xf32> -> vector<16x32xf32>
    %c1_146 = arith.constant 1 : index
    %c0_147 = arith.constant 0 : index
    %c0_148 = arith.constant 0 : index
    %340 = vector.load %arg12[%c1_146, %c0_147, %c0_148] : memref<2x1x32xf32, #tpu.memory_space<vmem>>, vector<1x1x32xf32>
    %341 = vector.shape_cast %340 : vector<1x1x32xf32> to vector<1x32xf32>
    %342 = vector.broadcast %341 : vector<1x32xf32> to vector<16x32xf32>
    %343 = arith.addf %339, %342 : vector<16x32xf32>
    %344 = vector.shape_cast %343 : vector<16x32xf32> to vector<2x8x32xf32>
    %345 = vector.extract_strided_slice %330 {offsets = [0, 0, 0], sizes = [2, 8, 8], strides = [1, 1, 1]} : vector<2x8x32xf32> to vector<2x8x8xf32>
    %346 = vector.extract_strided_slice %335 {offsets = [0, 0, 0], sizes = [2, 8, 8], strides = [1, 1, 1]} : vector<2x8x32xf32> to vector<2x8x8xf32>
    %347 = vector.extract_strided_slice %344 {offsets = [0, 0, 0], sizes = [2, 8, 8], strides = [1, 1, 1]} : vector<2x8x32xf32> to vector<2x8x8xf32>
    %348 = arith.truncf %345 : vector<2x8x8xf32> to vector<2x8x8xbf16>
    %349 = arith.truncf %346 : vector<2x8x8xf32> to vector<2x8x8xbf16>
    "tpu.trace_start"() <{level = 10 : i32, message = "bqd,bkd->bqk"}> : () -> ()
    %cst_149 = arith.constant dense<0.000000e+00> : vector<2x8x8xf32>
    %350 = tpu.matmul %348, %349, %cst_149 {dimension_numbers = #tpu.dot_dimension_numbers<[2], [2], [1], [1], [0, 0, 0, 1, 1, 1], [0], [0]>} : vector<2x8x8xbf16>, vector<2x8x8xbf16>, vector<2x8x8xf32> -> vector<2x8x8xf32>
    "tpu.trace_stop"() : () -> ()
    %cst_150 = arith.constant dense<0xFF800000> : vector<2x8xf32>
    %351 = vector.multi_reduction <maximumf>, %350, %cst_150 [2] : vector<2x8x8xf32> to vector<2x8xf32>
    %352 = vector.shape_cast %351 : vector<2x8xf32> to vector<2x8x1xf32>
    %353 = vector.broadcast %352 : vector<2x8x1xf32> to vector<2x8x8xf32>
    %354 = arith.subf %350, %353 : vector<2x8x8xf32>
    %355 = math.exp %354 : vector<2x8x8xf32>
    %cst_151 = arith.constant dense<0.000000e+00> : vector<2x8xf32>
    %356 = vector.multi_reduction <add>, %355, %cst_151 [2] : vector<2x8x8xf32> to vector<2x8xf32>
    %357 = vector.shape_cast %356 : vector<2x8xf32> to vector<2x8x1xf32>
    %358 = tpu.reciprocal %357 {approx = true} : vector<2x8x1xf32> -> vector<2x8x1xf32>
    %359 = vector.broadcast %358 : vector<2x8x1xf32> to vector<2x8x8xf32>
    %360 = arith.mulf %355, %359 : vector<2x8x8xf32>
    %361 = arith.truncf %360 : vector<2x8x8xf32> to vector<2x8x8xbf16>
    %362 = arith.truncf %347 : vector<2x8x8xf32> to vector<2x8x8xbf16>
    "tpu.trace_start"() <{level = 10 : i32, message = "bqk,bkd->bqd"}> : () -> ()
    %cst_152 = arith.constant dense<0.000000e+00> : vector<2x8x8xf32>
    %363 = tpu.matmul %361, %362, %cst_152 {dimension_numbers = #tpu.dot_dimension_numbers<[2], [1], [1], [2], [0, 0, 0, 1, 1, 2], [0], [0]>} : vector<2x8x8xbf16>, vector<2x8x8xbf16>, vector<2x8x8xf32> -> vector<2x8x8xf32>
    "tpu.trace_stop"() : () -> ()
    %364 = vector.extract_strided_slice %330 {offsets = [0, 0, 8], sizes = [2, 8, 8], strides = [1, 1, 1]} : vector<2x8x32xf32> to vector<2x8x8xf32>
    %365 = vector.extract_strided_slice %335 {offsets = [0, 0, 8], sizes = [2, 8, 8], strides = [1, 1, 1]} : vector<2x8x32xf32> to vector<2x8x8xf32>
    %366 = vector.extract_strided_slice %344 {offsets = [0, 0, 8], sizes = [2, 8, 8], strides = [1, 1, 1]} : vector<2x8x32xf32> to vector<2x8x8xf32>
    %367 = arith.truncf %364 : vector<2x8x8xf32> to vector<2x8x8xbf16>
    %368 = arith.truncf %365 : vector<2x8x8xf32> to vector<2x8x8xbf16>
    "tpu.trace_start"() <{level = 10 : i32, message = "bqd,bkd->bqk"}> : () -> ()
    %cst_153 = arith.constant dense<0.000000e+00> : vector<2x8x8xf32>
    %369 = tpu.matmul %367, %368, %cst_153 {dimension_numbers = #tpu.dot_dimension_numbers<[2], [2], [1], [1], [0, 0, 0, 1, 1, 1], [0], [0]>} : vector<2x8x8xbf16>, vector<2x8x8xbf16>, vector<2x8x8xf32> -> vector<2x8x8xf32>
    "tpu.trace_stop"() : () -> ()
    %cst_154 = arith.constant dense<0xFF800000> : vector<2x8xf32>
    %370 = vector.multi_reduction <maximumf>, %369, %cst_154 [2] : vector<2x8x8xf32> to vector<2x8xf32>
    %371 = vector.shape_cast %370 : vector<2x8xf32> to vector<2x8x1xf32>
    %372 = vector.broadcast %371 : vector<2x8x1xf32> to vector<2x8x8xf32>
    %373 = arith.subf %369, %372 : vector<2x8x8xf32>
    %374 = math.exp %373 : vector<2x8x8xf32>
    %cst_155 = arith.constant dense<0.000000e+00> : vector<2x8xf32>
    %375 = vector.multi_reduction <add>, %374, %cst_155 [2] : vector<2x8x8xf32> to vector<2x8xf32>
    %376 = vector.shape_cast %375 : vector<2x8xf32> to vector<2x8x1xf32>
    %377 = tpu.reciprocal %376 {approx = true} : vector<2x8x1xf32> -> vector<2x8x1xf32>
    %378 = vector.broadcast %377 : vector<2x8x1xf32> to vector<2x8x8xf32>
    %379 = arith.mulf %374, %378 : vector<2x8x8xf32>
    %380 = arith.truncf %379 : vector<2x8x8xf32> to vector<2x8x8xbf16>
    %381 = arith.truncf %366 : vector<2x8x8xf32> to vector<2x8x8xbf16>
    "tpu.trace_start"() <{level = 10 : i32, message = "bqk,bkd->bqd"}> : () -> ()
    %cst_156 = arith.constant dense<0.000000e+00> : vector<2x8x8xf32>
    %382 = tpu.matmul %380, %381, %cst_156 {dimension_numbers = #tpu.dot_dimension_numbers<[2], [1], [1], [2], [0, 0, 0, 1, 1, 2], [0], [0]>} : vector<2x8x8xbf16>, vector<2x8x8xbf16>, vector<2x8x8xf32> -> vector<2x8x8xf32>
    "tpu.trace_stop"() : () -> ()
    %383 = vector.extract_strided_slice %330 {offsets = [0, 0, 16], sizes = [2, 8, 8], strides = [1, 1, 1]} : vector<2x8x32xf32> to vector<2x8x8xf32>
    %384 = vector.extract_strided_slice %335 {offsets = [0, 0, 16], sizes = [2, 8, 8], strides = [1, 1, 1]} : vector<2x8x32xf32> to vector<2x8x8xf32>
    %385 = vector.extract_strided_slice %344 {offsets = [0, 0, 16], sizes = [2, 8, 8], strides = [1, 1, 1]} : vector<2x8x32xf32> to vector<2x8x8xf32>
    %386 = arith.truncf %383 : vector<2x8x8xf32> to vector<2x8x8xbf16>
    %387 = arith.truncf %384 : vector<2x8x8xf32> to vector<2x8x8xbf16>
    "tpu.trace_start"() <{level = 10 : i32, message = "bqd,bkd->bqk"}> : () -> ()
    %cst_157 = arith.constant dense<0.000000e+00> : vector<2x8x8xf32>
    %388 = tpu.matmul %386, %387, %cst_157 {dimension_numbers = #tpu.dot_dimension_numbers<[2], [2], [1], [1], [0, 0, 0, 1, 1, 1], [0], [0]>} : vector<2x8x8xbf16>, vector<2x8x8xbf16>, vector<2x8x8xf32> -> vector<2x8x8xf32>
    "tpu.trace_stop"() : () -> ()
    %cst_158 = arith.constant dense<0xFF800000> : vector<2x8xf32>
    %389 = vector.multi_reduction <maximumf>, %388, %cst_158 [2] : vector<2x8x8xf32> to vector<2x8xf32>
    %390 = vector.shape_cast %389 : vector<2x8xf32> to vector<2x8x1xf32>
    %391 = vector.broadcast %390 : vector<2x8x1xf32> to vector<2x8x8xf32>
    %392 = arith.subf %388, %391 : vector<2x8x8xf32>
    %393 = math.exp %392 : vector<2x8x8xf32>
    %cst_159 = arith.constant dense<0.000000e+00> : vector<2x8xf32>
    %394 = vector.multi_reduction <add>, %393, %cst_159 [2] : vector<2x8x8xf32> to vector<2x8xf32>
    %395 = vector.shape_cast %394 : vector<2x8xf32> to vector<2x8x1xf32>
    %396 = tpu.reciprocal %395 {approx = true} : vector<2x8x1xf32> -> vector<2x8x1xf32>
    %397 = vector.broadcast %396 : vector<2x8x1xf32> to vector<2x8x8xf32>
    %398 = arith.mulf %393, %397 : vector<2x8x8xf32>
    %399 = arith.truncf %398 : vector<2x8x8xf32> to vector<2x8x8xbf16>
    %400 = arith.truncf %385 : vector<2x8x8xf32> to vector<2x8x8xbf16>
    "tpu.trace_start"() <{level = 10 : i32, message = "bqk,bkd->bqd"}> : () -> ()
    %cst_160 = arith.constant dense<0.000000e+00> : vector<2x8x8xf32>
    %401 = tpu.matmul %399, %400, %cst_160 {dimension_numbers = #tpu.dot_dimension_numbers<[2], [1], [1], [2], [0, 0, 0, 1, 1, 2], [0], [0]>} : vector<2x8x8xbf16>, vector<2x8x8xbf16>, vector<2x8x8xf32> -> vector<2x8x8xf32>
    "tpu.trace_stop"() : () -> ()
    %402 = vector.extract_strided_slice %330 {offsets = [0, 0, 24], sizes = [2, 8, 8], strides = [1, 1, 1]} : vector<2x8x32xf32> to vector<2x8x8xf32>
    %403 = vector.extract_strided_slice %335 {offsets = [0, 0, 24], sizes = [2, 8, 8], strides = [1, 1, 1]} : vector<2x8x32xf32> to vector<2x8x8xf32>
    %404 = vector.extract_strided_slice %344 {offsets = [0, 0, 24], sizes = [2, 8, 8], strides = [1, 1, 1]} : vector<2x8x32xf32> to vector<2x8x8xf32>
    %405 = arith.truncf %402 : vector<2x8x8xf32> to vector<2x8x8xbf16>
    %406 = arith.truncf %403 : vector<2x8x8xf32> to vector<2x8x8xbf16>
    "tpu.trace_start"() <{level = 10 : i32, message = "bqd,bkd->bqk"}> : () -> ()
    %cst_161 = arith.constant dense<0.000000e+00> : vector<2x8x8xf32>
    %407 = tpu.matmul %405, %406, %cst_161 {dimension_numbers = #tpu.dot_dimension_numbers<[2], [2], [1], [1], [0, 0, 0, 1, 1, 1], [0], [0]>} : vector<2x8x8xbf16>, vector<2x8x8xbf16>, vector<2x8x8xf32> -> vector<2x8x8xf32>
    "tpu.trace_stop"() : () -> ()
    %cst_162 = arith.constant dense<0xFF800000> : vector<2x8xf32>
    %408 = vector.multi_reduction <maximumf>, %407, %cst_162 [2] : vector<2x8x8xf32> to vector<2x8xf32>
    %409 = vector.shape_cast %408 : vector<2x8xf32> to vector<2x8x1xf32>
    %410 = vector.broadcast %409 : vector<2x8x1xf32> to vector<2x8x8xf32>
    %411 = arith.subf %407, %410 : vector<2x8x8xf32>
    %412 = math.exp %411 : vector<2x8x8xf32>
    %cst_163 = arith.constant dense<0.000000e+00> : vector<2x8xf32>
    %413 = vector.multi_reduction <add>, %412, %cst_163 [2] : vector<2x8x8xf32> to vector<2x8xf32>
    %414 = vector.shape_cast %413 : vector<2x8xf32> to vector<2x8x1xf32>
    %415 = tpu.reciprocal %414 {approx = true} : vector<2x8x1xf32> -> vector<2x8x1xf32>
    %416 = vector.broadcast %415 : vector<2x8x1xf32> to vector<2x8x8xf32>
    %417 = arith.mulf %412, %416 : vector<2x8x8xf32>
    %418 = arith.truncf %417 : vector<2x8x8xf32> to vector<2x8x8xbf16>
    %419 = arith.truncf %404 : vector<2x8x8xf32> to vector<2x8x8xbf16>
    "tpu.trace_start"() <{level = 10 : i32, message = "bqk,bkd->bqd"}> : () -> ()
    %cst_164 = arith.constant dense<0.000000e+00> : vector<2x8x8xf32>
    %420 = tpu.matmul %418, %419, %cst_164 {dimension_numbers = #tpu.dot_dimension_numbers<[2], [1], [1], [2], [0, 0, 0, 1, 1, 2], [0], [0]>} : vector<2x8x8xbf16>, vector<2x8x8xbf16>, vector<2x8x8xf32> -> vector<2x8x8xf32>
    "tpu.trace_stop"() : () -> ()
    %421 = tpu.concatenate %363, %382, %401, %420 in 2 : vector<2x8x8xf32>, vector<2x8x8xf32>, vector<2x8x8xf32>, vector<2x8x8xf32> -> vector<2x8x32xf32>
    %422 = vector.shape_cast %421 : vector<2x8x32xf32> to vector<16x32xf32>
    %c1_165 = arith.constant 1 : index
    %c0_166 = arith.constant 0 : index
    %c0_167 = arith.constant 0 : index
    %423 = vector.load %arg13[%c1_165, %c0_166, %c0_167] : memref<2x32x32xbf16, #tpu.memory_space<vmem>>, vector<1x32x32xbf16>
    %424 = vector.shape_cast %423 : vector<1x32x32xbf16> to vector<32x32xbf16>
    %425 = arith.truncf %422 : vector<16x32xf32> to vector<16x32xbf16>
    %cst_168 = arith.constant dense<0.000000e+00> : vector<16x32xf32>
    %426 = tpu.matmul %425, %424, %cst_168 {dimension_numbers = #tpu.dot_dimension_numbers<[1], [0], [0], [1], [0, 0, 1, 1], [], []>} : vector<16x32xbf16>, vector<32x32xbf16>, vector<16x32xf32> -> vector<16x32xf32>
    %427 = arith.addf %295, %426 : vector<16x32xf32>
    %c1_169 = arith.constant 1 : index
    %c0_170 = arith.constant 0 : index
    %c0_171 = arith.constant 0 : index
    %428 = vector.load %arg14[%c1_169, %c0_170, %c0_171] : memref<2x1x32xf32, #tpu.memory_space<vmem>>, vector<1x1x32xf32>
    %429 = vector.shape_cast %428 : vector<1x1x32xf32> to vector<1x32xf32>
    %430 = vector.broadcast %429 : vector<1x32xf32> to vector<16x32xf32>
    %431 = arith.addf %427, %430 : vector<16x32xf32>
    %c1_172 = arith.constant 1 : index
    %c0_173 = arith.constant 0 : index
    %c0_174 = arith.constant 0 : index
    %432 = vector.load %arg15[%c1_172, %c0_173, %c0_174] : memref<2x2x32xf32, #tpu.memory_space<vmem>>, vector<1x2x32xf32>
    %433 = vector.shape_cast %432 : vector<1x2x32xf32> to vector<2x32xf32>
    %434 = vector.extract_strided_slice %433 {offsets = [0, 0], sizes = [1, 32], strides = [1, 1]} : vector<2x32xf32> to vector<1x32xf32>
    %435 = vector.extract_strided_slice %433 {offsets = [1, 0], sizes = [1, 32], strides = [1, 1]} : vector<2x32xf32> to vector<1x32xf32>
    %cst_175 = arith.constant dense<0.000000e+00> : vector<16xf32>
    %436 = vector.multi_reduction <add>, %431, %cst_175 [1] : vector<16x32xf32> to vector<16xf32>
    %437 = vector.shape_cast %436 : vector<16xf32> to vector<16x1xf32>
    %cst_176 = arith.constant 3.200000e+01 : f32
    %438 = vector.broadcast %cst_176 : f32 to vector<16x1xf32>
    %439 = arith.divf %437, %438 : vector<16x1xf32>
    %440 = vector.broadcast %439 : vector<16x1xf32> to vector<16x32xf32>
    %441 = arith.subf %431, %440 : vector<16x32xf32>
    %442 = arith.mulf %441, %441 : vector<16x32xf32>
    %cst_177 = arith.constant dense<0.000000e+00> : vector<16xf32>
    %443 = vector.multi_reduction <add>, %442, %cst_177 [1] : vector<16x32xf32> to vector<16xf32>
    %444 = vector.shape_cast %443 : vector<16xf32> to vector<16x1xf32>
    %cst_178 = arith.constant 3.200000e+01 : f32
    %445 = vector.broadcast %cst_178 : f32 to vector<16x1xf32>
    %446 = arith.divf %444, %445 : vector<16x1xf32>
    %447 = vector.broadcast %439 : vector<16x1xf32> to vector<16x32xf32>
    %448 = arith.subf %431, %447 : vector<16x32xf32>
    %cst_179 = arith.constant 9.99999974E-6 : f32
    %449 = vector.broadcast %cst_179 : f32 to vector<16x1xf32>
    %450 = arith.addf %446, %449 : vector<16x1xf32>
    %451 = math.rsqrt %450 : vector<16x1xf32>
    %452 = vector.broadcast %451 : vector<16x1xf32> to vector<16x32xf32>
    %453 = arith.mulf %448, %452 : vector<16x32xf32>
    %454 = vector.broadcast %434 : vector<1x32xf32> to vector<16x32xf32>
    %455 = arith.mulf %453, %454 : vector<16x32xf32>
    %456 = vector.broadcast %435 : vector<1x32xf32> to vector<16x32xf32>
    %457 = arith.addf %455, %456 : vector<16x32xf32>
    %c1_180 = arith.constant 1 : index
    %c0_181 = arith.constant 0 : index
    %c0_182 = arith.constant 0 : index
    %458 = vector.load %arg16[%c1_180, %c0_181, %c0_182] : memref<2x32x64xbf16, #tpu.memory_space<vmem>>, vector<1x32x64xbf16>
    %459 = vector.shape_cast %458 : vector<1x32x64xbf16> to vector<32x64xbf16>
    %460 = arith.truncf %457 : vector<16x32xf32> to vector<16x32xbf16>
    %cst_183 = arith.constant dense<0.000000e+00> : vector<16x64xf32>
    %461 = tpu.matmul %460, %459, %cst_183 {dimension_numbers = #tpu.dot_dimension_numbers<[1], [0], [0], [1], [0, 0, 1, 1], [], []>} : vector<16x32xbf16>, vector<32x64xbf16>, vector<16x64xf32> -> vector<16x64xf32>
    %c1_184 = arith.constant 1 : index
    %c0_185 = arith.constant 0 : index
    %c0_186 = arith.constant 0 : index
    %462 = vector.load %arg17[%c1_184, %c0_185, %c0_186] : memref<2x1x64xf32, #tpu.memory_space<vmem>>, vector<1x1x64xf32>
    %463 = vector.shape_cast %462 : vector<1x1x64xf32> to vector<1x64xf32>
    %464 = vector.broadcast %463 : vector<1x64xf32> to vector<16x64xf32>
    %465 = arith.addf %461, %464 : vector<16x64xf32>
    %466 = arith.mulf %465, %465 : vector<16x64xf32>
    %467 = arith.mulf %465, %466 : vector<16x64xf32>
    %cst_187 = arith.constant 4.471500e-02 : f32
    %468 = vector.broadcast %cst_187 : f32 to vector<16x64xf32>
    %469 = arith.mulf %468, %467 : vector<16x64xf32>
    %470 = arith.addf %465, %469 : vector<16x64xf32>
    %cst_188 = arith.constant 0.797884583 : f32
    %471 = vector.broadcast %cst_188 : f32 to vector<16x64xf32>
    %472 = arith.mulf %471, %470 : vector<16x64xf32>
    %473 = math.tanh %472 : vector<16x64xf32>
    %cst_189 = arith.constant 1.000000e+00 : f32
    %474 = vector.broadcast %cst_189 : f32 to vector<16x64xf32>
    %475 = arith.addf %474, %473 : vector<16x64xf32>
    %cst_190 = arith.constant 5.000000e-01 : f32
    %476 = vector.broadcast %cst_190 : f32 to vector<16x64xf32>
    %477 = arith.mulf %476, %475 : vector<16x64xf32>
    %478 = arith.mulf %465, %477 : vector<16x64xf32>
    %c1_191 = arith.constant 1 : index
    %c0_192 = arith.constant 0 : index
    %c0_193 = arith.constant 0 : index
    %479 = vector.load %arg18[%c1_191, %c0_192, %c0_193] : memref<2x64x32xbf16, #tpu.memory_space<vmem>>, vector<1x64x32xbf16>
    %480 = vector.shape_cast %479 : vector<1x64x32xbf16> to vector<64x32xbf16>
    %481 = arith.truncf %478 : vector<16x64xf32> to vector<16x64xbf16>
    %cst_194 = arith.constant dense<0.000000e+00> : vector<16x32xf32>
    %482 = tpu.matmul %481, %480, %cst_194 {dimension_numbers = #tpu.dot_dimension_numbers<[1], [0], [0], [1], [0, 0, 1, 1], [], []>} : vector<16x64xbf16>, vector<64x32xbf16>, vector<16x32xf32> -> vector<16x32xf32>
    %483 = arith.addf %431, %482 : vector<16x32xf32>
    %c1_195 = arith.constant 1 : index
    %c0_196 = arith.constant 0 : index
    %c0_197 = arith.constant 0 : index
    %484 = vector.load %arg19[%c1_195, %c0_196, %c0_197] : memref<2x1x32xf32, #tpu.memory_space<vmem>>, vector<1x1x32xf32>
    %485 = vector.shape_cast %484 : vector<1x1x32xf32> to vector<1x32xf32>
    %486 = vector.broadcast %485 : vector<1x32xf32> to vector<16x32xf32>
    %487 = arith.addf %483, %486 : vector<16x32xf32>
    %c0_198 = arith.constant 0 : index
    %c0_199 = arith.constant 0 : index
    %488 = vector.load %arg20[%c0_198, %c0_199] : memref<2x32xf32, #tpu.memory_space<vmem>>, vector<1x32xf32>
    %c1_200 = arith.constant 1 : index
    %c0_201 = arith.constant 0 : index
    %489 = vector.load %arg20[%c1_200, %c0_201] : memref<2x32xf32, #tpu.memory_space<vmem>>, vector<1x32xf32>
    %cst_202 = arith.constant dense<0.000000e+00> : vector<16xf32>
    %490 = vector.multi_reduction <add>, %487, %cst_202 [1] : vector<16x32xf32> to vector<16xf32>
    %491 = vector.shape_cast %490 : vector<16xf32> to vector<16x1xf32>
    %cst_203 = arith.constant 3.200000e+01 : f32
    %492 = vector.broadcast %cst_203 : f32 to vector<16x1xf32>
    %493 = arith.divf %491, %492 : vector<16x1xf32>
    %494 = vector.broadcast %493 : vector<16x1xf32> to vector<16x32xf32>
    %495 = arith.subf %487, %494 : vector<16x32xf32>
    %496 = arith.mulf %495, %495 : vector<16x32xf32>
    %cst_204 = arith.constant dense<0.000000e+00> : vector<16xf32>
    %497 = vector.multi_reduction <add>, %496, %cst_204 [1] : vector<16x32xf32> to vector<16xf32>
    %498 = vector.shape_cast %497 : vector<16xf32> to vector<16x1xf32>
    %cst_205 = arith.constant 3.200000e+01 : f32
    %499 = vector.broadcast %cst_205 : f32 to vector<16x1xf32>
    %500 = arith.divf %498, %499 : vector<16x1xf32>
    %501 = vector.broadcast %493 : vector<16x1xf32> to vector<16x32xf32>
    %502 = arith.subf %487, %501 : vector<16x32xf32>
    %cst_206 = arith.constant 9.99999974E-6 : f32
    %503 = vector.broadcast %cst_206 : f32 to vector<16x1xf32>
    %504 = arith.addf %500, %503 : vector<16x1xf32>
    %505 = math.rsqrt %504 : vector<16x1xf32>
    %506 = vector.broadcast %505 : vector<16x1xf32> to vector<16x32xf32>
    %507 = arith.mulf %502, %506 : vector<16x32xf32>
    %508 = vector.broadcast %488 : vector<1x32xf32> to vector<16x32xf32>
    %509 = arith.mulf %507, %508 : vector<16x32xf32>
    %510 = vector.broadcast %489 : vector<1x32xf32> to vector<16x32xf32>
    %511 = arith.addf %509, %510 : vector<16x32xf32>
    %512 = vector.shape_cast %511 : vector<16x32xf32> to vector<2x8x32xf32>
    %cst_207 = arith.constant dense<0.000000e+00> : vector<2x32xf32>
    %513 = vector.multi_reduction <add>, %512, %cst_207 [1] : vector<2x8x32xf32> to vector<2x32xf32>
    %cst_208 = arith.constant 8.000000e+00 : f32
    %514 = vector.broadcast %cst_208 : f32 to vector<2x32xf32>
    %515 = arith.divf %513, %514 : vector<2x32xf32>
    %c0_209 = arith.constant 0 : index
    %c0_210 = arith.constant 0 : index
    %516 = vector.load %arg21[%c0_209, %c0_210] : memref<32x5xbf16, #tpu.memory_space<vmem>>, vector<32x5xbf16>
    %517 = arith.truncf %515 : vector<2x32xf32> to vector<2x32xbf16>
    %cst_211 = arith.constant dense<0.000000e+00> : vector<2x5xf32>
    %518 = tpu.matmul %517, %516, %cst_211 {dimension_numbers = #tpu.dot_dimension_numbers<[1], [0], [0], [1], [0, 0, 1, 1], [], []>} : vector<2x32xbf16>, vector<32x5xbf16>, vector<2x5xf32> -> vector<2x5xf32>
    %c0_212 = arith.constant 0 : index
    %c0_213 = arith.constant 0 : index
    %519 = vector.load %arg22[%c0_212, %c0_213] : memref<1x5xf32, #tpu.memory_space<vmem>>, vector<1x5xf32>
    %520 = vector.broadcast %519 : vector<1x5xf32> to vector<2x5xf32>
    %521 = arith.addf %518, %520 : vector<2x5xf32>
    %c0_214 = arith.constant 0 : index
    %c0_215 = arith.constant 0 : index
    %c0_216 = arith.constant 0 : index
    %522 = vector.load %arg23[%c0_214, %c0_215, %c0_216] : memref<1x2x5xf32, #tpu.memory_space<vmem>>, vector<1x2x5xf32>
    %523 = vector.shape_cast %522 : vector<1x2x5xf32> to vector<2x5xf32>
    %524 = vector.shape_cast %521 : vector<2x5xf32> to vector<1x2x5xf32>
    tpu.vector_store %arg23[%c0_214, %c0_215, %c0_216], %524 {strides = array<i32>} : memref<1x2x5xf32, #tpu.memory_space<vmem>>, vector<1x2x5xf32>,
    return
  }
  func.func @transform_0(%arg0: i32) -> (i32, i32, i32) {
    %c0_i32 = arith.constant 0 : i32
    %c0_i32_0 = arith.constant 0 : i32
    %c0_i32_1 = arith.constant 0 : i32
    return %arg0, %c0_i32, %c0_i32_0 : i32, i32, i32
  }
  func.func @transform_1(%arg0: i32) -> (i32, i32, i32) {
    %c0_i32 = arith.constant 0 : i32
    %c0_i32_0 = arith.constant 0 : i32
    %c0_i32_1 = arith.constant 0 : i32
    %c0_i32_2 = arith.constant 0 : i32
    return %c0_i32, %c0_i32_0, %c0_i32_1 : i32, i32, i32
  }
  func.func @transform_2(%arg0: i32) -> (i32, i32) {
    %c0_i32 = arith.constant 0 : i32
    %c0_i32_0 = arith.constant 0 : i32
    %c0_i32_1 = arith.constant 0 : i32
    return %c0_i32, %c0_i32_0 : i32, i32
  }
  func.func @transform_3(%arg0: i32) -> (i32, i32, i32) {
    %c0_i32 = arith.constant 0 : i32
    %c0_i32_0 = arith.constant 0 : i32
    %c0_i32_1 = arith.constant 0 : i32
    %c0_i32_2 = arith.constant 0 : i32
    return %c0_i32, %c0_i32_0, %c0_i32_1 : i32, i32, i32
  }
  func.func @transform_4(%arg0: i32) -> (i32, i32) {
    %c0_i32 = arith.constant 0 : i32
    %c0_i32_0 = arith.constant 0 : i32
    %c0_i32_1 = arith.constant 0 : i32
    return %c0_i32, %c0_i32_0 : i32, i32
  }
  func.func @transform_5(%arg0: i32) -> (i32, i32) {
    %c0_i32 = arith.constant 0 : i32
    %c0_i32_0 = arith.constant 0 : i32
    %c0_i32_1 = arith.constant 0 : i32
    return %c0_i32, %c0_i32_0 : i32, i32
  }
  func.func @transform_6(%arg0: i32) -> (i32, i32, i32) {
    %c0_i32 = arith.constant 0 : i32
    %c0_i32_0 = arith.constant 0 : i32
    %c0_i32_1 = arith.constant 0 : i32
    %c0_i32_2 = arith.constant 0 : i32
    return %c0_i32, %c0_i32_0, %c0_i32_1 : i32, i32, i32
  }
  func.func @transform_7(%arg0: i32) -> (i32, i32, i32) {
    %c0_i32 = arith.constant 0 : i32
    %c0_i32_0 = arith.constant 0 : i32
    %c0_i32_1 = arith.constant 0 : i32
    %c0_i32_2 = arith.constant 0 : i32
    return %c0_i32, %c0_i32_0, %c0_i32_1 : i32, i32, i32
  }
  func.func @transform_8(%arg0: i32) -> (i32, i32, i32) {
    %c0_i32 = arith.constant 0 : i32
    %c0_i32_0 = arith.constant 0 : i32
    %c0_i32_1 = arith.constant 0 : i32
    %c0_i32_2 = arith.constant 0 : i32
    return %c0_i32, %c0_i32_0, %c0_i32_1 : i32, i32, i32
  }
  func.func @transform_9(%arg0: i32) -> (i32, i32, i32) {
    %c0_i32 = arith.constant 0 : i32
    %c0_i32_0 = arith.constant 0 : i32
    %c0_i32_1 = arith.constant 0 : i32
    %c0_i32_2 = arith.constant 0 : i32
    return %c0_i32, %c0_i32_0, %c0_i32_1 : i32, i32, i32
  }
  func.func @transform_10(%arg0: i32) -> (i32, i32, i32) {
    %c0_i32 = arith.constant 0 : i32
    %c0_i32_0 = arith.constant 0 : i32
    %c0_i32_1 = arith.constant 0 : i32
    %c0_i32_2 = arith.constant 0 : i32
    return %c0_i32, %c0_i32_0, %c0_i32_1 : i32, i32, i32
  }
  func.func @transform_11(%arg0: i32) -> (i32, i32, i32) {
    %c0_i32 = arith.constant 0 : i32
    %c0_i32_0 = arith.constant 0 : i32
    %c0_i32_1 = arith.constant 0 : i32
    %c0_i32_2 = arith.constant 0 : i32
    return %c0_i32, %c0_i32_0, %c0_i32_1 : i32, i32, i32
  }
  func.func @transform_12(%arg0: i32) -> (i32, i32, i32) {
    %c0_i32 = arith.constant 0 : i32
    %c0_i32_0 = arith.constant 0 : i32
    %c0_i32_1 = arith.constant 0 : i32
    %c0_i32_2 = arith.constant 0 : i32
    return %c0_i32, %c0_i32_0, %c0_i32_1 : i32, i32, i32
  }
  func.func @transform_13(%arg0: i32) -> (i32, i32, i32) {
    %c0_i32 = arith.constant 0 : i32
    %c0_i32_0 = arith.constant 0 : i32
    %c0_i32_1 = arith.constant 0 : i32
    %c0_i32_2 = arith.constant 0 : i32
    return %c0_i32, %c0_i32_0, %c0_i32_1 : i32, i32, i32
  }
  func.func @transform_14(%arg0: i32) -> (i32, i32, i32) {
    %c0_i32 = arith.constant 0 : i32
    %c0_i32_0 = arith.constant 0 : i32
    %c0_i32_1 = arith.constant 0 : i32
    %c0_i32_2 = arith.constant 0 : i32
    return %c0_i32, %c0_i32_0, %c0_i32_1 : i32, i32, i32
  }
  func.func @transform_15(%arg0: i32) -> (i32, i32, i32) {
    %c0_i32 = arith.constant 0 : i32
    %c0_i32_0 = arith.constant 0 : i32
    %c0_i32_1 = arith.constant 0 : i32
    %c0_i32_2 = arith.constant 0 : i32
    return %c0_i32, %c0_i32_0, %c0_i32_1 : i32, i32, i32
  }
  func.func @transform_16(%arg0: i32) -> (i32, i32, i32) {
    %c0_i32 = arith.constant 0 : i32
    %c0_i32_0 = arith.constant 0 : i32
    %c0_i32_1 = arith.constant 0 : i32
    %c0_i32_2 = arith.constant 0 : i32
    return %c0_i32, %c0_i32_0, %c0_i32_1 : i32, i32, i32
  }
  func.func @transform_17(%arg0: i32) -> (i32, i32, i32) {
    %c0_i32 = arith.constant 0 : i32
    %c0_i32_0 = arith.constant 0 : i32
    %c0_i32_1 = arith.constant 0 : i32
    %c0_i32_2 = arith.constant 0 : i32
    return %c0_i32, %c0_i32_0, %c0_i32_1 : i32, i32, i32
  }
  func.func @transform_18(%arg0: i32) -> (i32, i32, i32) {
    %c0_i32 = arith.constant 0 : i32
    %c0_i32_0 = arith.constant 0 : i32
    %c0_i32_1 = arith.constant 0 : i32
    %c0_i32_2 = arith.constant 0 : i32
    return %c0_i32, %c0_i32_0, %c0_i32_1 : i32, i32, i32
  }
  func.func @transform_19(%arg0: i32) -> (i32, i32) {
    %c0_i32 = arith.constant 0 : i32
    %c0_i32_0 = arith.constant 0 : i32
    %c0_i32_1 = arith.constant 0 : i32
    return %c0_i32, %c0_i32_0 : i32, i32
  }
  func.func @transform_20(%arg0: i32) -> (i32, i32) {
    %c0_i32 = arith.constant 0 : i32
    %c0_i32_0 = arith.constant 0 : i32
    %c0_i32_1 = arith.constant 0 : i32
    return %c0_i32, %c0_i32_0 : i32, i32
  }
  func.func @transform_21(%arg0: i32) -> (i32, i32) {
    %c0_i32 = arith.constant 0 : i32
    %c0_i32_0 = arith.constant 0 : i32
    %c0_i32_1 = arith.constant 0 : i32
    return %c0_i32, %c0_i32_0 : i32, i32
  }
  func.func @transform_22(%arg0: i32) -> (i32, i32, i32) {
    %c0_i32 = arith.constant 0 : i32
    %c0_i32_0 = arith.constant 0 : i32
    %c0_i32_1 = arith.constant 0 : i32
    return %arg0, %c0_i32, %c0_i32_0 : i32, i32, i32
  }
}

</mosaic_0001>

<bundles_post_ra>
// kernel: ve_model_forward.1
= control target key start
LH: loop header
LB: loop body
LE: loop exit
PB: predicated region body
PF: predicated region fallthrough
CT: control target
= control target key end

     0   :  { %s7160_s0 = inlined_call_operand.vmem [shape: f32[4,16,8], index: 0, kind: input, shape index: {}]   ;;  %s7161_s1 = inlined_call_operand.hbm [shape: bf16[3,8,32], index: 1, kind: input, shape index: {}]   ;;  %s7162_s2 = inlined_call_operand.vmem [shape: f32[1,32], index: 2, kind: input, shape index: {}]   ;;  %s7163_s3 = inlined_call_operand.vmem [shape: bf16[3,32,32], index: 3, kind: input, shape index: {}]   ;;  %s7164_s4 = inlined_call_operand.hbm [shape: f32[1,32], index: 4, kind: input, shape index: {}]   ;;  %s7165_s5 = inlined_call_operand.hbm [shape: f32[8,32], index: 5, kind: input, shape index: {}]   ;;  %s7166_s6 = inlined_call_operand.hbm [shape: f32[2,2,32], index: 6, kind: input, shape index: {}]   ;;  %s7167_s7 = inlined_call_operand.vmem [shape: bf16[2,32,32], index: 7, kind: input, shape index: {}]   ;;  %s7168_s8 = inlined_call_operand.vmem [shape: f32[2,1,32], index: 8, kind: input, shape index: {}]   ;;  %s7169_s9 = inlined_call_operand.vmem [shape: bf16[2,32,32], index: 9, kind: input, shape index: {}]   ;;  %s7170_s10 = inlined_call_operand.vmem [shape: bf16[2,32,32], index: 10, kind: input, shape index: {}]   ;;  %s7171_s11 = inlined_call_operand.hbm [shape: f32[2,1,32], index: 11, kind: input, shape index: {}]   ;;  %s7172_s12 = inlined_call_operand.vmem [shape: bf16[2,32,32], index: 12, kind: input, shape index: {}]   ;;  %s7173_s13 = inlined_call_operand.hbm [shape: f32[2,1,32], index: 13, kind: input, shape index: {}]   ;;  %s7174_s14 = inlined_call_operand.hbm [shape: f32[2,2,32], index: 14, kind: input, shape index: {}]   ;;  %s7175_s15 = inlined_call_operand.hbm [shape: bf16[2,32,64], index: 15, kind: input, shape index: {}]   ;;  %s7176_s16 = inlined_call_operand.hbm [shape: f32[2,1,64], index: 16, kind: input, shape index: {}]   ;;  %s7177_s17 = inlined_call_operand.vmem [shape: bf16[2,64,32], index: 17, kind: input, shape index: {}]   ;;  %s7178_s18 = inlined_call_operand.hbm [shape: f32[2,1,32], index: 18, kind: input, shape index: {}]   ;;  %s7179_s19 = inlined_call_operand.hbm [shape: f32[2,32], index: 19, kind: input, shape index: {}]   ;;  %s7180_s20 = inlined_call_operand.vmem [shape: bf16[32,5], index: 20, kind: input, shape index: {}]   ;;  %s7181_s21 = inlined_call_operand.hbm [shape: f32[1,5], index: 21, kind: input, shape index: {}]   ;;  %s7182_s22 = inlined_call_operand.hbm [shape: f32[2,2,5], index: 22, kind: output, shape index: {}]  }
   0x1   :  { %7204 = sst [smem:[#allocation39_spill]] %s7160_s0 }
   0x2   :  { %7205 = sst [smem:[#allocation40_spill]] %s7161_s1 }
   0x3   :  { %7206 = sst [smem:[#allocation41_spill]] %s7162_s2 }
   0x4   :  { %7207 = sst [smem:[#allocation42_spill]] %s7163_s3 }
   0x5   :  { %7208 = sst [smem:[#allocation43_spill]] %s7164_s4 }
   0x6   :  { %7209 = sst [smem:[#allocation44_spill]] %s7165_s5 }
   0x7   :  { %7210 = sst [smem:[#allocation45_spill]] %s7166_s6 }
   0x8   :  { %7211 = sst [smem:[#allocation46_spill]] %s7171_s11 }
   0x9   :  { %7212 = sst [smem:[#allocation47_spill]] %s7173_s13 }
   0xa   :  { %7213 = sst [smem:[#allocation48_spill]] %s7182_s22 }
   0xb   :  { %27 = vsyncpa [#allocation4], 0 }
   0xc   :  { %28 = vsyncpa [#allocation7], 0 }
   0xd   :  { %29 = vsyncpa [#allocation10], 0 }
   0xe   :  { %30 = vsyncpa [#allocation13], 0 }
   0xf   :  { %31 = vsyncpa [#allocation16], 0 }
  0x10   :  { %32 = vsyncpa [#allocation19], 0 }
  0x11   :  { %33 = vsyncpa [#allocation22], 0 }
  0x12   :  { %34 = vsyncpa [#allocation5], 0 }
  0x13   :  { %36 = vsyncpa [#allocation5 + $0x1], 0  ;;  %s6221_s3 = smov 0   ;;  %s6223_s28 = smov 0  }
  0x14   :  { %s6225_s29 = smov 0   ;;  %s6227_s30 = smov 0  }
  0x15 LB: > { %7214 = sst [smem:[#allocation32_spill]] %s6065_s3  ;;  %s6242_s4 = sadd.s32 4294967295, %s6077_s30   ;;  %s6077_s30 = sphi %s6227_s30, %s7263_s30   ;;  %s6073_s29 = sphi %s6225_s29, %s7268_s29   ;;  %s6069_s28 = sphi %s6223_s28, %s7267_s28   ;;  %s6065_s3 = sphi %s6221_s3, %s7266_s3  }
  0x16   : > { %7215 = sst [smem:[#allocation33_spill]] %s6073_s29  ;;  %s4674_s0 = sadd.s32 4294967294, %s6077_s30  }
  0x17   : > { %7216 = sst [smem:[#allocation34_spill]] %s6077_s30  ;;  %s6246_s23 = sadd.s32 1, %s6077_s30  }
  0x18   : > { %7217 = sst [smem:[#allocation35_spill]] %s6246_s23  ;;  %s516_s1 = sadd.s32 1, %s6073_s29 }
  0x19   : > { %s513_s5 = ssub.s32 %s6077_s30, %s6246_s23  ;;  %p526_p0 = scmp.ne.s32.totalorder %s6073_s29, %s6069_s28 }
  0x1a   : > { %p514_p1 = scmp.eq.s32.totalorder %s513_s5, 0  ;;  %p527_p2 = scmp.eq.s32.totalorder %s6242_s4, 1 }
  0x1b   : > { %p532_p3 = scmp.ne.s32.totalorder %s6069_s28, %s6065_s3  ;;  %p533_p4 = scmp.eq.s32.totalorder %s4674_s0, 1 }
  0x1c   : > { %s6257_s24 = scalar_select %p514_p1, %s6073_s29, %s516_s1  }
  0x1d   : > { %p6259_p5 = por %p527_p2, %p526_p0  ;;  %p6263_p6 = por %p533_p4, %p532_p3 }
  0x1e   : > { %7218 = sst [smem:[#allocation36_spill]] %s6257_s24  ;;  %p4675_p7 = scmp.ge.s32.totalorder %s6077_s30, 1 }
  0x1f   : > { %s7219_s6 = scalar_select %p6259_p5, 1, 0 }
  0x20   : > { %s7221_s25 = scalar_select %p6263_p6, 1, 0 }
  0x21   : > { %7220 = sst [smem:[#allocation37_spill]] %s7219_s6  ;;  %p540_p8 = scmp.lt.s32.totalorder %s6077_s30, 3 }
  0x22   : > { %7222 = sst [smem:[#allocation38_spill]] %s7221_s25  ;;  %p7189_p9 = scmp.eq.s32.totalorder %s6242_s4, 0 }
  0x23   : > { %p6270_p10 = pnand %p4675_p7, %p540_p8  ;;  %s6079_s2 = smov [#allocation6]  }
  0x24   : > { %s572_s27 = sshll.u32 %s6079_s2, 4  ;;  %s6080_s0 = smov [#allocation9]   ;;  %s573_s27 = int_to_ptr.vmem [resolvable:$true] %s572_s27 }
  0x25   : > { %s7223_s26 = scalar_select %p6270_p10, 1, 0 }
  0x26   : > { %p5383_p11 = pneg %p6270_p10  ;;  %s593_s1 = sshll.u32 %s6080_s0, 4  ;;  %s594_s1 = int_to_ptr.vmem [resolvable:$true] %s593_s1 }
  0x27   : > { %s5688_s29 = scalar_lea.vmem %s573_s27, 16  ;;  %s5695_s2 = scalar_lea.vmem %s573_s27, 32 }
  0x28   : > { %p6278_p12 = pnand %p7189_p9, %p5383_p11  ;;  %p5689_p0 = scmp.ne.s32.totalorder %s573_s27, %s5688_s29 }
  0x29   : > { %p5696_p3 = scmp.lt.s32.totalorder %s573_s27, %s573_s27  ;;  %p5697_p4 = scmp.lt.s32.totalorder %s5695_s2, %s5688_s29 }
  0x2a   : > { %p6284_p13 = pneg %p6278_p12 }
  0x2b   : > { %p5698_p7 = por %p5697_p4, %p5696_p3 }
  0x2c   : > { %p5691_p1 = pnand %p5689_p0, %p6284_p13 }
  0x2e   : > { %p5692_p2 = pneg %p5691_p1 }
  0x30   : > { %p5699_p8 = pnand %p5698_p7, %p5692_p2 }
  0x32   : > { %5702 = shalt.err (!%p5699_p8)
}
  0x33   : > { %s7226_s25 = sld [smem:[#allocation43_spill]]  ;;  %s5714_s3 = scalar_lea.vmem %s594_s1, 64 }
  0x34   : > { %p5715_p11 = scmp.ne.s32.totalorder %s594_s1, %s5714_s3  ;;  %p5722_p0 = scmp.lt.s32.totalorder %s594_s1, %s594_s1 }
  0x35   : > { %p5723_p1 = scmp.lt.s32.totalorder %s5714_s3, %s5714_s3 }
  0x36   : > { %p5717_p9 = pnand %p5715_p11, %p6284_p13 }
  0x37   : > { %p5724_p5 = por %p5723_p1, %p5722_p0 }
  0x38   : > { %p5718_p6 = pneg %p5717_p9 }
  0x39   : > { %5389 = dma.hbm_to_vmem [thread:$0]  (!%p6278_p12), %s7226_s25, 16, %s573_s27, [#allocation7]  }
  0x3a   : > { %p5725_p10 = pnand %p5724_p5, %p5718_p6 }
  0x3c   : > { %5728 = shalt.err (!%p5725_p10)
}
  0x3d   : > { %s7196_s29 = smov 32   ;;  %s7197_s2 = smov 2  }
  0x3e   : > { %s7227_s27 = sld [smem:[#allocation45_spill]]  ;;  %s6083_s0 = smov [#allocation12]  }
  0x3f   : > { %s634_s30 = sshll.u32 %s6083_s0, 4  ;;  %s635_s30 = int_to_ptr.vmem [resolvable:$true] %s634_s30 }
  0x40   : > { %s5740_s22 = scalar_lea.vmem %s635_s30, 32  ;;  %p5748_p10 = scmp.lt.s32.totalorder %s635_s30, %s635_s30 }
  0x41   : > { %p5741_p9 = scmp.ne.s32.totalorder %s635_s30, %s5740_s22  ;;  %p5749_p2 = scmp.lt.s32.totalorder %s5740_s22, %s5740_s22 }
  0x43   : > { %p5743_p5 = pnand %p5741_p9, %p6284_p13  ;;  %p5750_p3 = por %p5749_p2, %p5748_p10 }
  0x44   : > { %5395 = dma.hbm_to_vmem [thread:$0]  (!%p6278_p12), %s7227_s27, 64, %s594_s1, [#allocation10], %s7196_s29, %s7196_s29, %s7197_s2  }
  0x45   : > { %p5744_p6 = pneg %p5743_p5 }
  0x47   : > { %p5751_p4 = pnand %p5750_p3, %p5744_p6 }
  0x49   : > { %5754 = shalt.err (!%p5751_p4)
}
  0x4a   : > { %s7200_s3 = smov 16   ;;  %s7202_s6 = smov 1  }
  0x4b   : > { %s7228_s13 = sld [smem:[#allocation47_spill]]  ;;  %s6086_s25 = smov [#allocation15]  }
  0x4c   : > { %s660_s27 = sshll.u32 %s6086_s25, 4  ;;  %s6087_s0 = smov [#allocation18]   ;;  %s661_s27 = int_to_ptr.vmem [resolvable:$true] %s660_s27 }
  0x4d   : > { %s689_s22 = sshll.u32 %s6087_s0, 4  ;;  %s5766_s29 = scalar_lea.vmem %s661_s27, 512  ;;  %s690_s22 = int_to_ptr.vmem [resolvable:$true] %s689_s22 }
  0x4e   : > { %p5767_p7 = scmp.ne.s32.totalorder %s661_s27, %s5766_s29  ;;  %p5774_p0 = scmp.lt.s32.totalorder %s661_s27, %s661_s27 }
  0x4f   : > { %p5775_p1 = scmp.lt.s32.totalorder %s5766_s29, %s5766_s29 }
  0x50   : > { %p5769_p8 = pnand %p5767_p7, %p6284_p13 }
  0x51   : > { %5401 = dma.hbm_to_vmem [thread:$0]  (!%p6278_p12), %s7228_s13, 32, %s635_s30, [#allocation13], %s7200_s3, %s7200_s3, %s7202_s6  }
  0x52   : > { %p5770_p11 = pneg %p5769_p8  ;;  %p5776_p9 = por %p5775_p1, %p5774_p0 }
  0x54   : > { %p5777_p5 = pnand %p5776_p9, %p5770_p11 }
  0x56   : > { %5780 = shalt.err (!%p5777_p5)
}
  0x57   : > { %s7198_s2 = smov 64   ;;  %s7199_s1 = smov 4  }
  0x58   : > { %5407 = dma.hbm_to_vmem [thread:$0]  (!%p6278_p12), %s7175_s15, 512, %s661_s27, [#allocation16], %s7198_s2, %s7198_s2, %s7199_s1  }
  0x59   : > { %s5792_s25 = scalar_lea.vmem %s690_s22, 32  ;;  %p5800_p3 = scmp.lt.s32.totalorder %s690_s22, %s690_s22 }
  0x5a   : > { %p5793_p6 = scmp.ne.s32.totalorder %s690_s22, %s5792_s25  ;;  %p5801_p4 = scmp.lt.s32.totalorder %s5792_s25, %s5792_s25 }
  0x5c   : > { %p5795_p10 = pnand %p5793_p6, %p6284_p13  ;;  %p5802_p7 = por %p5801_p4, %p5800_p3 }
  0x5e   : > { %p5796_p2 = pneg %p5795_p10 }
  0x60   : > { %p5803_p8 = pnand %p5802_p7, %p5796_p2 }
  0x62   : > { %5806 = shalt.err (!%p5803_p8)
}
  0x63   : > { %5413 = dma.hbm_to_vmem [thread:$0]  (!%p6278_p12), %s7178_s18, 32, %s690_s22, [#allocation19], %s7200_s3, %s7200_s3, %s7202_s6  }
  0x64   : > { %s6090_s27 = smov [#allocation3]   ;;  %s6091_s23 = smov [#allocation8]  }
  0x65   : > { %s552_s30 = sshll.u32 %s6090_s27, 4  ;;  %s583_s2 = sshll.u32 %s6091_s23, 4  ;;  %s553_s30 = int_to_ptr.vmem [resolvable:$true] %s552_s30  ;;  %s584_s2 = int_to_ptr.vmem [resolvable:$true] %s583_s2 }
  0x66   : > { %s5818_s1 = scalar_lea.vmem %s553_s30, 192  ;;  %p5826_p9 = scmp.lt.s32.totalorder %s553_s30, %s553_s30 }
  0x67   : > { %p5819_p11 = scmp.ne.s32.totalorder %s553_s30, %s5818_s1  ;;  %p5827_p5 = scmp.lt.s32.totalorder %s5818_s1, %s5818_s1 }
  0x69   : > { %p5821_p0 = pnand %p5819_p11, %p6284_p13  ;;  %p5828_p6 = por %p5827_p5, %p5826_p9 }
  0x6b   : > { %p5822_p1 = pneg %p5821_p0 }
  0x6d   : > { %p5829_p10 = pnand %p5828_p6, %p5822_p1 }
  0x6f   : > { %5832 = shalt.err (!%p5829_p10)
}
  0x70   : > { %s7229_s25 = smov 4   ;;  %s7230_s29 = smov 64  }
  0x71   : > { %s7231_s27 = sld [smem:[#allocation40_spill]]  ;;  %s5844_s23 = scalar_lea.vmem %s584_s2, 128 }
  0x72   : > { %p5845_p2 = scmp.ne.s32.totalorder %s584_s2, %s5844_s23  ;;  %p5852_p7 = scmp.lt.s32.totalorder %s584_s2, %s584_s2 }
  0x73   : > { %p5853_p8 = scmp.lt.s32.totalorder %s5844_s23, %s5844_s23 }
  0x74   : > { %p5847_p3 = pnand %p5845_p2, %p6284_p13 }
  0x75   : > { %p5854_p11 = por %p5853_p8, %p5852_p7 }
  0x76   : > { %p5848_p4 = pneg %p5847_p3 }
  0x77   : > { %5386 = dma.hbm_to_vmem [thread:$0]  (!%p6278_p12), %s7231_s27, 192, %s553_s30, [#allocation4], %s7230_s29, %s7230_s29, %s7229_s25  }
  0x78   : > { %p5855_p0 = pnand %p5854_p11, %p5848_p4 }
  0x7a   : > { %5858 = shalt.err (!%p5855_p0)
}
  0x7b   : > { %s7232_s6 = sld [smem:[#allocation44_spill]]  ;;  %s6092_s22 = smov [#allocation11]  }
  0x7c   : > { %s618_s30 = sshll.u32 %s6092_s22, 4  ;;  %s6093_s25 = smov [#allocation14]   ;;  %s619_s30 = int_to_ptr.vmem [resolvable:$true] %s618_s30 }
  0x7d   : > { %s647_s29 = sshll.u32 %s6093_s25, 4  ;;  %s5870_s0 = scalar_lea.vmem %s619_s30, 32  ;;  %s648_s29 = int_to_ptr.vmem [resolvable:$true] %s647_s29 }
  0x7e   : > { %p5871_p1 = scmp.ne.s32.totalorder %s619_s30, %s5870_s0  ;;  %p5878_p6 = scmp.lt.s32.totalorder %s619_s30, %s619_s30 }
  0x7f   : > { %p5879_p10 = scmp.lt.s32.totalorder %s5870_s0, %s5870_s0 }
  0x80   : > { %p5873_p9 = pnand %p5871_p1, %p6284_p13 }
  0x81   : > { %5392 = dma.hbm_to_vmem [thread:$0]  (!%p6278_p12), %s7232_s6, 128, %s584_s2, [#allocation7]  }
  0x82   : > { %p5874_p5 = pneg %p5873_p9  ;;  %p5880_p2 = por %p5879_p10, %p5878_p6 }
  0x84   : > { %p5881_p3 = pnand %p5880_p2, %p5874_p5 }
  0x86   : > { %5884 = shalt.err (!%p5881_p3)
}
  0x87   : > { %s7233_s3 = smov 1   ;;  %s7234_s27 = smov 16  }
  0x88   : > { %s7235_s11 = sld [smem:[#allocation46_spill]]  ;;  %s5896_s23 = scalar_lea.vmem %s648_s29, 64 }
  0x89   : > { %p5897_p4 = scmp.ne.s32.totalorder %s648_s29, %s5896_s23  ;;  %p5904_p11 = scmp.lt.s32.totalorder %s648_s29, %s648_s29 }
  0x8a   : > { %p5905_p0 = scmp.lt.s32.totalorder %s5896_s23, %s5896_s23 }
  0x8b   : > { %p5899_p7 = pnand %p5897_p4, %p6284_p13 }
  0x8c   : > { %p5906_p1 = por %p5905_p0, %p5904_p11 }
  0x8d   : > { %p5900_p8 = pneg %p5899_p7 }
  0x8e   : > { %5398 = dma.hbm_to_vmem [thread:$0]  (!%p6278_p12), %s7235_s11, 32, %s619_s30, [#allocation10], %s7234_s27, %s7234_s27, %s7233_s3  }
  0x8f   : > { %p5907_p9 = pnand %p5906_p1, %p5900_p8 }
  0x91   : > { %5910 = shalt.err (!%p5907_p9)
}
  0x92   : > { %s7236_s1 = smov 2   ;;  %s7237_s22 = smov 32  }
  0x93   : > { %5404 = dma.hbm_to_vmem [thread:$0]  (!%p6278_p12), %s7174_s14, 64, %s648_s29, [#allocation13], %s7237_s22, %s7237_s22, %s7236_s1  }
  0x94   : > { %s6094_s30 = smov [#allocation17]   ;;  %s6095_s2 = smov [#allocation20]  }
  0x95   : > { %s673_s6 = sshll.u32 %s6094_s30, 4  ;;  %s703_s11 = sshll.u32 %s6095_s2, 4  ;;  %s674_s6 = int_to_ptr.vmem [resolvable:$true] %s673_s6  ;;  %s704_s11 = int_to_ptr.vmem [resolvable:$true] %s703_s11 }
  0x96   : > { %s5922_s13 = scalar_lea.vmem %s674_s6, 32  ;;  %p5930_p2 = scmp.lt.s32.totalorder %s674_s6, %s674_s6 }
  0x97   : > { %p5923_p5 = scmp.ne.s32.totalorder %s674_s6, %s5922_s13  ;;  %p5931_p3 = scmp.lt.s32.totalorder %s5922_s13, %s5922_s13 }
  0x99   : > { %p5925_p6 = pnand %p5923_p5, %p6284_p13  ;;  %p5932_p4 = por %p5931_p3, %p5930_p2 }
  0x9b   : > { %p5926_p10 = pneg %p5925_p6 }
  0x9d   : > { %p5933_p7 = pnand %p5932_p4, %p5926_p10 }
  0x9f   : > { %5936 = shalt.err (!%p5933_p7)
}
  0xa0   : > { %5410 = dma.hbm_to_vmem [thread:$0]  (!%p6278_p12), %s7176_s16, 32, %s674_s6, [#allocation16], %s7234_s27, %s7234_s27, %s7233_s3  }
  0xa1   : > { %s5948_s1 = scalar_lea.vmem %s704_s11, 32  ;;  %p5956_p1 = scmp.lt.s32.totalorder %s704_s11, %s704_s11 }
  0xa2   : > { %p5949_p8 = scmp.ne.s32.totalorder %s704_s11, %s5948_s1  ;;  %p5957_p9 = scmp.lt.s32.totalorder %s5948_s1, %s5948_s1 }
  0xa4   : > { %p5951_p11 = pnand %p5949_p8, %p6284_p13  ;;  %p5958_p5 = por %p5957_p9, %p5956_p1 }
  0xa6   : > { %p5952_p0 = pneg %p5951_p11 }
  0xa8   : > { %p5959_p6 = pnand %p5958_p5, %p5952_p0 }
  0xaa   : > { %5962 = shalt.err (!%p5959_p6)
}
  0xab   : > { %5416 = dma.hbm_to_vmem [thread:$0]  (!%p6278_p12), %s7179_s19, 32, %s704_s11, [#allocation19]  }
  0xac   : > { %s6096_s25 = smov [#allocation21]  }
  0xad   : > { %s717_s3 = sshll.u32 %s6096_s25, 4  ;;  %s718_s3 = int_to_ptr.vmem [resolvable:$true] %s717_s3 }
  0xae   : > { %s5974_s27 = scalar_lea.vmem %s718_s3, 16  ;;  %s5981_s0 = scalar_lea.vmem %s718_s3, 32 }
  0xaf   : > { %p5975_p10 = scmp.ne.s32.totalorder %s718_s3, %s5974_s27  ;;  %p5982_p4 = scmp.lt.s32.totalorder %s718_s3, %s718_s3 }
  0xb0   : > { %p5983_p7 = scmp.lt.s32.totalorder %s5981_s0, %s5974_s27 }
  0xb1   : > { %p5977_p2 = pnand %p5975_p10, %p6284_p13 }
  0xb2   : > { %p5984_p8 = por %p5983_p7, %p5982_p4 }
  0xb3   : > { %p5978_p3 = pneg %p5977_p2 }
  0xb5   : > { %p5985_p11 = pnand %p5984_p8, %p5978_p3 }
  0xb7   : > { %5988 = shalt.err (!%p5985_p11)
}
  0xb8   : > { %5419 = dma.hbm_to_vmem [thread:$0]  (!%p6278_p12), %s7181_s21, 16, %s718_s3, [#allocation22]  }
  0xb9   : > { %p7238_p0 = scmp.ne.s32.totalorder %s7223_s26, 0 }
  0xba   : > { %p7239_p1 = scmp.eq.s32.totalorder (!%p7238_p0), %s6242_s4, 0 }
  0xbb   : > { %740 = sbr.rel (%p7238_p0) target bundleno = 8923 (0x22db), region = 108 }
  0xc0   : > { %6032 = dma.done.wait (%p7239_p1), [#allocation4], 192   ;;  %p7240_p13 = pmov %p7239_p1 }
  0xc1   : > { %p7241_p9 = pmov %p7239_p1 }
  0xc2   : > { %6034 = vsyncadd (%p7240_p13), [#allocation4], 4294967104 }
  0xc3   : > { %6036 = dma.done.wait (%p7241_p9), [#allocation7], 144   ;;  %p7242_p5 = pmov %p7239_p1 }
  0xc4   : > { %p7243_p6 = pmov %p7239_p1 }
  0xc5   : > { %6038 = vsyncadd (%p7242_p5), [#allocation7], 4294967152 }
  0xc6   : > { %6040 = dma.done.wait (%p7243_p6), [#allocation10], 96   ;;  %p7244_p12 = pmov %p7239_p1 }
  0xc7   : > { %p7245_p10 = pmov %p7239_p1 }
  0xc8   : > { %6042 = vsyncadd (%p7244_p12), [#allocation10], 4294967200 }
  0xc9   : > { %6044 = dma.done.wait (%p7245_p10), [#allocation13], 96   ;;  %p7246_p2 = pmov %p7239_p1 }
  0xca   : > { %p7247_p3 = pmov %p7239_p1 }
  0xcb   : > { %6046 = vsyncadd (%p7246_p2), [#allocation13], 4294967200 }
  0xcc   : > { %6048 = dma.done.wait (%p7247_p3), [#allocation16], 544   ;;  %p7248_p4 = pmov %p7239_p1 }
  0xcd   : > { %p7249_p7 = pmov %p7239_p1 }
  0xce   : > { %6050 = vsyncadd (%p7248_p4), [#allocation16], 4294966752 }
  0xcf   : > { %6052 = dma.done.wait (%p7249_p7), [#allocation19], 64   ;;  %p7250_p8 = pmov %p7239_p1 }
  0xd0   : > { %p7251_p11 = pmov %p7239_p1 }
  0xd1   : > { %6054 = vsyncadd (%p7250_p8), [#allocation19], 4294967232 }
  0xd2   : > { %6056 = dma.done.wait (%p7251_p11), [#allocation22], 16   ;;  %p7252_p0 = pmov %p7239_p1 }
  0xd3   : > { %s4703_s11 = sshll.u32 %s6242_s4, 1  ;;  %v855_v0 = vlaneseq  ;;  %vm963_vm0 = vcmask 1043456   ;;  %vm956_vm1 = vcmask 64512   ;;  %s7253_s2 = sld [smem:[#allocation39_spill]]  ;;  %v953_v8 = vld [vmem:[#allocation3 + $0x4] sm:$0xf] }
  0xd4   : > { %6058 = vsyncadd (%p7252_p0), [#allocation22], 4294967280  ;;  %p848_p1 = scmp.lt.s32.totalorder %s4703_s11, 3  ;;  %v6097_v11 = vmov 0.0   ;;  %5330 = vmatprep.subr.msk.bf16.mxu0 %vm963_vm0, %v953_v8  ;;  %v965_v14 = vsel %vm963_vm0, %v953_v8, 0  ;;  %s7254_s13 = sld [smem:[#allocation42_spill]] }
  0xd5   : > { %v6427_v1 = vshrl.u32 %v855_v0, 7  ;;  %4985 = vmatpush3.bf16.msra.mxu0 %v965_v14  ;;  %v949_v24 = vld [vmem:[#allocation3] sm:$0xf]  ;;  %v1088_v27 = vld [vmem:[#allocation3 + $0x8] sm:$0xf]  ;;  %s7255_s5 = sld [smem:[#allocation41_spill]] }
  0xd6   : > { %s7270_s11 = smov (!%p848_p1, %s4703_s11), 3  ;;  %5331 = vmatprep.subr.msk.bf16.mxu1 %vm963_vm0, %v949_v24  ;;  %v1023_v28 = vsel %vm963_vm0, %v949_v24, 0  ;;  %5332 = vmatprep.subr.msk.bf16.mxu0 %vm963_vm0, %v1088_v27  ;;  %v1098_v30 = vsel %vm963_vm0, %v1088_v27, 0  ;;  %vm1237_vm8 = vcmask 261120   ;;  %vm6098_vm9 = vmmov 0   ;;  %s6100_s23 = smov 112  }
  0xd7   : > { %v864_v2 = vand.u32 15, %v6427_v1  ;;  %v858_v3 = vadd.s32 16, %v6427_v1  ;;  %v857_v4 = vadd.s32 8, %v6427_v1  ;;  %s4855_s24 = sshll.u32 %s7270_s11, 4  ;;  %vm940_vm2 = vcmp.lt.s32.totalorder %v6427_v1, 1  ;;  %4991 = vmatpush3.bf16.msra.mxu1 %v1023_v28  ;;  %s6101_s1 = smov 104  }
  0xd8   : > { %v859_v5 = vadd.s32 24, %v6427_v1  ;;  %vm1078_vm4 = vcmp.lt.s32.totalorder %v6427_v1, 7  ;;  %s6102_s22 = smov 8   ;;  %s6103_s25 = smov 16   ;;  %vm2622_vm10 = vcmask 130048   ;;  %vm2625_vm11 = vcmask 195584  }
  0xd9   : > { %s852_s29 = scalar_lea.vmem %s7253_s2, %s4855_s24  ;;  %vm908_vm3 = vcmp.ne.s32.totalorder %v864_v2, 0  ;;  %v878_v6 = vand.u32 15, %v858_v3  ;;  %v871_v7 = vand.u32 15, %v857_v4  ;;  %s6104_s6 = smov 24   ;;  %vm2858_vm12 = vcmask 523264  }
  0xda   : > { %v932_v9 = vld [vmem:[%s852_s29] sm:$0xff]  ;;  %v933_v10 = vld [vmem:[%s852_s29 + $0x8] sm:$0xff]  ;;  %v6439_v12 = vsel %vm908_vm3, 1.0, %v6097_v11  ;;  %v885_v13 = vand.u32 15, %v859_v5  ;;  %v934_v18 = vld [vmem:[%s852_s29 + $0x10] sm:$0xff]  ;;  %vm4424_vm13 = vcmask 1041409  }
  0xdb   : > { %v936_v15 = vrot.slane %v932_v9, 7  ;;  %v937_v16 = vrot.slane %v933_v10, 7  ;;  %v954_v17 = vpack.c.bf16 %v933_v10, %v932_v9  ;;  %v935_v19 = vld [vmem:[%s852_s29 + $0x18] sm:$0xff]  ;;  %v1074_v20 = vrot.slane %v932_v9, 1  ;;  %v5538_v51 = vld [vmem:[%s7254_s13 + $0x10] sm:$0xff]   ;;  %v5539_v52 = vld [vmem:[%s7254_s13 + $0x8] sm:$0xff]  }
  0xdc   : > { %v1075_v21 = vrot.slane %v933_v10, 1  ;;  %v938_v22 = vrot.slane %v934_v18, 7  ;;  %v955_v23 = vpack.c.bf16 %v935_v19, %v934_v18  ;;  %v1076_v25 = vrot.slane %v934_v18, 1  ;;  %v5537_v50 = vld [vmem:[%s7254_s13 + $0x18] sm:$0xff]   ;;  %v5540_v53 = vld [vmem:[%s7254_s13] sm:$0xff]   ;;  %v6497_v54 = vld [vmem:[%s7254_s13 + $0x28] sm:$0xff]  }
  0xdd   : > { %4986 = vmatprep.mubr.msk.bf16.mxu0 %vm956_vm1, %v954_v17  ;;  %v1077_v26 = vrot.slane %v935_v19, 1  ;;  %v939_v29 = vrot.slane %v935_v19, 7  ;;  %v943_v31 = vsel %vm940_vm2, %v936_v15, %v937_v16  ;;  %vm910_vm5 = vcmp.ne.s32.totalorder %v878_v6, 0  ;;  %5002 = vmatprep.subr.bf16.mxu1 %v5537_v50  ;;  %v4716_v63 = vld [vmem:[%s7255_s5] ss:$0 sm:$0xff]  ;;  %s6099_s29 = smov 120  }
  0xde   : > { %v942_v32 = vsel %vm940_vm2, %v937_v16, %v938_v22  ;;  %4987 = vmatmul.mubr.msk.bf16.vlgmr.msra.gmra.mxu0 %vm956_vm1, %v955_v23  ;;  %v6456_v34 = vsel %vm910_vm5, 1.0, %v6097_v11  ;;  %vm921_vm6 = vcmp.ne.s32.totalorder %v871_v7, 15  ;;  %v1080_v39 = vsel %vm1078_vm4, %v1075_v21, %v1076_v25  ;;  %s7257_s0 = sld [smem:[#allocation48_spill]]  ;;  %s6105_s24 = smov [#allocation23]  }
  0xdf   : > { %v944_v33 = vsel %vm940_vm2, %v939_v29, %v936_v15  ;;  %v941_v35 = vsel %vm940_vm2, %v938_v22, %v939_v29  ;;  %4997 = vmatpush3.bf16.msra.mxu0 %v1098_v30  ;;  %v947_v37 = vmul.f32 %v6456_v34, %v942_v32  ;;  %v6463_v38 = vsel %vm921_vm6, 1.0, %v6097_v11  ;;  %s5993_s26 = sshll.u32 %s6105_s24, 4  ;;  %s5994_s26 = int_to_ptr.vmem [resolvable:$false] %s5993_s26 }
  0xe0   : > { %v945_v36 = vmul.f32 %v6439_v12, %v944_v33  ;;  %v1081_v40 = vsel %vm1078_vm4, %v1074_v20, %v1075_v21  ;;  %v1084_v41 = vmul.f32 %v6463_v38, %v1080_v39  ;;  %vm923_vm7 = vcmp.ne.s32.totalorder %v885_v13, 15  ;;  %5010 = vmatprep.subr.bf16.mxu0 %v5539_v52  ;;  %s5995_s5 = scalar_lea.vmem %s5994_s26, 64 }
  0xe1   : > { %v1079_v42 = vsel %vm1078_vm4, %v1076_v25, %v1077_v26  ;;  %v951_v44 = vpack.c.bf16 %v941_v35, %v947_v37  ;;  %v6473_v45 = vsel %vm923_vm7, 1.0, %v6097_v11  ;;  %v1082_v46 = vsel %vm1078_vm4, %v1077_v26, %v1074_v20 }
  0xe2   : > { %v950_v43 = vpack.c.bf16 %v943_v31, %v945_v36  ;;  %v1089_v47 = vpack.c.bf16 %v1084_v41, %v1081_v40  ;;  %v1086_v48 = vmul.f32 %v6473_v45, %v1082_v46  ;;  %vm4482_vm14 = vcmask 33792  }
  0xe4   : > { %4992 = vmatprep.mubr.msk.bf16.mxu1 %vm956_vm1, %v950_v43  ;;  %4998 = vmatprep.mubr.msk.bf16.mxu0 %vm956_vm1, %v1089_v47  ;;  %v1090_v49 = vpack.c.bf16 %v1086_v48, %v1079_v42 }
  0xe5   : > { %4993 = vmatmul.mubr.msk.bf16.vlgmr.msra.gmra.mxu1 %vm956_vm1, %v951_v44 }
  0xe6   : > { %4999 = vmatmul.mubr.msk.bf16.vlgmr.msra.gmra.mxu0 %vm956_vm1, %v1090_v49  ;;  %5003 = vmatpush3.bf16.msra.mxu1 %v5537_v50 }
  0xe7   : > { %5004 = vmatprep.subr.bf16.mxu1 %v5538_v51  ;;  %5011 = vmatpush3.bf16.msra.mxu0 %v5539_v52 }
  0xe8   : > { %5012 = vmatprep.subr.bf16.mxu0 %v5540_v53 }
  0xea   : > { %5005 = vmatpush3.bf16.msra.mxu1 %v5538_v51 }
  0xeb   : > { %5018 = vmatprep.subr.bf16.mxu1 %v6497_v54  ;;  %5013 = vmatpush3.bf16.msra.mxu0 %v5540_v53 }
  0xec   : > { %5026 = vmatprep.subr.bf16.mxu0 %v6097_v11 }
 0x19e   : > { %v4988_v55 = vpop.f32.mrf.mxu0 }
 0x1a0   : > { %v1001_v56 = vpop.f32.mrf.mxu0 }
 0x1a2   : > { %v4989_v57 = vpop.f32.mrf.mxu0 }
 0x1a4   : > { %v1004_v59 = vpop.f32.mrf.mxu0 }
 0x1a5   : > { %v4994_v58 = vpop.f32.mrf.mxu1 }
 0x1a6   : > { %v1068_v60 = vadd.f32 %v4994_v58, %v4988_v55  ;;  %v5000_v62 = vpop.f32.mrf.mxu0 }
 0x1a7   : > { %v1059_v61 = vpop.f32.mrf.mxu1 }
 0x1a8   : > { %v1060_v0 = vadd.f32 %v1059_v61, %v1001_v56  ;;  %v1151_v2 = vadd.f32 %v5000_v62, %v1068_v60  ;;  %v1134_v4 = vpop.f32.mrf.mxu0 }
 0x1a9   : > { %v4995_v3 = vpop.f32.mrf.mxu1 }
 0x1aa   : > { %v1071_v5 = vadd.f32 %v4995_v3, %v4989_v57  ;;  %v1162_v6 = vadd.f32 %v4716_v63, %v1151_v2  ;;  %v1149_v7 = vadd.f32 %v1134_v4, %v1060_v0  ;;  %v5001_v9 = vpop.f32.mrf.mxu0 }
 0x1ab   : > { %v1062_v8 = vpop.f32.mrf.mxu1 }
 0x1ac   : > { %v1166_v10 = vmul.f32 %v1162_v6, %v1162_v6  ;;  %v1063_v13 = vadd.f32 %v1062_v8, %v1004_v59  ;;  %v1160_v14 = vadd.f32 %v4716_v63, %v1149_v7  ;;  %v1152_v15 = vadd.f32 %v5001_v9, %v1071_v5  ;;  %v1137_v16 = vpop.f32.mrf.mxu0 }
 0x1ae   : > { %v1170_v17 = vmul.f32 %v1166_v10, %v1162_v6  ;;  %v1164_v18 = vmul.f32 %v1160_v14, %v1160_v14  ;;  %v1163_v19 = vadd.f32 %v4716_v63, %v1152_v15  ;;  %v1150_v20 = vadd.f32 %v1137_v16, %v1063_v13 }
 0x1b0   : > { %v1174_v21 = vmul.f32 0.044715, %v1170_v17  ;;  %v1168_v22 = vmul.f32 %v1164_v18, %v1160_v14  ;;  %v1167_v23 = vmul.f32 %v1163_v19, %v1163_v19  ;;  %v1161_v24 = vadd.f32 %v4716_v63, %v1150_v20 }
 0x1b2   : > { %v1178_v25 = vadd.f32 %v1174_v21, %v1162_v6  ;;  %v1172_v26 = vmul.f32 0.044715, %v1168_v22  ;;  %v1171_v27 = vmul.f32 %v1167_v23, %v1163_v19  ;;  %v1165_v28 = vmul.f32 %v1161_v24, %v1161_v24 }
 0x1b4   : > { %v1182_v29 = vmul.f32 0.7978846, %v1178_v25  ;;  %v1176_v30 = vadd.f32 %v1172_v26, %v1160_v14  ;;  %v1175_v31 = vmul.f32 0.044715, %v1171_v27  ;;  %v1169_v32 = vmul.f32 %v1165_v28, %v1161_v24 }
 0x1b6   : > { %5573 = vtanh.f32 %v1182_v29  ;;  %v1180_v33 = vmul.f32 0.7978846, %v1176_v30  ;;  %v1179_v35 = vadd.f32 %v1175_v31, %v1163_v19  ;;  %v1173_v36 = vmul.f32 0.044715, %v1169_v32 }
 0x1b8   : > { %5575 = vtanh.f32 %v1180_v33  ;;  %v1183_v37 = vmul.f32 0.7978846, %v1179_v35  ;;  %v1177_v39 = vadd.f32 %v1173_v36, %v1161_v24 }
 0x1ba   : > { %5577 = vtanh.f32 %v1183_v37  ;;  %v1181_v40 = vmul.f32 0.7978846, %v1177_v39 }
 0x1bc   : > { %5579 = vtanh.f32 %v1181_v40 }
 0x1c3   : > { %v5574_v41 = vpop.eup %5573 }
 0x1c4   : > { %v1190_v42 = vadd.f32 1.0, %v5574_v41 }
 0x1c5   : > { %v5576_v43 = vpop.eup %5575 }
 0x1c6   : > { %v1188_v44 = vadd.f32 1.0, %v5576_v43  ;;  %v1194_v47 = vmul.f32 0.5, %v1190_v42  ;;  %v4737_v42 = vld [vmem:[#allocation6] ss:$0 sm:$0xff] }
 0x1c7   : > { %v5578_v46 = vpop.eup %5577 }
 0x1c8   : > { %v1192_v48 = vmul.f32 0.5, %v1188_v44  ;;  %v1191_v49 = vadd.f32 1.0, %v5578_v46  ;;  %v1198_v55 = vmul.f32 %v1194_v47, %v1162_v6  ;;  %v5542_v6 = vld [vmem:[%s7254_s13 + $0x20] sm:$0xff]  }
 0x1c9   : > { %v5580_v50 = vpop.eup %5579 }
 0x1ca   : > { %v1196_v51 = vmul.f32 %v1192_v48, %v1160_v14  ;;  %v1195_v52 = vmul.f32 0.5, %v1191_v49  ;;  %v1189_v53 = vadd.f32 1.0, %v5580_v50  ;;  %v1202_v62 = vrot.slane %v1198_v55, 7 }
 0x1cb   : > { %v1362_v8 = vrot.slane %v1198_v55, 1 }
 0x1cc   : > { %v1199_v56 = vmul.f32 %v1195_v52, %v1163_v19  ;;  %v1193_v57 = vmul.f32 0.5, %v1189_v53  ;;  %v1200_v60 = vrot.slane %v1196_v51, 7  ;;  %v1360_v3 = vrot.slane %v1196_v51, 1 }
 0x1ce   : > { %v1363_v58 = vrot.slane %v1199_v56, 1  ;;  %v1197_v59 = vmul.f32 %v1193_v57, %v1161_v24  ;;  %v1203_v61 = vrot.slane %v1199_v56, 7  ;;  %v1224_v4 = vpack.c.bf16 %v1199_v56, %v1198_v55 }
 0x1d0   : > { %v1223_v63 = vpack.c.bf16 %v1197_v59, %v1196_v51  ;;  %v1201_v0 = vrot.slane %v1197_v59, 7  ;;  %v1207_v2 = vsel %vm940_vm2, %v1203_v61, %v1200_v60  ;;  %v1361_v7 = vrot.slane %v1197_v59, 1 }
 0x1d1   : > { %v1208_v5 = vmul.f32 %v6439_v12, %v1207_v2  ;;  %v1367_v13 = vsel %vm1078_vm4, %v1363_v58, %v1360_v3  ;;  %v1204_v16 = vsel %vm940_vm2, %v1202_v62, %v1203_v61 }
 0x1d2   : > { %5006 = vmatprep.mubr.msk.bf16.mxu1 %vm1237_vm8, %v1223_v63  ;;  %v1206_v9 = vsel %vm940_vm2, %v1200_v60, %v1201_v0  ;;  %v1205_v10 = vsel %vm940_vm2, %v1201_v0, %v1202_v62  ;;  %v1365_v15 = vsel %vm1078_vm4, %v1361_v7, %v1362_v8  ;;  %v1366_v19 = vsel %vm1078_vm4, %v1360_v3, %v1361_v7 }
 0x1d3   : > { %5007 = vmatmul.mubr.msk.bf16.vlgmr.msra.gmra.mxu1 %vm1237_vm8, %v1224_v4  ;;  %v1216_v12 = vpack.c.bf16 %v1206_v9, %v1208_v5  ;;  %v1210_v14 = vmul.f32 %v6456_v34, %v1205_v10  ;;  %v1369_v17 = vmul.f32 %v6463_v38, %v1365_v15  ;;  %v1371_v20 = vmul.f32 %v6473_v45, %v1367_v13  ;;  %v1457_v4 = vld [vmem:[#allocation8] sm:$0xff] }
 0x1d4   : > { %5019 = vmatpush3.bf16.msra.mxu1 %v6497_v54  ;;  %v1364_v54 = vsel %vm1078_vm4, %v1362_v8, %v1363_v58 }
 0x1d5   : > { %5014 = vmatprep.mubr.msk.bf16.mxu0 %vm1237_vm8, %v1216_v12  ;;  %v1217_v18 = vpack.c.bf16 %v1204_v16, %v1210_v14  ;;  %5020 = vmatprep.subr.bf16.mxu1 %v5542_v6  ;;  %v1377_v34 = vpack.c.bf16 %v1369_v17, %v1366_v19  ;;  %v1378_v21 = vpack.c.bf16 %v1371_v20, %v1364_v54  ;;  %v5543_v20 = vld [vmem:[%s7167_s7 + $0x8] sm:$0xff]   ;;  %v5545_v54 = vld [vmem:[%s7167_s7] sm:$0xff]  }
 0x1d7   : > { %5015 = vmatmul.mubr.msk.bf16.vlgmr.msra.gmra.mxu0 %vm1237_vm8, %v1217_v18  ;;  %5022 = vmatprep.mubr.msk.bf16.mxu1 %vm1237_vm8, %v1377_v34  ;;  %v5544_v34 = vld [vmem:[%s7169_s9 + $0x8] sm:$0xff]  }
 0x1d8   : > { %5021 = vmatpush3.bf16.msra.mxu1 %v5542_v6  ;;  %5030 = vmatprep.mubr.msk.bf16.mxu0 %vm6098_vm9, %v6097_v11 }
 0x1d9   : > { %5034 = vmatprep.subr.bf16.mxu1 %v6097_v11  ;;  %5027 = vmatpush3.bf16.msra.mxu0 %v5543_v20 }
 0x1da   : > { %5028 = vmatprep.subr.bf16.mxu0 %v6097_v11 }
 0x1db   : > { %5023 = vmatmul.mubr.msk.bf16.vlgmr.msra.gmra.mxu1 %vm1237_vm8, %v1378_v21  ;;  %v5546_v21 = vld [vmem:[%s7169_s9] sm:$0xff]  }
 0x1dc   : > { %5038 = vmatprep.mubr.msk.bf16.mxu1 %vm6098_vm9, %v6097_v11  ;;  %5035 = vmatpush3.bf16.msra.mxu1 %v5544_v34 }
 0x1dd   : > { %5036 = vmatprep.subr.bf16.mxu1 %v6097_v11  ;;  %5029 = vmatpush3.bf16.msra.mxu0 %v5545_v54 }
 0x1de   : > { %5042 = vmatprep.subr.bf16.mxu0 %v6097_v11 }
 0x1e0   : > { %5037 = vmatpush3.bf16.msra.mxu1 %v5546_v21 }
 0x1e1   : > { %5050 = vmatprep.subr.bf16.mxu1 %v6097_v11 }
 0x293   : > { %v5008_v38 = vpop.f32.mrf.mxu1 }
 0x295   : > { %v1278_v22 = vpop.f32.mrf.mxu1 }
 0x297   : > { %v5009_v23 = vpop.f32.mrf.mxu1  ;;  %v5016_v24 = vpop.f32.mrf.mxu0 }
 0x298   : > { %v1354_v26 = vadd.f32 %v5016_v24, %v5008_v38 }
 0x299   : > { %v1281_v25 = vpop.f32.mrf.mxu1  ;;  %v1345_v45 = vpop.f32.mrf.mxu0 }
 0x29a   : > { %v1346_v29 = vadd.f32 %v1345_v45, %v1278_v22 }
 0x29b   : > { %v5017_v27 = vpop.f32.mrf.mxu0  ;;  %v5024_v28 = vpop.f32.mrf.mxu1 }
 0x29c   : > { %v1448_v30 = vadd.f32 %v5024_v28, %v1354_v26  ;;  %v1357_v33 = vadd.f32 %v5017_v27, %v5009_v23  ;;  %v6572_v26 = vsub.s32 0, %v6427_v1  ;;  %v1487_v27 = vld [vmem:[#allocation9] sm:$0x3] }
 0x29d   : > { %v1348_v31 = vpop.f32.mrf.mxu0  ;;  %v1431_v32 = vpop.f32.mrf.mxu1 }
 0x29e   : > { %1452 = vst.msk [vmem:[#allocation2 + $0x10] sm:$0xff] %vm1237_vm8, %v1448_v30  ;;  %v1446_v35 = vadd.f32 %v1431_v32, %v1346_v29  ;;  %v1349_v37 = vadd.f32 %v1348_v31, %v1281_v25  ;;  %v1518_v30 = vrot.slane %v1487_v27, %v6572_v26  ;;  %v6576_v31 = vsub.s32 1, %v6427_v1  ;;  %v5548_v1 = vld [vmem:[%s7170_s10] sm:$0xff]  }
 0x29f   : > { %v5025_v36 = vpop.f32.mrf.mxu1 }
 0x2a0   : > { %1450 = vst.msk [vmem:[#allocation2] sm:$0xff] %vm1237_vm8, %v1446_v35  ;;  %v1449_v39 = vadd.f32 %v5025_v36, %v1357_v33  ;;  %v1524_v36 = vrot.slane %v1487_v27, %v6576_v31 }
 0x2a1   : > { %v1434_v40 = vpop.f32.mrf.mxu1 }
 0x2a2   : > { %1453 = vst.msk [vmem:[#allocation2 + $0x18] sm:$0xff] %vm1237_vm8, %v1449_v39  ;;  %v1447_v41 = vadd.f32 %v1434_v40, %v1349_v37 }
 0x2a4   : > { %1451 = vst.msk [vmem:[#allocation2 + $0x8] sm:$0xff] %vm1237_vm8, %v1447_v41  ;;  %v5547_v41 = vld [vmem:[%s7170_s10 + $0x8] sm:$0xff]  }
 0x2a9   : > { %v1456_v43 = vld [vmem:[#allocation2 + $0x10] ss:$2 sm:$0xff] }
 0x2aa   : > { %v1466_v44 = vadd.f32 %v4737_v42, %v1456_v43 }
 0x2ab   : > { %v1454_v46 = vld [vmem:[#allocation2] ss:$2 sm:$0xff] }
 0x2ac   : > { %v1465_v47 = vadd.f32 %v4737_v42, %v1454_v46  ;;  %v1468_v48 = vmul.f32 %v1466_v44, %v1466_v44 }
 0x2ae   : > { %v1467_v49 = vmul.f32 %v1465_v47, %v1465_v47  ;;  %v1470_v50 = vmul.f32 %v1468_v48, %v1466_v44 }
 0x2b0   : > { %v1469_v51 = vmul.f32 %v1467_v49, %v1465_v47  ;;  %v1472_v52 = vmul.f32 0.044715, %v1470_v50 }
 0x2b2   : > { %v1471_v53 = vmul.f32 0.044715, %v1469_v51  ;;  %v1474_v55 = vadd.f32 %v1472_v52, %v1466_v44 }
 0x2b4   : > { %v1473_v56 = vadd.f32 %v1471_v53, %v1465_v47  ;;  %v1476_v57 = vmul.f32 0.7978846, %v1474_v55 }
 0x2b6   : > { %v1475_v58 = vmul.f32 0.7978846, %v1473_v56  ;;  %5581 = vtanh.f32 %v1476_v57 }
 0x2b8   : > { %5583 = vtanh.f32 %v1475_v58  ;;  %v4745_v58 = vld [vmem:[#allocation11] ss:$0 sm:$0xff] }
 0x2c3   : > { %v5582_v59 = vpop.eup %5581 }
 0x2c4   : > { %v1480_v60 = vadd.f32 1.0, %v5582_v59 }
 0x2c5   : > { %v5584_v61 = vpop.eup %5583 }
 0x2c6   : > { %v1479_v62 = vadd.f32 1.0, %v5584_v61  ;;  %v1482_v63 = vmul.f32 0.5, %v1480_v60 }
 0x2c8   : > { %v1481_v0 = vmul.f32 0.5, %v1479_v62  ;;  %v1484_v3 = vmul.f32 %v1482_v63, %v1466_v44 }
 0x2ca   : > { %v1483_v2 = vmul.f32 %v1481_v0, %v1465_v47  ;;  %v6543_v7 = vadd.f32 %v1484_v3, %v1457_v4  ;;  %v4738_v47 = vld [vmem:[%s7168_s8] ss:$0 sm:$0xff] }
 0x2cc   : > { %v6539_v5 = vadd.f32 %v1483_v2, %v1457_v4  ;;  %v1491_v8 = vsel %vm1237_vm8, %v6543_v7, 0.0 }
 0x2ce   : > { %v1488_v6 = vsel %vm1237_vm8, %v6539_v5, 0.0 }
 0x2cf   : > { %1489 = vadd.xlane.f32.xlu0 %v1488_v6 }
 0x2d3   : > { %1492 = vadd.xlane.f32.xlu0 %v1491_v8 }
 0x358   : > { %v1490_v9 = vpop.xlane.xlu0 %1489 }
 0x359   : > { %v1495_v10 = vmul.f32 0.03125, %v1490_v9 }
 0x35b   : > { %v1497_v13 = vsub.f32 %v6539_v5, %v1495_v10 }
 0x35c   : > { %v1493_v12 = vpop.xlane.xlu0 %1492 }
 0x35d   : > { %v1496_v14 = vmul.f32 0.03125, %v1493_v12  ;;  %v1499_v15 = vmul.f32 %v1497_v13, %v1497_v13 }
 0x35f   : > { %v1498_v16 = vsub.f32 %v6543_v7, %v1496_v14  ;;  %v1501_v17 = vsel %vm1237_vm8, %v1499_v15, 0.0 }
 0x360   : > { %1502 = vadd.xlane.f32.xlu1 %v1501_v17 }
 0x361   : > { %v1500_v18 = vmul.f32 %v1498_v16, %v1498_v16 }
 0x363   : > { %v1504_v19 = vsel %vm1237_vm8, %v1500_v18, 0.0 }
 0x364   : > { %1505 = vadd.xlane.f32.xlu1 %v1504_v19 }
 0x3e9   : > { %v1503_v38 = vpop.xlane.xlu1 %1502 }
 0x3ea   : > { %v1507_v22 = vmul.f32 0.03125, %v1503_v38 }
 0x3ec   : > { %v1509_v23 = vadd.f32 1e-05, %v1507_v22 }
 0x3ed   : > { %v1506_v24 = vpop.xlane.xlu1 %1505 }
 0x3ee   : > { %5585 = vrsqrt.f32 %v1509_v23  ;;  %v1508_v25 = vmul.f32 0.03125, %v1506_v24 }
 0x3f0   : > { %v1510_v45 = vadd.f32 1e-05, %v1508_v25 }
 0x3f2   : > { %5587 = vrsqrt.f32 %v1510_v45 }
 0x3fb   : > { %v5586_v28 = vpop.eup %5585 }
 0x3fc   : > { %v1513_v29 = vmul.f32 %v5586_v28, %v1497_v13 }
 0x3fe   : > { %v1519_v35 = vmul.f32 %v1518_v30, %v1513_v29 }
 0x3ff   : > { %v5588_v32 = vpop.eup %5587 }
 0x400   : > { %v1514_v33 = vmul.f32 %v5588_v32, %v1498_v16  ;;  %v1525_v39 = vadd.f32 %v1524_v36, %v1519_v35 }
 0x402   : > { %v1520_v37 = vmul.f32 %v1518_v30, %v1514_v33 }
 0x404   : > { %v1526_v40 = vadd.f32 %v1524_v36, %v1520_v37 }
 0x406   : > { %v1531_v42 = vpack.c.bf16 %v1526_v40, %v1525_v39 }
 0x408   : > { %5031 = vmatmul.mubr.msk.bf16.vlgmr.msra.gmra.mxu0 %vm1237_vm8, %v1531_v42  ;;  %5039 = vmatmul.mubr.msk.bf16.vlgmr.msra.gmra.mxu1 %vm1237_vm8, %v1531_v42 }
 0x409   : > { %5043 = vmatpush3.bf16.msra.mxu0 %v5547_v41  ;;  %5046 = vmatprep.mubr.msk.bf16.mxu0 %vm6098_vm9, %v6097_v11 }
 0x40a   : > { %5044 = vmatprep.subr.bf16.mxu0 %v6097_v11  ;;  %5052 = vmatprep.mubr.msk.bf16.mxu1 %vm6098_vm9, %v6097_v11 }
 0x40d   : > { %5045 = vmatpush3.bf16.msra.mxu0 %v5548_v1 }
 0x40e   : > { %5056 = vmatprep.subr.bf16.mxu0 %v6097_v11 }
 0x410   : > { %5047 = vmatmul.mubr.msk.bf16.vlgmr.msra.gmra.mxu0 %vm1237_vm8, %v1531_v42 }
 0x411   : > { %5058 = vmatprep.mubr.msk.bf16.mxu0 %vm6098_vm9, %v6097_v11 }
 0x4c8   : > { %v1588_v43 = vpop.f32.mrf.mxu0  ;;  %v1645_v44 = vpop.f32.mrf.mxu1 }
 0x4c9   : > { %v6596_v46 = vpack.c.bf16 %v1645_v44, %v1645_v44  ;;  %v1589_v53 = vadd.f32 %v4738_v47, %v1588_v43 }
 0x4ca   : > { %v5032_v48 = vpop.f32.mrf.mxu0  ;;  %v5040_v49 = vpop.f32.mrf.mxu1 }
 0x4cb   : > { %v1724_v50 = vsel %vm956_vm1, %v6596_v46, 0  ;;  %v6608_v61 = vpack.c.bf16 %v1589_v53, %v1589_v53 }
 0x4cc   : > { %v1591_v51 = vpop.f32.mrf.mxu0  ;;  %v1648_v52 = vpop.f32.mrf.mxu1  ;;  %5051 = vmatpush3.bf16.xpose.msra.mxu1 %v1724_v50 }
 0x4cd   : > { %v6603_v55 = vpack.c.bf16 %v1648_v52, %v1648_v52  ;;  %5062 = vmatprep.subr.bf16.mxu1 %v6097_v11  ;;  %v1592_v62 = vadd.f32 %v4738_v47, %v1591_v51 }
 0x4ce   : > { %v5033_v56 = vpop.f32.mrf.mxu0  ;;  %v5041_v57 = vpop.f32.mrf.mxu1 }
 0x4cf   : > { %v1770_v59 = vsel %vm956_vm1, %v6603_v55, 0  ;;  %v6617_v4 = vpack.c.bf16 %v1592_v62, %v1592_v62 }
 0x4d0   : > { %v1709_v60 = vpop.f32.mrf.mxu0  ;;  %5057 = vmatpush3.bf16.xpose.msra.mxu0 %v1770_v59 }
 0x4d1   : > { %v1710_v63 = vadd.f32 %v4745_v58, %v1709_v60  ;;  %5068 = vmatprep.subr.bf16.mxu0 %v6097_v11 }
 0x4d2   : > { %v5048_v0 = vpop.f32.mrf.mxu0 }
 0x4d3   : > { %v6611_v2 = vpack.c.bf16 %v1710_v63, %v1710_v63  ;;  %5053 = vmatmul.mubr.msk.bf16.vlgmr.msra.gmra.mxu1 %vm956_vm1, %v6608_v61 }
 0x4d4   : > { %v1712_v3 = vpop.f32.mrf.mxu0  ;;  %5064 = vmatprep.mubr.msk.bf16.mxu1 %vm6098_vm9, %v6097_v11 }
 0x4d5   : > { %v1713_v6 = vadd.f32 %v4745_v58, %v1712_v3  ;;  %v1842_v8 = vsel %vm963_vm0, %v6611_v2, 0 }
 0x4d6   : > { %v5049_v9 = vpop.f32.mrf.mxu0  ;;  %5063 = vmatpush3.bf16.msra.mxu1 %v1842_v8 }
 0x4d7   : > { %v6621_v10 = vpack.c.bf16 %v1713_v6, %v1713_v6  ;;  %5059 = vmatmul.mubr.msk.bf16.vlgmr.msra.gmra.mxu0 %vm956_vm1, %v6617_v4  ;;  %5074 = vmatprep.subr.bf16.mxu1 %v6097_v11 }
 0x4d8   : > { %5070 = vmatprep.mubr.msk.bf16.mxu0 %vm6098_vm9, %v6097_v11 }
 0x4d9   : > { %v1888_v13 = vsel %vm963_vm0, %v6621_v10, 0 }
 0x4da   : > { %5069 = vmatpush3.bf16.msra.mxu0 %v1888_v13 }
 0x4db   : > { %5080 = vmatprep.subr.bf16.mxu0 %v6097_v11 }
 0x593   : > { %v1760_v12 = vpop.f32.mrf.mxu1 }
 0x594   : > { %v1812_v14 = vsel %vm956_vm1, %v1760_v12, -inf }
 0x595   : > { %1813 = vmax.xlane.f32.xlu0 %v1812_v14  ;;  %v5054_v15 = vpop.f32.mrf.mxu1 }
 0x597   : > { %v1763_v16 = vpop.f32.mrf.mxu1  ;;  %v1806_v17 = vpop.f32.mrf.mxu0 }
 0x598   : > { %v1815_v18 = vsel %vm956_vm1, %v1806_v17, -inf }
 0x599   : > { %v5055_v19 = vpop.f32.mrf.mxu1  ;;  %1816 = vmax.xlane.f32.xlu1 %v1815_v18  ;;  %v5060_v20 = vpop.f32.mrf.mxu0 }
 0x59b   : > { %v1809_v34 = vpop.f32.mrf.mxu0 }
 0x59d   : > { %v5061_v54 = vpop.f32.mrf.mxu0 }
 0x5aa   : > { %1986 = vrot.lane.b32.xlu1 %v6603_v55, %s6099_s29 }
 0x61e   : > { %v1814_v21 = vpop.xlane.xlu0 %1813 }
 0x61f   : > { %v1818_v38 = vsub.f32 %v1760_v12, %v1814_v21 }
 0x621   : > { %v1820_v22 = vmul.f32 1.442695, %v1818_v38 }
 0x622   : > { %v1817_v23 = vpop.xlane.xlu1 %1816 }
 0x623   : > { %5589 = vpow2.f32 %v1820_v22  ;;  %v1819_v24 = vsub.f32 %v1806_v17, %v1817_v23 }
 0x625   : > { %v1822_v25 = vmul.f32 1.442695, %v1819_v24 }
 0x626   : > { %v1987_v30 = vpop.permute.xlu1 %1986 }
 0x627   : > { %5591 = vpow2.f32 %v1822_v25  ;;  %v1992_v43 = vsel %vm956_vm1, %v1987_v30, 0 }
 0x630   : > { %v5590_v45 = vpop.eup %5589 }
 0x631   : > { %v1824_v27 = vsel %vm956_vm1, %v5590_v45, 0.0 }
 0x632   : > { %1825 = vadd.xlane.f32.xlu0 %v1824_v27 }
 0x634   : > { %v5592_v28 = vpop.eup %5591 }
 0x635   : > { %v1827_v29 = vsel %vm956_vm1, %v5592_v28, 0.0 }
 0x636   : > { %1828 = vadd.xlane.f32.xlu1 %v1827_v29 }
 0x647   : > { %1931 = vrot.lane.b32.xlu1 %v6608_v61, %s6099_s29 }
 0x648   : > { %1934 = vrot.lane.b32.xlu0 %v6596_v46, %s6099_s29 }
 0x64b   : > { %1983 = vrot.lane.b32.xlu1 %v6617_v4, %s6099_s29 }
 0x6bb   : > { %v1826_v32 = vpop.xlane.xlu0 %1825 }
 0x6bc   : > { %5593 = vrcp.f32 %v1826_v32 }
 0x6bf   : > { %v1829_v33 = vpop.xlane.xlu1 %1828  ;;  %v1935_v37 = vpop.permute.xlu0 %1934 }
 0x6c0   : > { %5595 = vrcp.f32 %v1829_v33  ;;  %v1940_v41 = vsel %vm956_vm1, %v1935_v37, 0 }
 0x6c3   : > { %v1932_v44 = vpop.permute.xlu1 %1931 }
 0x6c7   : > { %v1984_v47 = vpop.permute.xlu1 %1983 }
 0x6c9   : > { %v5594_v35 = vpop.eup %5593 }
 0x6ca   : > { %v1832_v36 = vmul.f32 %v5594_v35, %v5590_v45 }
 0x6cc   : > { %v1834_v39 = vpack.c.bf16 %v1832_v36, %v1832_v36 }
 0x6cd   : > { %v5596_v40 = vpop.eup %5595 }
 0x6ce   : > { %5065 = vmatmul.mubr.msk.bf16.vlgmr.msra.gmra.mxu1 %vm956_vm1, %v1834_v39  ;;  %v1833_v42 = vmul.f32 %v5596_v40, %v5592_v28 }
 0x6cf   : > { %5075 = vmatpush3.bf16.xpose.msra.mxu1 %v1940_v41  ;;  %5076 = vmatprep.mubr.msk.bf16.mxu1 %vm6098_vm9, %v6097_v11 }
 0x6d0   : > { %v1835_v1 = vpack.c.bf16 %v1833_v42, %v1833_v42  ;;  %5086 = vmatprep.subr.bf16.mxu1 %v6097_v11 }
 0x6d2   : > { %5071 = vmatmul.mubr.msk.bf16.vlgmr.msra.gmra.mxu0 %vm956_vm1, %v1835_v1 }
 0x6d3   : > { %5081 = vmatpush3.bf16.xpose.msra.mxu0 %v1992_v43  ;;  %5082 = vmatprep.mubr.msk.bf16.mxu0 %vm6098_vm9, %v6097_v11 }
 0x6d4   : > { %5092 = vmatprep.subr.bf16.mxu0 %v6097_v11 }
 0x6d6   : > { %5077 = vmatmul.mubr.msk.bf16.vlgmr.msra.gmra.mxu1 %vm956_vm1, %v1932_v44 }
 0x6d7   : > { %5088 = vmatprep.mubr.msk.bf16.mxu1 %vm6098_vm9, %v6097_v11 }
 0x6da   : > { %5083 = vmatmul.mubr.msk.bf16.vlgmr.msra.gmra.mxu0 %vm956_vm1, %v1984_v47 }
 0x6db   : > { %5094 = vmatprep.mubr.msk.bf16.mxu0 %vm6098_vm9, %v6097_v11 }
 0x78e   : > { %v6659_v48 = vpop.f32.mrf.mxu1 }
 0x790   : > { %v5066_v49 = vpop.f32.mrf.mxu1 }
 0x792   : > { %v1881_v50 = vpop.f32.mrf.mxu1  ;;  %v6661_v51 = vpop.f32.mrf.mxu0 }
 0x794   : > { %v5067_v52 = vpop.f32.mrf.mxu1  ;;  %v5072_v53 = vpop.f32.mrf.mxu0 }
 0x796   : > { %v1927_v56 = vpop.f32.mrf.mxu0  ;;  %v1976_v57 = vpop.f32.mrf.mxu1 }
 0x797   : > { %v2034_v58 = vsel %vm956_vm1, %v1976_v57, -inf }
 0x798   : > { %2035 = vmax.xlane.f32.xlu0 %v2034_v58  ;;  %v5073_v59 = vpop.f32.mrf.mxu0  ;;  %v5078_v60 = vpop.f32.mrf.mxu1 }
 0x79a   : > { %v1979_v62 = vpop.f32.mrf.mxu1  ;;  %v2028_v63 = vpop.f32.mrf.mxu0 }
 0x79b   : > { %v2037_v0 = vsel %vm956_vm1, %v2028_v63, -inf }
 0x79c   : > { %v5079_v3 = vpop.f32.mrf.mxu1  ;;  %2038 = vmax.xlane.f32.xlu1 %v2037_v0  ;;  %v5084_v6 = vpop.f32.mrf.mxu0 }
 0x79e   : > { %v2031_v8 = vpop.f32.mrf.mxu0 }
 0x7a0   : > { %v5085_v9 = vpop.f32.mrf.mxu0 }
 0x7ad   : > { %2108 = vrot.lane.b32.xlu1 %v6621_v10, %s6099_s29 }
 0x7b1   : > { %2158 = vrot.lane.b32.xlu1 %v6596_v46, %s6100_s23 }
 0x7b5   : > { %2208 = vrot.lane.b32.xlu1 %v6603_v55, %s6100_s23 }
 0x7b9   : > { %2206 = vrot.lane.b32.xlu1 %v6617_v4, %s6100_s23 }
 0x821   : > { %v2036_v13 = vpop.xlane.xlu0 %2035 }
 0x822   : > { %v2040_v12 = vsub.f32 %v1976_v57, %v2036_v13 }
 0x824   : > { %v2042_v14 = vmul.f32 1.442695, %v2040_v12 }
 0x825   : > { %v2039_v15 = vpop.xlane.xlu1 %2038 }
 0x826   : > { %5597 = vpow2.f32 %v2042_v14  ;;  %v2041_v16 = vsub.f32 %v2028_v63, %v2039_v15 }
 0x828   : > { %v2044_v17 = vmul.f32 1.442695, %v2041_v16 }
 0x829   : > { %v2109_v18 = vpop.permute.xlu1 %2108 }
 0x82a   : > { %5599 = vpow2.f32 %v2044_v17  ;;  %v2114_v19 = vsel %vm963_vm0, %v2109_v18, 0 }
 0x82b   : > { %5093 = vmatpush3.bf16.msra.mxu0 %v2114_v19 }
 0x82c   : > { %5104 = vmatprep.subr.bf16.mxu0 %v6097_v11 }
 0x82d   : > { %v2159_v45 = vpop.permute.xlu1 %2158 }
 0x82e   : > { %v2164_v30 = vsel %vm956_vm1, %v2159_v45, 0 }
 0x831   : > { %v2209_v33 = vpop.permute.xlu1 %2208 }
 0x832   : > { %v2214_v36 = vsel %vm956_vm1, %v2209_v33, 0 }
 0x833   : > { %v5598_v20 = vpop.eup %5597 }
 0x834   : > { %v2046_v34 = vsel %vm956_vm1, %v5598_v20, 0.0 }
 0x835   : > { %2047 = vadd.xlane.f32.xlu0 %v2046_v34  ;;  %v2207_v39 = vpop.permute.xlu1 %2206 }
 0x837   : > { %v5600_v54 = vpop.eup %5599 }
 0x838   : > { %v2049_v21 = vsel %vm956_vm1, %v5600_v54, 0.0 }
 0x839   : > { %2050 = vadd.xlane.f32.xlu0 %v2049_v21 }
 0x84f   : > { %2059 = vrot.lane.b32.xlu0 %v6611_v2, %s6099_s29 }
 0x853   : > { %2156 = vrot.lane.b32.xlu0 %v6608_v61, %s6100_s23 }
 0x8be   : > { %v2048_v38 = vpop.xlane.xlu0 %2047 }
 0x8bf   : > { %5601 = vrcp.f32 %v2048_v38 }
 0x8c2   : > { %v2051_v22 = vpop.xlane.xlu0 %2050 }
 0x8c3   : > { %5603 = vrcp.f32 %v2051_v22 }
 0x8c6   : > { %v2060_v23 = vpop.permute.xlu0 %2059 }
 0x8c7   : > { %v2065_v24 = vsel %vm963_vm0, %v2060_v23, 0 }
 0x8c8   : > { %5087 = vmatpush3.bf16.msra.mxu1 %v2065_v24 }
 0x8c9   : > { %5098 = vmatprep.subr.bf16.mxu1 %v6097_v11 }
 0x8ca   : > { %v2157_v37 = vpop.permute.xlu0 %2156 }
 0x8cc   : > { %v5602_v25 = vpop.eup %5601 }
 0x8cd   : > { %v2054_v27 = vmul.f32 %v5602_v25, %v5598_v20 }
 0x8cf   : > { %v2056_v28 = vpack.c.bf16 %v2054_v27, %v2054_v27 }
 0x8d0   : > { %v5604_v29 = vpop.eup %5603 }
 0x8d1   : > { %5089 = vmatmul.mubr.msk.bf16.vlgmr.msra.gmra.mxu1 %vm956_vm1, %v2056_v28  ;;  %v2055_v32 = vmul.f32 %v5604_v29, %v5600_v54 }
 0x8d2   : > { %5099 = vmatpush3.bf16.xpose.msra.mxu1 %v2164_v30  ;;  %5100 = vmatprep.mubr.msk.bf16.mxu1 %vm6098_vm9, %v6097_v11 }
 0x8d3   : > { %v2057_v35 = vpack.c.bf16 %v2055_v32, %v2055_v32  ;;  %5110 = vmatprep.subr.bf16.mxu1 %v6097_v11 }
 0x8d5   : > { %5095 = vmatmul.mubr.msk.bf16.vlgmr.msra.gmra.mxu0 %vm956_vm1, %v2057_v35 }
 0x8d6   : > { %5105 = vmatpush3.bf16.xpose.msra.mxu0 %v2214_v36  ;;  %5106 = vmatprep.mubr.msk.bf16.mxu0 %vm6098_vm9, %v6097_v11 }
 0x8d7   : > { %5116 = vmatprep.subr.bf16.mxu0 %v6097_v11 }
 0x8d9   : > { %5101 = vmatmul.mubr.msk.bf16.vlgmr.msra.gmra.mxu1 %vm956_vm1, %v2157_v37 }
 0x8da   : > { %5112 = vmatprep.mubr.msk.bf16.mxu1 %vm6098_vm9, %v6097_v11 }
 0x8dd   : > { %5107 = vmatmul.mubr.msk.bf16.vlgmr.msra.gmra.mxu0 %vm956_vm1, %v2207_v39 }
 0x8de   : > { %5118 = vmatprep.mubr.msk.bf16.mxu0 %vm6098_vm9, %v6097_v11 }
 0x991   : > { %v6699_v40 = vpop.f32.mrf.mxu1 }
 0x993   : > { %v5090_v41 = vpop.f32.mrf.mxu1 }
 0x995   : > { %v2104_v42 = vpop.f32.mrf.mxu1  ;;  %v6701_v1 = vpop.f32.mrf.mxu0 }
 0x996   : > { %v5507_v43 = vpack.i.bf16 %v6701_v1, %v6699_v40 }
 0x997   : > { %v5091_v44 = vpop.f32.mrf.mxu1  ;;  %v5096_v47 = vpop.f32.mrf.mxu0 }
 0x999   : > { %v2153_v49 = vpop.f32.mrf.mxu0  ;;  %v2200_v50 = vpop.f32.mrf.mxu1 }
 0x99a   : > { %v2256_v52 = vsel %vm956_vm1, %v2200_v50, -inf }
 0x99b   : > { %2257 = vmax.xlane.f32.xlu0 %v2256_v52  ;;  %v5097_v53 = vpop.f32.mrf.mxu0  ;;  %v5102_v56 = vpop.f32.mrf.mxu1 }
 0x99d   : > { %v2203_v57 = vpop.f32.mrf.mxu1  ;;  %v2250_v58 = vpop.f32.mrf.mxu0 }
 0x99e   : > { %v2259_v59 = vsel %vm956_vm1, %v2250_v58, -inf }
 0x99f   : > { %v5103_v60 = vpop.f32.mrf.mxu1  ;;  %2260 = vmax.xlane.f32.xlu1 %v2259_v59  ;;  %v5108_v62 = vpop.f32.mrf.mxu0 }
 0x9a1   : > { %v2253_v63 = vpop.f32.mrf.mxu0 }
 0x9a3   : > { %v5109_v0 = vpop.f32.mrf.mxu0 }
 0x9b0   : > { %2328 = vrot.lane.b32.xlu1 %v6621_v10, %s6100_s23 }
 0x9b4   : > { %2378 = vrot.lane.b32.xlu1 %v6596_v46, %s6101_s1 }
 0x9b8   : > { %2428 = vrot.lane.b32.xlu1 %v6603_v55, %s6101_s1 }
 0x9bc   : > { %2426 = vrot.lane.b32.xlu1 %v6617_v4, %s6101_s1 }
 0xa24   : > { %v2258_v3 = vpop.xlane.xlu0 %2257 }
 0xa25   : > { %v2262_v6 = vsub.f32 %v2200_v50, %v2258_v3 }
 0xa27   : > { %v2264_v8 = vmul.f32 1.442695, %v2262_v6 }
 0xa28   : > { %v2261_v9 = vpop.xlane.xlu1 %2260 }
 0xa29   : > { %5605 = vpow2.f32 %v2264_v8  ;;  %v2263_v13 = vsub.f32 %v2250_v58, %v2261_v9 }
 0xa2b   : > { %v2266_v12 = vmul.f32 1.442695, %v2263_v13 }
 0xa2c   : > { %v2329_v14 = vpop.permute.xlu1 %2328 }
 0xa2d   : > { %5607 = vpow2.f32 %v2266_v12  ;;  %v2334_v15 = vsel %vm963_vm0, %v2329_v14, 0 }
 0xa2e   : > { %5117 = vmatpush3.bf16.msra.mxu0 %v2334_v15 }
 0xa2f   : > { %5128 = vmatprep.subr.bf16.mxu0 %v6097_v11 }
 0xa30   : > { %v2379_v54 = vpop.permute.xlu1 %2378 }
 0xa31   : > { %v2384_v23 = vsel %vm956_vm1, %v2379_v54, 0 }
 0xa34   : > { %v2429_v24 = vpop.permute.xlu1 %2428 }
 0xa35   : > { %v2434_v45 = vsel %vm956_vm1, %v2429_v24, 0 }
 0xa36   : > { %v5606_v46 = vpop.eup %5605 }
 0xa37   : > { %v2268_v55 = vsel %vm956_vm1, %v5606_v46, 0.0 }
 0xa38   : > { %2269 = vadd.xlane.f32.xlu0 %v2268_v55  ;;  %v2427_v28 = vpop.permute.xlu1 %2426 }
 0xa3a   : > { %v5608_v16 = vpop.eup %5607 }
 0xa3b   : > { %v2271_v4 = vsel %vm956_vm1, %v5608_v16, 0.0 }
 0xa3c   : > { %2272 = vadd.xlane.f32.xlu0 %v2271_v4 }
 0xa52   : > { %2280 = vrot.lane.b32.xlu0 %v6611_v2, %s6100_s23 }
 0xa56   : > { %2376 = vrot.lane.b32.xlu0 %v6608_v61, %s6101_s1 }
 0xac1   : > { %v2270_v17 = vpop.xlane.xlu0 %2269 }
 0xac2   : > { %5609 = vrcp.f32 %v2270_v17  ;;  %v5549_v17 = vld [vmem:[%s7172_s12 + $0x8] sm:$0xff]  }
 0xac5   : > { %v2273_v18 = vpop.xlane.xlu0 %2272 }
 0xac6   : > { %5611 = vrcp.f32 %v2273_v18  ;;  %v5550_v18 = vld [vmem:[%s7172_s12] sm:$0xff]  }
 0xac9   : > { %v2281_v19 = vpop.permute.xlu0 %2280 }
 0xaca   : > { %v2286_v20 = vsel %vm963_vm0, %v2281_v19, 0 }
 0xacb   : > { %5111 = vmatpush3.bf16.msra.mxu1 %v2286_v20 }
 0xacc   : > { %5122 = vmatprep.subr.bf16.mxu1 %v6097_v11 }
 0xacd   : > { %v2377_v27 = vpop.permute.xlu0 %2376 }
 0xacf   : > { %v5610_v34 = vpop.eup %5609 }
 0xad0   : > { %v2276_v21 = vmul.f32 %v5610_v34, %v5606_v46 }
 0xad2   : > { %v2278_v38 = vpack.c.bf16 %v2276_v21, %v2276_v21 }
 0xad3   : > { %v5612_v22 = vpop.eup %5611 }
 0xad4   : > { %5113 = vmatmul.mubr.msk.bf16.vlgmr.msra.gmra.mxu1 %vm956_vm1, %v2278_v38  ;;  %v2277_v61 = vmul.f32 %v5612_v22, %v5608_v16 }
 0xad5   : > { %5123 = vmatpush3.bf16.xpose.msra.mxu1 %v2384_v23  ;;  %5124 = vmatprep.mubr.msk.bf16.mxu1 %vm6098_vm9, %v6097_v11 }
 0xad6   : > { %v2279_v25 = vpack.c.bf16 %v2277_v61, %v2277_v61  ;;  %5134 = vmatprep.subr.bf16.mxu1 %v6097_v11 }
 0xad8   : > { %5119 = vmatmul.mubr.msk.bf16.vlgmr.msra.gmra.mxu0 %vm956_vm1, %v2279_v25 }
 0xad9   : > { %5129 = vmatpush3.bf16.xpose.msra.mxu0 %v2434_v45  ;;  %5130 = vmatprep.mubr.msk.bf16.mxu0 %vm6098_vm9, %v6097_v11 }
 0xada   : > { %5140 = vmatprep.subr.bf16.mxu0 %v6097_v11 }
 0xadc   : > { %5125 = vmatmul.mubr.msk.bf16.vlgmr.msra.gmra.mxu1 %vm956_vm1, %v2377_v27 }
 0xadd   : > { %5136 = vmatprep.mubr.msk.bf16.mxu1 %vm6098_vm9, %v6097_v11 }
 0xae0   : > { %5131 = vmatmul.mubr.msk.bf16.vlgmr.msra.gmra.mxu0 %vm956_vm1, %v2427_v28 }
 0xae1   : > { %5142 = vmatprep.mubr.msk.bf16.mxu0 %vm6098_vm9, %v6097_v11 }
 0xb94   : > { %v2322_v29 = vpop.f32.mrf.mxu1 }
 0xb96   : > { %v5114_v30 = vpop.f32.mrf.mxu1 }
 0xb98   : > { %v2325_v32 = vpop.f32.mrf.mxu1  ;;  %v2370_v33 = vpop.f32.mrf.mxu0 }
 0xb99   : > { %v5512_v58 = vpack.i.bf16 %v2370_v33, %v2322_v29 }
 0xb9a   : > { %v5115_v35 = vpop.f32.mrf.mxu1  ;;  %v5120_v36 = vpop.f32.mrf.mxu0 }
 0xb9c   : > { %v2373_v37 = vpop.f32.mrf.mxu0  ;;  %v2420_v39 = vpop.f32.mrf.mxu1 }
 0xb9d   : > { %v2476_v41 = vsel %vm956_vm1, %v2420_v39, -inf }
 0xb9e   : > { %2477 = vmax.xlane.f32.xlu0 %v2476_v41  ;;  %v5121_v42 = vpop.f32.mrf.mxu0  ;;  %v5126_v44 = vpop.f32.mrf.mxu1 }
 0xba0   : > { %v2423_v47 = vpop.f32.mrf.mxu1  ;;  %v2470_v49 = vpop.f32.mrf.mxu0 }
 0xba1   : > { %v2479_v50 = vsel %vm956_vm1, %v2470_v49, -inf  ;;  %v4768_v47 = vld [vmem:[#allocation12] ss:$0 sm:$0xff] }
 0xba2   : > { %v5127_v52 = vpop.f32.mrf.mxu1  ;;  %2480 = vmax.xlane.f32.xlu1 %v2479_v50  ;;  %v5132_v53 = vpop.f32.mrf.mxu0 }
 0xba4   : > { %v2473_v56 = vpop.f32.mrf.mxu0 }
 0xba6   : > { %v5133_v57 = vpop.f32.mrf.mxu0 }
 0xbb3   : > { %2548 = vrot.lane.b32.xlu1 %v6621_v10, %s6101_s1 }
 0xbb7   : > { %5508 = vrot.lane.b32.xlu1 %v5507_v43, %s6102_s22 }
 0xbbb   : > { %5513 = vrot.lane.b32.xlu1 %v5512_v58, %s6103_s25 }
 0xc27   : > { %v2478_v59 = vpop.xlane.xlu0 %2477 }
 0xc28   : > { %v2482_v60 = vsub.f32 %v2420_v39, %v2478_v59 }
 0xc2a   : > { %v2484_v62 = vmul.f32 1.442695, %v2482_v60 }
 0xc2b   : > { %v2481_v63 = vpop.xlane.xlu1 %2480 }
 0xc2c   : > { %5613 = vpow2.f32 %v2484_v62  ;;  %v2483_v0 = vsub.f32 %v2470_v49, %v2481_v63 }
 0xc2e   : > { %v2486_v3 = vmul.f32 1.442695, %v2483_v0 }
 0xc2f   : > { %v2549_v6 = vpop.permute.xlu1 %2548 }
 0xc30   : > { %5615 = vpow2.f32 %v2486_v3  ;;  %v2554_v10 = vsel %vm963_vm0, %v2549_v6, 0 }
 0xc31   : > { %5141 = vmatpush3.bf16.msra.mxu0 %v2554_v10 }
 0xc32   : > { %5154 = vmatprep.subr.bf16.mxu0 %v6097_v11 }
 0xc33   : > { %v5509_v24 = vpop.permute.xlu1 %5508 }
 0xc34   : > { %v5511_v45 = vunpack.i.h.bf16 %v5509_v24  ;;  %v5510_v27 = vunpack.i.l.bf16 %v5509_v24  ;;  %v4769_v24 = vld [vmem:[#allocation17] ss:$0 sm:$0xff] }
 0xc36   : > { %v2621_v32 = vsel %vm956_vm1, %v6661_v51, %v5511_v45  ;;  %v2620_v33 = vsel %vm956_vm1, %v6659_v48, %v5510_v27 }
 0xc37   : > { %v5514_v25 = vpop.permute.xlu1 %5513 }
 0xc38   : > { %v5516_v28 = vunpack.i.h.bf16 %v5514_v25  ;;  %v5515_v29 = vunpack.i.l.bf16 %v5514_v25 }
 0xc39   : > { %v5614_v40 = vpop.eup %5613 }
 0xc3a   : > { %v2488_v1 = vsel %vm956_vm1, %v5614_v40, 0.0  ;;  %v2623_v37 = vsel %vm2622_vm10, %v2620_v33, %v5515_v29  ;;  %v2624_v39 = vsel %vm2622_vm10, %v2621_v32, %v5516_v28 }
 0xc3b   : > { %2489 = vadd.xlane.f32.xlu0 %v2488_v1  ;;  %v5551_v1 = vld [vmem:[#allocation15 + $0x8] sm:$0xff]  }
 0xc3d   : > { %v5616_v43 = vpop.eup %5615 }
 0xc3e   : > { %v2491_v8 = vsel %vm956_vm1, %v5616_v43, 0.0 }
 0xc3f   : > { %2492 = vadd.xlane.f32.xlu0 %v2491_v8 }
 0xc55   : > { %2500 = vrot.lane.b32.xlu0 %v6611_v2, %s6101_s1 }
 0xcc4   : > { %v2490_v9 = vpop.xlane.xlu0 %2489 }
 0xcc5   : > { %5617 = vrcp.f32 %v2490_v9 }
 0xcc8   : > { %v2493_v13 = vpop.xlane.xlu0 %2492 }
 0xcc9   : > { %5619 = vrcp.f32 %v2493_v13 }
 0xccc   : > { %v2501_v12 = vpop.permute.xlu0 %2500 }
 0xccd   : > { %v2506_v14 = vsel %vm963_vm0, %v2501_v12, 0 }
 0xcce   : > { %5135 = vmatpush3.bf16.msra.mxu1 %v2506_v14 }
 0xccf   : > { %5146 = vmatprep.subr.bf16.mxu1 %v6097_v11 }
 0xcd2   : > { %v5618_v15 = vpop.eup %5617 }
 0xcd3   : > { %v2496_v46 = vmul.f32 %v5618_v15, %v5614_v40 }
 0xcd5   : > { %v2498_v55 = vpack.c.bf16 %v2496_v46, %v2496_v46  ;;  %v2700_v46 = vld [vmem:[#allocation14] sm:$0x3] }
 0xcd6   : > { %v5620_v16 = vpop.eup %5619 }
 0xcd7   : > { %5137 = vmatmul.mubr.msk.bf16.vlgmr.msra.gmra.mxu1 %vm956_vm1, %v2498_v55  ;;  %v2497_v4 = vmul.f32 %v5620_v16, %v5616_v43  ;;  %v5552_v43 = vld [vmem:[#allocation15] sm:$0xff]  }
 0xcd8   : > { %5150 = vmatprep.mubr.msk.bf16.mxu1 %vm6098_vm9, %v6097_v11  ;;  %5147 = vmatpush3.bf16.msra.mxu1 %v5549_v17 }
 0xcd9   : > { %v2499_v2 = vpack.c.bf16 %v2497_v4, %v2497_v4  ;;  %5148 = vmatprep.subr.bf16.mxu1 %v6097_v11  ;;  %v2730_v4 = vrot.slane %v2700_v46, %v6572_v26 }
 0xcdb   : > { %5143 = vmatmul.mubr.msk.bf16.vlgmr.msra.gmra.mxu0 %vm956_vm1, %v2499_v2 }
 0xcdc   : > { %5158 = vmatprep.mubr.msk.bf16.mxu0 %vm6098_vm9, %v6097_v11  ;;  %5149 = vmatpush3.bf16.msra.mxu1 %v5550_v18 }
 0xcdd   : > { %5162 = vmatprep.subr.bf16.mxu1 %v6097_v11  ;;  %5155 = vmatpush3.bf16.msra.mxu0 %v5551_v1 }
 0xcde   : > { %5156 = vmatprep.subr.bf16.mxu0 %v6097_v11 }
 0xce1   : > { %5157 = vmatpush3.bf16.msra.mxu0 %v5552_v43 }
 0xce2   : > { %5174 = vmatprep.subr.bf16.mxu0 %v6097_v11 }
 0xd97   : > { %v2542_v19 = vpop.f32.mrf.mxu1 }
 0xd99   : > { %v5138_v20 = vpop.f32.mrf.mxu1 }
 0xd9b   : > { %v2545_v34 = vpop.f32.mrf.mxu1  ;;  %v2590_v54 = vpop.f32.mrf.mxu0 }
 0xd9c   : > { %v5517_v21 = vpack.i.bf16 %v2590_v54, %v2542_v19  ;;  %v2736_v19 = vrot.slane %v2700_v46, %v6576_v31 }
 0xd9d   : > { %v5139_v38 = vpop.f32.mrf.mxu1  ;;  %v5144_v22 = vpop.f32.mrf.mxu0 }
 0xd9e   : > { %5518 = vrot.lane.b32.xlu0 %v5517_v21, %s6104_s6  ;;  %v5553_v38 = vld [vmem:[%s7177_s17 + $0x18] sm:$0xff]   ;;  %v5554_v22 = vld [vmem:[%s7177_s17 + $0x10] sm:$0xff]  }
 0xd9f   : > { %v2593_v23 = vpop.f32.mrf.mxu0 }
 0xda0   : > { %v5555_v23 = vld [vmem:[%s7177_s17 + $0x8] sm:$0xff]  }
 0xda1   : > { %v5145_v61 = vpop.f32.mrf.mxu0 }
 0xda2   : > { %v5556_v61 = vld [vmem:[%s7177_s17] sm:$0xff]  }
 0xe10   : > { %v5519_v30 = vpop.permute.xlu0 %5518 }
 0xe11   : > { %v5521_v35 = vunpack.i.h.bf16 %v5519_v30  ;;  %v5520_v36 = vunpack.i.l.bf16 %v5519_v30 }
 0xe13   : > { %v2627_v41 = vsel %vm2625_vm11, %v2624_v39, %v5521_v35  ;;  %v2626_v42 = vsel %vm2625_vm11, %v2623_v37, %v5520_v36 }
 0xe14   : > { %v2632_v44 = vpack.c.bf16 %v2627_v41, %v2626_v42 }
 0xe16   : > { %5151 = vmatmul.mubr.msk.bf16.vlgmr.msra.gmra.mxu1 %vm1237_vm8, %v2632_v44 }
 0xe17   : > { %5170 = vmatprep.mubr.msk.bf16.mxu1 %vm6098_vm9, %v6097_v11  ;;  %5163 = vmatpush3.bf16.msra.mxu1 %v5553_v38  ;;  %v2915_v38 = vld [vmem:[#allocation9 + $0x2] sm:$0x3] }
 0xe18   : > { %5164 = vmatprep.subr.bf16.mxu1 %v6097_v11 }
 0xe1b   : > { %5165 = vmatpush3.bf16.msra.mxu1 %v5554_v22 }
 0xe1c   : > { %5166 = vmatprep.subr.bf16.mxu1 %v6097_v11 }
 0xe1f   : > { %5167 = vmatpush3.bf16.msra.mxu1 %v5555_v23 }
 0xe20   : > { %5168 = vmatprep.subr.bf16.mxu1 %v6097_v11 }
 0xe23   : > { %5169 = vmatpush3.bf16.msra.mxu1 %v5556_v61  ;;  %v2945_v61 = vrot.slane %v2915_v38, %v6572_v26 }
 0xe24   : > { %5190 = vmatprep.subr.bf16.mxu1 %v6097_v11 }
 0xed6   : > { %v2682_v51 = vpop.f32.mrf.mxu1 }
 0xed7   : > { %v2689_v48 = vadd.f32 %v2682_v51, %v6539_v5 }
 0xed8   : > { %v5152_v49 = vpop.f32.mrf.mxu1 }
 0xed9   : > { %v6785_v50 = vadd.f32 %v4768_v47, %v2689_v48 }
 0xeda   : > { %v2685_v52 = vpop.f32.mrf.mxu1 }
 0xedb   : > { %v2690_v53 = vadd.f32 %v2685_v52, %v6543_v7  ;;  %v2701_v56 = vsel %vm1237_vm8, %v6785_v50, 0.0 }
 0xedc   : > { %2702 = vadd.xlane.f32.xlu1 %v2701_v56  ;;  %v5153_v57 = vpop.f32.mrf.mxu1 }
 0xedd   : > { %v6790_v58 = vadd.f32 %v4768_v47, %v2690_v53 }
 0xedf   : > { %v2704_v59 = vsel %vm1237_vm8, %v6790_v58, 0.0 }
 0xee0   : > { %2705 = vadd.xlane.f32.xlu0 %v2704_v59 }
 0xf65   : > { %v2703_v60 = vpop.xlane.xlu1 %2702 }
 0xf66   : > { %v2707_v62 = vmul.f32 0.03125, %v2703_v60 }
 0xf68   : > { %v2709_v5 = vsub.f32 %v6785_v50, %v2707_v62 }
 0xf69   : > { %v2706_v63 = vpop.xlane.xlu0 %2705 }
 0xf6a   : > { %v2708_v0 = vmul.f32 0.03125, %v2706_v63  ;;  %v2711_v3 = vmul.f32 %v2709_v5, %v2709_v5 }
 0xf6c   : > { %v2710_v7 = vsub.f32 %v6790_v58, %v2708_v0  ;;  %v2713_v6 = vsel %vm1237_vm8, %v2711_v3, 0.0 }
 0xf6d   : > { %2714 = vadd.xlane.f32.xlu0 %v2713_v6 }
 0xf6e   : > { %v2712_v10 = vmul.f32 %v2710_v7, %v2710_v7 }
 0xf70   : > { %v2716_v40 = vsel %vm1237_vm8, %v2712_v10, 0.0 }
 0xf71   : > { %2717 = vadd.xlane.f32.xlu0 %v2716_v40 }
 0xff6   : > { %v2715_v8 = vpop.xlane.xlu0 %2714 }
 0xff7   : > { %v2719_v9 = vmul.f32 0.03125, %v2715_v8 }
 0xff9   : > { %v2721_v13 = vadd.f32 1e-05, %v2719_v9 }
 0xffa   : > { %v2718_v12 = vpop.xlane.xlu0 %2717 }
 0xffb   : > { %5621 = vrsqrt.f32 %v2721_v13  ;;  %v2720_v14 = vmul.f32 0.03125, %v2718_v12 }
 0xffd   : > { %v2722_v15 = vadd.f32 1e-05, %v2720_v14 }
 0xfff   : > { %5623 = vrsqrt.f32 %v2722_v15 }
0x1008   : > { %v5622_v55 = vpop.eup %5621 }
0x1009   : > { %v2725_v16 = vmul.f32 %v5622_v55, %v2709_v5  ;;  %v4778_v5 = vld [vmem:[#allocation18] ss:$0 sm:$0xff] }
0x100b   : > { %v2731_v18 = vmul.f32 %v2730_v4, %v2725_v16  ;;  %v5557_v16 = vld [vmem:[%s7167_s7 + $0x18] sm:$0xff]  }
0x100c   : > { %v5624_v2 = vpop.eup %5623 }
0x100d   : > { %v2726_v17 = vmul.f32 %v5624_v2, %v2710_v7  ;;  %v2737_v34 = vadd.f32 %v2736_v19, %v2731_v18  ;;  %v5559_v2 = vld [vmem:[%s7167_s7 + $0x10] sm:$0xff]  }
0x100f   : > { %v2732_v20 = vmul.f32 %v2730_v4, %v2726_v17  ;;  %v5558_v4 = vld [vmem:[%s7170_s10 + $0x18] sm:$0xff]   ;;  %v5560_v17 = vld [vmem:[%s7170_s10 + $0x10] sm:$0xff]  }
0x1011   : > { %v2738_v54 = vadd.f32 %v2736_v19, %v2732_v20 }
0x1013   : > { %v2743_v21 = vpack.c.bf16 %v2738_v54, %v2737_v34 }
0x1015   : > { %5159 = vmatmul.mubr.msk.bf16.vlgmr.msra.gmra.mxu0 %vm1237_vm8, %v2743_v21 }
0x1016   : > { %5178 = vmatprep.mubr.msk.bf16.mxu0 %vm6098_vm9, %v6097_v11  ;;  %5175 = vmatpush3.bf16.msra.mxu0 %v5557_v16 }
0x1017   : > { %5176 = vmatprep.subr.bf16.mxu0 %v6097_v11 }
0x101a   : > { %5177 = vmatpush3.bf16.msra.mxu0 %v5559_v2 }
0x101b   : > { %5182 = vmatprep.subr.bf16.mxu0 %v6097_v11 }
0x10d5   : > { %v2800_v25 = vpop.f32.mrf.mxu0 }
0x10d6   : > { %v2801_v45 = vadd.f32 %v4769_v24, %v2800_v25 }
0x10d7   : > { %v5160_v27 = vpop.f32.mrf.mxu0 }
0x10d8   : > { %v2807_v28 = vmul.f32 %v2801_v45, %v2801_v45  ;;  %v2951_v27 = vrot.slane %v2915_v38, %v6576_v31 }
0x10d9   : > { %v2803_v29 = vpop.f32.mrf.mxu0 }
0x10da   : > { %v2809_v30 = vmul.f32 %v2807_v28, %v2801_v45  ;;  %v2804_v32 = vadd.f32 %v4769_v24, %v2803_v29 }
0x10db   : > { %v5161_v33 = vpop.f32.mrf.mxu0 }
0x10dc   : > { %v2811_v35 = vmul.f32 0.044715, %v2809_v30  ;;  %v2808_v36 = vmul.f32 %v2804_v32, %v2804_v32 }
0x10de   : > { %v2813_v37 = vadd.f32 %v2811_v35, %v2801_v45  ;;  %v2810_v39 = vmul.f32 %v2808_v36, %v2804_v32  ;;  %v5562_v35 = vld [vmem:[%s7169_s9 + $0x10] sm:$0xff]  }
0x10e0   : > { %v2815_v41 = vmul.f32 0.7978846, %v2813_v37  ;;  %v2812_v42 = vmul.f32 0.044715, %v2810_v39 }
0x10e2   : > { %5625 = vtanh.f32 %v2815_v41  ;;  %v2814_v44 = vadd.f32 %v2812_v42, %v2804_v32 }
0x10e4   : > { %v2816_v51 = vmul.f32 0.7978846, %v2814_v44 }
0x10e6   : > { %5627 = vtanh.f32 %v2816_v51 }
0x10ef   : > { %v5626_v47 = vpop.eup %5625 }
0x10f0   : > { %v2819_v48 = vadd.f32 1.0, %v5626_v47 }
0x10f2   : > { %v2821_v52 = vmul.f32 0.5, %v2819_v48  ;;  %v4799_v48 = vld [vmem:[#allocation11 + $0x1] ss:$0 sm:$0xff] }
0x10f3   : > { %v5628_v49 = vpop.eup %5627 }
0x10f4   : > { %v2820_v53 = vadd.f32 1.0, %v5628_v49  ;;  %v2823_v57 = vmul.f32 %v2821_v52, %v2801_v45 }
0x10f6   : > { %v2822_v56 = vmul.f32 0.5, %v2820_v53  ;;  %v4784_v53 = vld [vmem:[%s7168_s8 + $0x1] ss:$0 sm:$0xff] }
0x10f8   : > { %v2824_v59 = vmul.f32 %v2822_v56, %v2804_v32  ;;  %v5561_v32 = vld [vmem:[%s7169_s9 + $0x18] sm:$0xff]  }
0x10fa   : > { %v2833_v60 = vpack.c.bf16 %v2824_v59, %v2823_v57 }
0x10fc   : > { %5171 = vmatmul.mubr.msk.bf16.vlgmr.msra.gmra.mxu1 %vm2858_vm12, %v2833_v60 }
0x10fd   : > { %5194 = vmatprep.mubr.msk.bf16.mxu1 %vm6098_vm9, %v6097_v11  ;;  %5191 = vmatpush3.bf16.msra.mxu1 %v5558_v4 }
0x10fe   : > { %5192 = vmatprep.subr.bf16.mxu1 %v6097_v11 }
0x1101   : > { %5193 = vmatpush3.bf16.msra.mxu1 %v5560_v17 }
0x1102   : > { %5204 = vmatprep.subr.bf16.mxu1 %v6097_v11 }
0x11bc   : > { %v2896_v62 = vpop.f32.mrf.mxu1 }
0x11bd   : > { %v2903_v63 = vadd.f32 %v2896_v62, %v6785_v50 }
0x11be   : > { %v5172_v0 = vpop.f32.mrf.mxu1 }
0x11bf   : > { %v6825_v3 = vadd.f32 %v4778_v5, %v2903_v63 }
0x11c0   : > { %v2899_v7 = vpop.f32.mrf.mxu1 }
0x11c1   : > { %v2904_v6 = vadd.f32 %v2899_v7, %v6790_v58  ;;  %v2916_v10 = vsel %vm1237_vm8, %v6825_v3, 0.0 }
0x11c2   : > { %2917 = vadd.xlane.f32.xlu1 %v2916_v10  ;;  %v5173_v40 = vpop.f32.mrf.mxu1 }
0x11c3   : > { %v6830_v1 = vadd.f32 %v4778_v5, %v2904_v6 }
0x11c5   : > { %v2919_v43 = vsel %vm1237_vm8, %v6830_v1, 0.0 }
0x11c6   : > { %2920 = vadd.xlane.f32.xlu0 %v2919_v43 }
0x124b   : > { %v2918_v8 = vpop.xlane.xlu1 %2917 }
0x124c   : > { %v2922_v9 = vmul.f32 0.03125, %v2918_v8 }
0x124e   : > { %v2924_v50 = vsub.f32 %v6825_v3, %v2922_v9 }
0x124f   : > { %v2921_v13 = vpop.xlane.xlu0 %2920 }
0x1250   : > { %v2923_v12 = vmul.f32 0.03125, %v2921_v13  ;;  %v2926_v14 = vmul.f32 %v2924_v50, %v2924_v50 }
0x1252   : > { %v2925_v58 = vsub.f32 %v6830_v1, %v2923_v12  ;;  %v2928_v15 = vsel %vm1237_vm8, %v2926_v14, 0.0 }
0x1253   : > { %2929 = vadd.xlane.f32.xlu1 %v2928_v15 }
0x1254   : > { %v2927_v46 = vmul.f32 %v2925_v58, %v2925_v58 }
0x1256   : > { %v2931_v55 = vsel %vm1237_vm8, %v2927_v46, 0.0 }
0x1257   : > { %2932 = vadd.xlane.f32.xlu0 %v2931_v55 }
0x12dc   : > { %v2930_v18 = vpop.xlane.xlu1 %2929 }
0x12dd   : > { %v2934_v19 = vmul.f32 0.03125, %v2930_v18 }
0x12df   : > { %v2936_v20 = vadd.f32 1e-05, %v2934_v19 }
0x12e0   : > { %v2933_v34 = vpop.xlane.xlu0 %2932 }
0x12e1   : > { %5629 = vrsqrt.f32 %v2936_v20  ;;  %v2935_v54 = vmul.f32 0.03125, %v2933_v34 }
0x12e3   : > { %v2937_v21 = vadd.f32 1e-05, %v2935_v54 }
0x12e5   : > { %5631 = vrsqrt.f32 %v2937_v21 }
0x12ee   : > { %v5630_v22 = vpop.eup %5629 }
0x12ef   : > { %v2940_v23 = vmul.f32 %v5630_v22, %v2924_v50 }
0x12f1   : > { %v2946_v45 = vmul.f32 %v2945_v61, %v2940_v23 }
0x12f2   : > { %v5632_v24 = vpop.eup %5631 }
0x12f3   : > { %v2941_v25 = vmul.f32 %v5632_v24, %v2925_v58  ;;  %v2952_v29 = vadd.f32 %v2951_v27, %v2946_v45 }
0x12f5   : > { %v2947_v28 = vmul.f32 %v2945_v61, %v2941_v25 }
0x12f7   : > { %v2953_v30 = vadd.f32 %v2951_v27, %v2947_v28 }
0x12f9   : > { %v2959_v33 = vpack.c.bf16 %v2953_v30, %v2952_v29 }
0x12fb   : > { %5179 = vmatmul.mubr.msk.bf16.vlgmr.msra.gmra.mxu0 %vm1237_vm8, %v2959_v33  ;;  %5195 = vmatmul.mubr.msk.bf16.vlgmr.msra.gmra.mxu1 %vm1237_vm8, %v2959_v33 }
0x12fc   : > { %5183 = vmatpush3.bf16.msra.mxu0 %v5561_v32  ;;  %5186 = vmatprep.mubr.msk.bf16.mxu0 %vm6098_vm9, %v6097_v11 }
0x12fd   : > { %5184 = vmatprep.subr.bf16.mxu0 %v6097_v11  ;;  %5206 = vmatprep.mubr.msk.bf16.mxu1 %vm6098_vm9, %v6097_v11 }
0x1300   : > { %5185 = vmatpush3.bf16.msra.mxu0 %v5562_v35 }
0x1301   : > { %5198 = vmatprep.subr.bf16.mxu0 %v6097_v11 }
0x1303   : > { %5187 = vmatmul.mubr.msk.bf16.vlgmr.msra.gmra.mxu0 %vm1237_vm8, %v2959_v33 }
0x1304   : > { %5200 = vmatprep.mubr.msk.bf16.mxu0 %vm6098_vm9, %v6097_v11 }
0x13bb   : > { %v3017_v36 = vpop.f32.mrf.mxu0  ;;  %v3141_v37 = vpop.f32.mrf.mxu1 }
0x13bc   : > { %v3142_v57 = vadd.f32 %v4799_v48, %v3141_v37  ;;  %v3018_v62 = vadd.f32 %v4784_v53, %v3017_v36 }
0x13bd   : > { %v5180_v39 = vpop.f32.mrf.mxu0  ;;  %v5196_v41 = vpop.f32.mrf.mxu1 }
0x13be   : > { %v6883_v0 = vpack.c.bf16 %v3142_v57, %v3142_v57  ;;  %v6887_v10 = vpack.c.bf16 %v3018_v62, %v3018_v62 }
0x13bf   : > { %v3020_v42 = vpop.f32.mrf.mxu0  ;;  %v3144_v44 = vpop.f32.mrf.mxu1 }
0x13c0   : > { %v3145_v7 = vadd.f32 %v4799_v48, %v3144_v44  ;;  %v3021_v40 = vadd.f32 %v4784_v53, %v3020_v42  ;;  %v3274_v8 = vsel %vm963_vm0, %v6883_v0, 0 }
0x13c1   : > { %v5181_v51 = vpop.f32.mrf.mxu0  ;;  %v5197_v47 = vpop.f32.mrf.mxu1 }
0x13c2   : > { %v6890_v43 = vpack.c.bf16 %v3145_v7, %v3145_v7  ;;  %v6898_v9 = vpack.c.bf16 %v3021_v40, %v3021_v40 }
0x13c3   : > { %v3075_v49 = vpop.f32.mrf.mxu0 }
0x13c4   : > { %v6873_v52 = vpack.c.bf16 %v3075_v49, %v3075_v49  ;;  %v3320_v50 = vsel %vm963_vm0, %v6890_v43, 0 }
0x13c5   : > { %v5188_v56 = vpop.f32.mrf.mxu0 }
0x13c6   : > { %v3156_v59 = vsel %vm956_vm1, %v6873_v52, 0 }
0x13c7   : > { %v3078_v60 = vpop.f32.mrf.mxu0  ;;  %5199 = vmatpush3.bf16.xpose.msra.mxu0 %v3156_v59 }
0x13c8   : > { %v6880_v5 = vpack.c.bf16 %v3078_v60, %v3078_v60  ;;  %5210 = vmatprep.subr.bf16.mxu0 %v6097_v11 }
0x13c9   : > { %v5189_v63 = vpop.f32.mrf.mxu0 }
0x13ca   : > { %v3202_v6 = vsel %vm956_vm1, %v6880_v5, 0 }
0x13cb   : > { %5205 = vmatpush3.bf16.xpose.msra.mxu1 %v3202_v6 }
0x13cc   : > { %5216 = vmatprep.subr.bf16.mxu1 %v6097_v11 }
0x13ce   : > { %5201 = vmatmul.mubr.msk.bf16.vlgmr.msra.gmra.mxu0 %vm956_vm1, %v6887_v10 }
0x13cf   : > { %5211 = vmatpush3.bf16.msra.mxu0 %v3274_v8  ;;  %5212 = vmatprep.mubr.msk.bf16.mxu0 %vm6098_vm9, %v6097_v11 }
0x13d0   : > { %5222 = vmatprep.subr.bf16.mxu0 %v6097_v11 }
0x13d2   : > { %5207 = vmatmul.mubr.msk.bf16.vlgmr.msra.gmra.mxu1 %vm956_vm1, %v6898_v9 }
0x13d3   : > { %5217 = vmatpush3.bf16.msra.mxu1 %v3320_v50  ;;  %5218 = vmatprep.mubr.msk.bf16.mxu1 %vm6098_vm9, %v6097_v11 }
0x13d4   : > { %5228 = vmatprep.subr.bf16.mxu1 %v6097_v11 }
0x148e   : > { %v3192_v13 = vpop.f32.mrf.mxu0 }
0x148f   : > { %v3244_v12 = vsel %vm956_vm1, %v3192_v13, -inf }
0x1490   : > { %3245 = vmax.xlane.f32.xlu1 %v3244_v12  ;;  %v5202_v14 = vpop.f32.mrf.mxu0 }
0x1492   : > { %v3195_v58 = vpop.f32.mrf.mxu0  ;;  %v3238_v15 = vpop.f32.mrf.mxu1 }
0x1493   : > { %v3247_v46 = vsel %vm956_vm1, %v3238_v15, -inf }
0x1494   : > { %3248 = vmax.xlane.f32.xlu0 %v3247_v46  ;;  %v5203_v55 = vpop.f32.mrf.mxu0  ;;  %v5208_v16 = vpop.f32.mrf.mxu1 }
0x1496   : > { %v3241_v4 = vpop.f32.mrf.mxu1 }
0x1498   : > { %v5209_v2 = vpop.f32.mrf.mxu1 }
0x14a1   : > { %3366 = vrot.lane.b32.xlu1 %v6873_v52, %s6099_s29 }
0x1519   : > { %v3246_v17 = vpop.xlane.xlu1 %3245 }
0x151a   : > { %v3250_v18 = vsub.f32 %v3192_v13, %v3246_v17 }
0x151c   : > { %v3252_v19 = vmul.f32 1.442695, %v3250_v18 }
0x151d   : > { %v3249_v20 = vpop.xlane.xlu0 %3248  ;;  %v3367_v61 = vpop.permute.xlu1 %3366 }
0x151e   : > { %5633 = vpow2.f32 %v3252_v19  ;;  %v3251_v34 = vsub.f32 %v3238_v15, %v3249_v20  ;;  %v3372_v30 = vsel %vm956_vm1, %v3367_v61, 0 }
0x1520   : > { %v3254_v54 = vmul.f32 1.442695, %v3251_v34 }
0x1522   : > { %5635 = vpow2.f32 %v3254_v54 }
0x152b   : > { %v5634_v21 = vpop.eup %5633 }
0x152c   : > { %v3256_v38 = vsel %vm956_vm1, %v5634_v21, 0.0 }
0x152d   : > { %3257 = vadd.xlane.f32.xlu1 %v3256_v38 }
0x152f   : > { %v5636_v22 = vpop.eup %5635 }
0x1530   : > { %v3259_v23 = vsel %vm956_vm1, %v5636_v22, 0.0 }
0x1531   : > { %3260 = vadd.xlane.f32.xlu0 %v3259_v23 }
0x153e   : > { %3363 = vrot.lane.b32.xlu1 %v6887_v10, %s6099_s29 }
0x1542   : > { %3415 = vrot.lane.b32.xlu1 %v6898_v9, %s6099_s29 }
0x1547   : > { %3418 = vrot.lane.b32.xlu0 %v6880_v5, %s6099_s29 }
0x15b6   : > { %v3258_v24 = vpop.xlane.xlu1 %3257 }
0x15b7   : > { %5637 = vrcp.f32 %v3258_v24 }
0x15ba   : > { %v3261_v25 = vpop.xlane.xlu0 %3260  ;;  %v3364_v37 = vpop.permute.xlu1 %3363 }
0x15bb   : > { %5639 = vrcp.f32 %v3261_v25 }
0x15be   : > { %v3419_v33 = vpop.permute.xlu0 %3418  ;;  %v3416_v39 = vpop.permute.xlu1 %3415 }
0x15bf   : > { %v3424_v36 = vsel %vm956_vm1, %v3419_v33, 0 }
0x15c4   : > { %v5638_v45 = vpop.eup %5637 }
0x15c5   : > { %v3264_v27 = vmul.f32 %v5638_v45, %v5634_v21 }
0x15c7   : > { %v3266_v28 = vpack.c.bf16 %v3264_v27, %v3264_v27 }
0x15c8   : > { %v5640_v29 = vpop.eup %5639 }
0x15c9   : > { %5213 = vmatmul.mubr.msk.bf16.vlgmr.msra.gmra.mxu0 %vm956_vm1, %v3266_v28  ;;  %v3265_v32 = vmul.f32 %v5640_v29, %v5636_v22 }
0x15ca   : > { %5223 = vmatpush3.bf16.xpose.msra.mxu0 %v3372_v30  ;;  %5224 = vmatprep.mubr.msk.bf16.mxu0 %vm6098_vm9, %v6097_v11 }
0x15cb   : > { %v3267_v35 = vpack.c.bf16 %v3265_v32, %v3265_v32  ;;  %5234 = vmatprep.subr.bf16.mxu0 %v6097_v11 }
0x15cd   : > { %5219 = vmatmul.mubr.msk.bf16.vlgmr.msra.gmra.mxu1 %vm956_vm1, %v3267_v35 }
0x15ce   : > { %5229 = vmatpush3.bf16.xpose.msra.mxu1 %v3424_v36  ;;  %5230 = vmatprep.mubr.msk.bf16.mxu1 %vm6098_vm9, %v6097_v11 }
0x15cf   : > { %5240 = vmatprep.subr.bf16.mxu1 %v6097_v11 }
0x15d1   : > { %5225 = vmatmul.mubr.msk.bf16.vlgmr.msra.gmra.mxu0 %vm956_vm1, %v3364_v37 }
0x15d2   : > { %5236 = vmatprep.mubr.msk.bf16.mxu0 %vm6098_vm9, %v6097_v11 }
0x15d5   : > { %5231 = vmatmul.mubr.msk.bf16.vlgmr.msra.gmra.mxu1 %vm956_vm1, %v3416_v39 }
0x15d6   : > { %5242 = vmatprep.mubr.msk.bf16.mxu1 %vm6098_vm9, %v6097_v11 }
0x1689   : > { %v6936_v41 = vpop.f32.mrf.mxu0 }
0x168b   : > { %v5214_v42 = vpop.f32.mrf.mxu0 }
0x168d   : > { %v3313_v44 = vpop.f32.mrf.mxu0  ;;  %v6938_v51 = vpop.f32.mrf.mxu1 }
0x168f   : > { %v5215_v47 = vpop.f32.mrf.mxu0  ;;  %v5220_v48 = vpop.f32.mrf.mxu1 }
0x1691   : > { %v3359_v49 = vpop.f32.mrf.mxu1  ;;  %v3408_v53 = vpop.f32.mrf.mxu0 }
0x1692   : > { %v3466_v56 = vsel %vm956_vm1, %v3408_v53, -inf }
0x1693   : > { %v5221_v57 = vpop.f32.mrf.mxu1  ;;  %3467 = vmax.xlane.f32.xlu1 %v3466_v56  ;;  %v5226_v59 = vpop.f32.mrf.mxu0 }
0x1695   : > { %v3411_v60 = vpop.f32.mrf.mxu0  ;;  %v3460_v62 = vpop.f32.mrf.mxu1 }
0x1696   : > { %v3469_v63 = vsel %vm956_vm1, %v3460_v62, -inf }
0x1697   : > { %3470 = vmax.xlane.f32.xlu0 %v3469_v63  ;;  %v5227_v7 = vpop.f32.mrf.mxu0  ;;  %v5232_v6 = vpop.f32.mrf.mxu1 }
0x1699   : > { %v3463_v40 = vpop.f32.mrf.mxu1 }
0x169b   : > { %v5233_v8 = vpop.f32.mrf.mxu1 }
0x16a4   : > { %3491 = vrot.lane.b32.xlu1 %v6883_v0, %s6099_s29 }
0x16a8   : > { %3590 = vrot.lane.b32.xlu1 %v6873_v52, %s6100_s23 }
0x16ac   : > { %3640 = vrot.lane.b32.xlu1 %v6880_v5, %s6100_s23 }
0x16b0   : > { %3588 = vrot.lane.b32.xlu1 %v6887_v10, %s6100_s23 }
0x171c   : > { %v3468_v50 = vpop.xlane.xlu1 %3467 }
0x171d   : > { %v3472_v13 = vsub.f32 %v3408_v53, %v3468_v50 }
0x171f   : > { %v3474_v12 = vmul.f32 1.442695, %v3472_v13 }
0x1720   : > { %v3471_v14 = vpop.xlane.xlu0 %3470  ;;  %v3492_v58 = vpop.permute.xlu1 %3491 }
0x1721   : > { %5641 = vpow2.f32 %v3474_v12  ;;  %v3473_v15 = vsub.f32 %v3460_v62, %v3471_v14  ;;  %v3497_v46 = vsel %vm963_vm0, %v3492_v58, 0 }
0x1722   : > { %5235 = vmatpush3.bf16.msra.mxu0 %v3497_v46 }
0x1723   : > { %v3476_v55 = vmul.f32 1.442695, %v3473_v15  ;;  %5246 = vmatprep.subr.bf16.mxu0 %v6097_v11 }
0x1724   : > { %v3591_v21 = vpop.permute.xlu1 %3590 }
0x1725   : > { %5643 = vpow2.f32 %v3476_v55  ;;  %v3596_v61 = vsel %vm956_vm1, %v3591_v21, 0 }
0x1728   : > { %v3641_v25 = vpop.permute.xlu1 %3640 }
0x1729   : > { %v3646_v27 = vsel %vm956_vm1, %v3641_v25, 0 }
0x172c   : > { %v3589_v28 = vpop.permute.xlu1 %3588 }
0x172e   : > { %v5642_v16 = vpop.eup %5641 }
0x172f   : > { %v3478_v4 = vsel %vm956_vm1, %v5642_v16, 0.0 }
0x1730   : > { %3479 = vadd.xlane.f32.xlu0 %v3478_v4 }
0x1732   : > { %v5644_v2 = vpop.eup %5643 }
0x1733   : > { %v3481_v17 = vsel %vm956_vm1, %v5644_v2, 0.0 }
0x1734   : > { %3482 = vadd.xlane.f32.xlu0 %v3481_v17 }
0x174a   : > { %3540 = vrot.lane.b32.xlu0 %v6890_v43, %s6099_s29 }
0x174e   : > { %3638 = vrot.lane.b32.xlu0 %v6898_v9, %s6100_s23 }
0x17b9   : > { %v3480_v18 = vpop.xlane.xlu0 %3479 }
0x17ba   : > { %5645 = vrcp.f32 %v3480_v18 }
0x17bd   : > { %v3483_v19 = vpop.xlane.xlu0 %3482 }
0x17be   : > { %5647 = vrcp.f32 %v3483_v19 }
0x17c1   : > { %v3541_v20 = vpop.permute.xlu0 %3540 }
0x17c2   : > { %v3546_v34 = vsel %vm963_vm0, %v3541_v20, 0 }
0x17c3   : > { %5241 = vmatpush3.bf16.msra.mxu1 %v3546_v34 }
0x17c4   : > { %5252 = vmatprep.subr.bf16.mxu1 %v6097_v11 }
0x17c5   : > { %v3639_v29 = vpop.permute.xlu0 %3638 }
0x17c7   : > { %v5646_v54 = vpop.eup %5645 }
0x17c8   : > { %v3486_v38 = vmul.f32 %v5646_v54, %v5642_v16 }
0x17ca   : > { %v3488_v22 = vpack.c.bf16 %v3486_v38, %v3486_v38 }
0x17cb   : > { %v5648_v23 = vpop.eup %5647 }
0x17cc   : > { %5237 = vmatmul.mubr.msk.bf16.vlgmr.msra.gmra.mxu0 %vm956_vm1, %v3488_v22  ;;  %v3487_v24 = vmul.f32 %v5648_v23, %v5644_v2 }
0x17cd   : > { %5247 = vmatpush3.bf16.xpose.msra.mxu0 %v3596_v61  ;;  %5248 = vmatprep.mubr.msk.bf16.mxu0 %vm6098_vm9, %v6097_v11 }
0x17ce   : > { %v3489_v45 = vpack.c.bf16 %v3487_v24, %v3487_v24  ;;  %5258 = vmatprep.subr.bf16.mxu0 %v6097_v11 }
0x17d0   : > { %5243 = vmatmul.mubr.msk.bf16.vlgmr.msra.gmra.mxu1 %vm956_vm1, %v3489_v45 }
0x17d1   : > { %5253 = vmatpush3.bf16.xpose.msra.mxu1 %v3646_v27  ;;  %5254 = vmatprep.mubr.msk.bf16.mxu1 %vm6098_vm9, %v6097_v11 }
0x17d2   : > { %5264 = vmatprep.subr.bf16.mxu1 %v6097_v11 }
0x17d4   : > { %5249 = vmatmul.mubr.msk.bf16.vlgmr.msra.gmra.mxu0 %vm956_vm1, %v3589_v28 }
0x17d5   : > { %5260 = vmatprep.mubr.msk.bf16.mxu0 %vm6098_vm9, %v6097_v11 }
0x17d8   : > { %5255 = vmatmul.mubr.msk.bf16.vlgmr.msra.gmra.mxu1 %vm956_vm1, %v3639_v29 }
0x17d9   : > { %5266 = vmatprep.mubr.msk.bf16.mxu1 %vm6098_vm9, %v6097_v11 }
0x188c   : > { %v6976_v30 = vpop.f32.mrf.mxu0 }
0x188e   : > { %v5238_v32 = vpop.f32.mrf.mxu0 }
0x1890   : > { %v3536_v33 = vpop.f32.mrf.mxu0  ;;  %v6978_v35 = vpop.f32.mrf.mxu1 }
0x1891   : > { %v5522_v36 = vpack.i.bf16 %v6978_v35, %v6976_v30 }
0x1892   : > { %v5239_v37 = vpop.f32.mrf.mxu0  ;;  %v5244_v39 = vpop.f32.mrf.mxu1 }
0x1894   : > { %v3585_v42 = vpop.f32.mrf.mxu1  ;;  %v3632_v44 = vpop.f32.mrf.mxu0 }
0x1895   : > { %v3688_v47 = vsel %vm956_vm1, %v3632_v44, -inf }
0x1896   : > { %v5245_v48 = vpop.f32.mrf.mxu1  ;;  %3689 = vmax.xlane.f32.xlu1 %v3688_v47  ;;  %v5250_v49 = vpop.f32.mrf.mxu0 }
0x1898   : > { %v3635_v53 = vpop.f32.mrf.mxu0  ;;  %v3682_v56 = vpop.f32.mrf.mxu1 }
0x1899   : > { %v3691_v57 = vsel %vm956_vm1, %v3682_v56, -inf }
0x189a   : > { %3692 = vmax.xlane.f32.xlu0 %v3691_v57  ;;  %v5251_v59 = vpop.f32.mrf.mxu0  ;;  %v5256_v60 = vpop.f32.mrf.mxu1 }
0x189c   : > { %v3685_v62 = vpop.f32.mrf.mxu1 }
0x189e   : > { %v5257_v63 = vpop.f32.mrf.mxu1 }
0x18a7   : > { %3712 = vrot.lane.b32.xlu1 %v6883_v0, %s6100_s23 }
0x18ab   : > { %3810 = vrot.lane.b32.xlu1 %v6873_v52, %s6101_s1 }
0x18af   : > { %3860 = vrot.lane.b32.xlu1 %v6880_v5, %s6101_s1 }
0x18b3   : > { %3808 = vrot.lane.b32.xlu1 %v6887_v10, %s6101_s1 }
0x191f   : > { %v3690_v7 = vpop.xlane.xlu1 %3689 }
0x1920   : > { %v3694_v6 = vsub.f32 %v3632_v44, %v3690_v7 }
0x1922   : > { %v3696_v40 = vmul.f32 1.442695, %v3694_v6 }
0x1923   : > { %v3693_v8 = vpop.xlane.xlu0 %3692  ;;  %v3713_v50 = vpop.permute.xlu1 %3712 }
0x1924   : > { %5649 = vpow2.f32 %v3696_v40  ;;  %v3695_v13 = vsub.f32 %v3682_v56, %v3693_v8  ;;  %v3718_v12 = vsel %vm963_vm0, %v3713_v50, 0 }
0x1925   : > { %5259 = vmatpush3.bf16.msra.mxu0 %v3718_v12 }
0x1926   : > { %v3698_v14 = vmul.f32 1.442695, %v3695_v13  ;;  %5270 = vmatprep.subr.bf16.mxu0 %v6097_v11 }
0x1927   : > { %v3811_v2 = vpop.permute.xlu1 %3810 }
0x1928   : > { %5651 = vpow2.f32 %v3698_v14  ;;  %v3816_v20 = vsel %vm956_vm1, %v3811_v2, 0 }
0x192b   : > { %v3861_v34 = vpop.permute.xlu1 %3860 }
0x192c   : > { %v3866_v21 = vsel %vm956_vm1, %v3861_v34, 0 }
0x192f   : > { %v3809_v38 = vpop.permute.xlu1 %3808 }
0x1931   : > { %v5650_v52 = vpop.eup %5649 }
0x1932   : > { %v3700_v5 = vsel %vm956_vm1, %v5650_v52, 0.0 }
0x1933   : > { %3701 = vadd.xlane.f32.xlu0 %v3700_v5 }
0x1935   : > { %v5652_v58 = vpop.eup %5651 }
0x1936   : > { %v3703_v10 = vsel %vm956_vm1, %v5652_v58, 0.0 }
0x1937   : > { %3704 = vadd.xlane.f32.xlu0 %v3703_v10 }
0x194d   : > { %3760 = vrot.lane.b32.xlu0 %v6890_v43, %s6100_s23  ;;  %s844_s23 = sand.u32 1, %s6069_s28  }
0x194e   : > { %s4485_s11 = scalar_lea.sflag [#allocation5], %s844_s23 }
0x1951   : > { %3858 = vrot.lane.b32.xlu0 %v6898_v9, %s6101_s1 }
0x19bc   : > { %v3702_v15 = vpop.xlane.xlu0 %3701 }
0x19bd   : > { %5653 = vrcp.f32 %v3702_v15  ;;  %v5563_v15 = vld [vmem:[%s7172_s12 + $0x18] sm:$0xff]  }
0x19c0   : > { %v3705_v46 = vpop.xlane.xlu0 %3704 }
0x19c1   : > { %5655 = vrcp.f32 %v3705_v46  ;;  %v5564_v46 = vld [vmem:[%s7172_s12 + $0x10] sm:$0xff]  }
0x19c4   : > { %v3761_v55 = vpop.permute.xlu0 %3760 }
0x19c5   : > { %v3766_v16 = vsel %vm963_vm0, %v3761_v55, 0 }
0x19c6   : > { %5265 = vmatpush3.bf16.msra.mxu1 %v3766_v16 }
0x19c7   : > { %5276 = vmatprep.subr.bf16.mxu1 %v6097_v11 }
0x19c8   : > { %v3859_v22 = vpop.permute.xlu0 %3858 }
0x19ca   : > { %v5654_v4 = vpop.eup %5653 }
0x19cb   : > { %v3708_v17 = vmul.f32 %v5654_v4, %v5650_v52 }
0x19cd   : > { %v3710_v18 = vpack.c.bf16 %v3708_v17, %v3708_v17 }
0x19ce   : > { %v5656_v19 = vpop.eup %5655 }
0x19cf   : > { %5261 = vmatmul.mubr.msk.bf16.vlgmr.msra.gmra.mxu0 %vm956_vm1, %v3710_v18  ;;  %v3709_v9 = vmul.f32 %v5656_v19, %v5652_v58 }
0x19d0   : > { %5271 = vmatpush3.bf16.xpose.msra.mxu0 %v3816_v20  ;;  %5272 = vmatprep.mubr.msk.bf16.mxu0 %vm6098_vm9, %v6097_v11 }
0x19d1   : > { %v3711_v54 = vpack.c.bf16 %v3709_v9, %v3709_v9  ;;  %5282 = vmatprep.subr.bf16.mxu0 %v6097_v11 }
0x19d3   : > { %5267 = vmatmul.mubr.msk.bf16.vlgmr.msra.gmra.mxu1 %vm956_vm1, %v3711_v54 }
0x19d4   : > { %5277 = vmatpush3.bf16.xpose.msra.mxu1 %v3866_v21  ;;  %5278 = vmatprep.mubr.msk.bf16.mxu1 %vm6098_vm9, %v6097_v11 }
0x19d5   : > { %5288 = vmatprep.subr.bf16.mxu1 %v6097_v11 }
0x19d7   : > { %5273 = vmatmul.mubr.msk.bf16.vlgmr.msra.gmra.mxu0 %vm956_vm1, %v3809_v38 }
0x19d8   : > { %5284 = vmatprep.mubr.msk.bf16.mxu0 %vm6098_vm9, %v6097_v11 }
0x19db   : > { %5279 = vmatmul.mubr.msk.bf16.vlgmr.msra.gmra.mxu1 %vm956_vm1, %v3859_v22 }
0x19dc   : > { %5290 = vmatprep.mubr.msk.bf16.mxu1 %vm6098_vm9, %v6097_v11 }
0x1a8f   : > { %v3754_v23 = vpop.f32.mrf.mxu0 }
0x1a91   : > { %v5262_v61 = vpop.f32.mrf.mxu0 }
0x1a93   : > { %v3757_v24 = vpop.f32.mrf.mxu0  ;;  %v3802_v25 = vpop.f32.mrf.mxu1 }
0x1a94   : > { %v5527_v56 = vpack.i.bf16 %v3802_v25, %v3754_v23 }
0x1a95   : > { %v5263_v45 = vpop.f32.mrf.mxu0  ;;  %v5268_v27 = vpop.f32.mrf.mxu1 }
0x1a97   : > { %v3805_v28 = vpop.f32.mrf.mxu1  ;;  %v3852_v29 = vpop.f32.mrf.mxu0 }
0x1a98   : > { %v3908_v32 = vsel %vm956_vm1, %v3852_v29, -inf }
0x1a99   : > { %v5269_v33 = vpop.f32.mrf.mxu1  ;;  %3909 = vmax.xlane.f32.xlu1 %v3908_v32  ;;  %v5274_v37 = vpop.f32.mrf.mxu0 }
0x1a9b   : > { %v3855_v39 = vpop.f32.mrf.mxu0  ;;  %v3902_v42 = vpop.f32.mrf.mxu1 }
0x1a9c   : > { %v3911_v44 = vsel %vm956_vm1, %v3902_v42, -inf  ;;  %v4826_v39 = vld [vmem:[#allocation12 + $0x1] ss:$0 sm:$0xff] }
0x1a9d   : > { %3912 = vmax.xlane.f32.xlu0 %v3911_v44  ;;  %v5275_v47 = vpop.f32.mrf.mxu0  ;;  %v5280_v48 = vpop.f32.mrf.mxu1 }
0x1a9f   : > { %v3905_v49 = vpop.f32.mrf.mxu1 }
0x1aa1   : > { %v5281_v53 = vpop.f32.mrf.mxu1 }
0x1aaa   : > { %3932 = vrot.lane.b32.xlu1 %v6883_v0, %s6101_s1 }
0x1aae   : > { %5523 = vrot.lane.b32.xlu1 %v5522_v36, %s6102_s22  ;;  %s7256_s22 = sld [smem:[#allocation37_spill]] }
0x1ab2   : > { %5528 = vrot.lane.b32.xlu1 %v5527_v56, %s6103_s25  ;;  %s4852_s25 = sshll.u32 %s6242_s4, 5 }
0x1ab3   : > { %s7119_s30 = scalar_lea.hbm %s7257_s0, %s4852_s25 }
0x1ab4   : > { %p7258_p9 = scmp.ne.s32.totalorder %s7256_s22, 0 }
0x1b22   : > { %v3910_v57 = vpop.xlane.xlu1 %3909 }
0x1b23   : > { %v3914_v59 = vsub.f32 %v3852_v29, %v3910_v57 }
0x1b25   : > { %v3916_v60 = vmul.f32 1.442695, %v3914_v59 }
0x1b26   : > { %v3913_v62 = vpop.xlane.xlu0 %3912  ;;  %v3933_v63 = vpop.permute.xlu1 %3932 }
0x1b27   : > { %5657 = vpow2.f32 %v3916_v60  ;;  %v3915_v7 = vsub.f32 %v3902_v42, %v3913_v62  ;;  %v3938_v6 = vsel %vm963_vm0, %v3933_v63, 0 }
0x1b28   : > { %5283 = vmatpush3.bf16.msra.mxu0 %v3938_v6 }
0x1b29   : > { %v3918_v40 = vmul.f32 1.442695, %v3915_v7  ;;  %5294 = vmatprep.subr.bf16.mxu0 %v6097_v11 }
0x1b2a   : > { %v5524_v34 = vpop.permute.xlu1 %5523 }
0x1b2b   : > { %5659 = vpow2.f32 %v3918_v40  ;;  %v5526_v21 = vunpack.i.h.bf16 %v5524_v34  ;;  %v5525_v38 = vunpack.i.l.bf16 %v5524_v34 }
0x1b2d   : > { %v4053_v24 = vsel %vm956_vm1, %v6938_v51, %v5526_v21  ;;  %v4052_v25 = vsel %vm956_vm1, %v6936_v41, %v5525_v38 }
0x1b2e   : > { %v5529_v54 = vpop.permute.xlu1 %5528 }
0x1b2f   : > { %v5531_v22 = vunpack.i.h.bf16 %v5529_v54  ;;  %v5530_v23 = vunpack.i.l.bf16 %v5529_v54 }
0x1b31   : > { %v4054_v28 = vsel %vm2622_vm10, %v4052_v25, %v5530_v23  ;;  %v4055_v29 = vsel %vm2622_vm10, %v4053_v24, %v5531_v22 }
0x1b34   : > { %v5658_v0 = vpop.eup %5657 }
0x1b35   : > { %v3920_v30 = vsel %vm956_vm1, %v5658_v0, 0.0 }
0x1b36   : > { %3921 = vadd.xlane.f32.xlu0 %v3920_v30  ;;  %v5565_v30 = vld [vmem:[#allocation15 + $0x18] sm:$0xff]  }
0x1b38   : > { %v5660_v35 = vpop.eup %5659 }
0x1b39   : > { %v3923_v36 = vsel %vm956_vm1, %v5660_v35, 0.0 }
0x1b3a   : > { %3924 = vadd.xlane.f32.xlu0 %v3923_v36 }
0x1b50   : > { %3980 = vrot.lane.b32.xlu0 %v6890_v43, %s6101_s1  ;;  %s4702_s1 = sshll.u32 %s844_s23, 1 }
0x1bbf   : > { %v3922_v8 = vpop.xlane.xlu0 %3921 }
0x1bc0   : > { %5661 = vrcp.f32 %v3922_v8 }
0x1bc3   : > { %v3925_v50 = vpop.xlane.xlu0 %3924 }
0x1bc4   : > { %5663 = vrcp.f32 %v3925_v50 }
0x1bc7   : > { %v3981_v13 = vpop.permute.xlu0 %3980 }
0x1bc8   : > { %v3986_v12 = vsel %vm963_vm0, %v3981_v13, 0 }
0x1bc9   : > { %5289 = vmatpush3.bf16.msra.mxu1 %v3986_v12 }
0x1bca   : > { %5302 = vmatprep.subr.bf16.mxu1 %v6097_v11 }
0x1bcd   : > { %v5662_v14 = vpop.eup %5661 }
0x1bce   : > { %v3928_v52 = vmul.f32 %v5662_v14, %v5658_v0 }
0x1bd0   : > { %v3930_v5 = vpack.c.bf16 %v3928_v52, %v3928_v52  ;;  %v4133_v52 = vld [vmem:[#allocation14 + $0x2] sm:$0x3] }
0x1bd1   : > { %v5664_v58 = vpop.eup %5663 }
0x1bd2   : > { %5285 = vmatmul.mubr.msk.bf16.vlgmr.msra.gmra.mxu0 %vm956_vm1, %v3930_v5  ;;  %v3929_v10 = vmul.f32 %v5664_v58, %v5660_v35  ;;  %v5566_v35 = vld [vmem:[#allocation15 + $0x10] sm:$0xff]  }
0x1bd3   : > { %5298 = vmatprep.mubr.msk.bf16.mxu0 %vm6098_vm9, %v6097_v11  ;;  %5295 = vmatpush3.bf16.msra.mxu0 %v5563_v15 }
0x1bd4   : > { %v3931_v43 = vpack.c.bf16 %v3929_v10, %v3929_v10  ;;  %5296 = vmatprep.subr.bf16.mxu0 %v6097_v11  ;;  %v4163_v10 = vrot.slane %v4133_v52, %v6572_v26  ;;  %v5568_v26 = vld [vmem:[%s7177_s17 + $0x30] sm:$0xff]  }
0x1bd6   : > { %5291 = vmatmul.mubr.msk.bf16.vlgmr.msra.gmra.mxu1 %vm956_vm1, %v3931_v43 }
0x1bd7   : > { %5306 = vmatprep.mubr.msk.bf16.mxu1 %vm6098_vm9, %v6097_v11  ;;  %5297 = vmatpush3.bf16.msra.mxu0 %v5564_v46 }
0x1bd8   : > { %5310 = vmatprep.subr.bf16.mxu0 %v6097_v11  ;;  %5303 = vmatpush3.bf16.msra.mxu1 %v5565_v30 }
0x1bd9   : > { %5304 = vmatprep.subr.bf16.mxu1 %v6097_v11 }
0x1bdc   : > { %5305 = vmatpush3.bf16.msra.mxu1 %v5566_v35 }
0x1bdd   : > { %5322 = vmatprep.subr.bf16.mxu1 %v6097_v11 }
0x1c92   : > { %v3974_v55 = vpop.f32.mrf.mxu0 }
0x1c94   : > { %v5286_v16 = vpop.f32.mrf.mxu0 }
0x1c96   : > { %v3977_v4 = vpop.f32.mrf.mxu0  ;;  %v4022_v2 = vpop.f32.mrf.mxu1 }
0x1c97   : > { %v5532_v17 = vpack.i.bf16 %v4022_v2, %v3974_v55  ;;  %v4169_v55 = vrot.slane %v4133_v52, %v6576_v31  ;;  %v5569_v31 = vld [vmem:[%s7177_s17 + $0x28] sm:$0xff]  }
0x1c98   : > { %v5287_v18 = vpop.f32.mrf.mxu0  ;;  %v5292_v19 = vpop.f32.mrf.mxu1  ;;  %v5571_v52 = vld [vmem:[%s7180_s20 + $0x8] sm:$0xff]  }
0x1c99   : > { %5533 = vrot.lane.b32.xlu1 %v5532_v17, %s6104_s6  ;;  %v5567_v18 = vld [vmem:[%s7177_s17 + $0x38] sm:$0xff]   ;;  %v5570_v19 = vld [vmem:[%s7177_s17 + $0x20] sm:$0xff]   ;;  %s846_s6 = scalar_lea.vmem [#allocation23], %s4702_s1 }
0x1c9a   : > { %v4025_v20 = vpop.f32.mrf.mxu1  ;;  %s4498_s2 = sshll.u32 %s846_s6, 4  ;;  %s7121_s2 = int_to_ptr.vmem [resolvable:$true] %s4498_s2 }
0x1c9b   : > { %v4827_v20 = vld [vmem:[#allocation17 + $0x1] ss:$0 sm:$0xff]  ;;  %s5989_s4 = scalar_lea.vmem %s7121_s2, 32  ;;  %p5996_p12 = scmp.lt.s32.totalorder %s7121_s2, %s5994_s26 }
0x1c9c   : > { %v5293_v9 = vpop.f32.mrf.mxu1  ;;  %p5990_p13 = scmp.ne.s32.totalorder %s7121_s2, %s5989_s4  ;;  %p5997_p10 = scmp.lt.s32.totalorder %s5995_s5, %s5989_s4 }
0x1c9e   : > { %p5991_p5 = pnand %p5990_p13, %p7258_p9  ;;  %p5998_p2 = por %p5997_p10, %p5996_p12 }
0x1ca0   : > { %p5992_p6 = pneg %p5991_p5 }
0x1ca2   : > { %p5999_p3 = pnand %p5998_p2, %p5992_p6 }
0x1d0b   : > { %v5534_v61 = vpop.permute.xlu1 %5533 }
0x1d0c   : > { %v5536_v45 = vunpack.i.h.bf16 %v5534_v61  ;;  %v5535_v27 = vunpack.i.l.bf16 %v5534_v61 }
0x1d0e   : > { %v4057_v32 = vsel %vm2625_vm11, %v4055_v29, %v5536_v45  ;;  %v4056_v33 = vsel %vm2625_vm11, %v4054_v28, %v5535_v27 }
0x1d0f   : > { %v4063_v37 = vpack.c.bf16 %v4057_v32, %v4056_v33 }
0x1d11   : > { %5299 = vmatmul.mubr.msk.bf16.vlgmr.msra.gmra.mxu0 %vm1237_vm8, %v4063_v37 }
0x1d12   : > { %5318 = vmatprep.mubr.msk.bf16.mxu0 %vm6098_vm9, %v6097_v11  ;;  %5311 = vmatpush3.bf16.msra.mxu0 %v5567_v18 }
0x1d13   : > { %5312 = vmatprep.subr.bf16.mxu0 %v6097_v11 }
0x1d16   : > { %5313 = vmatpush3.bf16.msra.mxu0 %v5568_v26 }
0x1d17   : > { %5314 = vmatprep.subr.bf16.mxu0 %v6097_v11 }
0x1d1a   : > { %5315 = vmatpush3.bf16.msra.mxu0 %v5569_v31 }
0x1d1b   : > { %5316 = vmatprep.subr.bf16.mxu0 %v6097_v11 }
0x1d1e   : > { %5317 = vmatpush3.bf16.msra.mxu0 %v5570_v19 }
0x1dd1   : > { %v4113_v51 = vpop.f32.mrf.mxu0 }
0x1dd2   : > { %v4120_v41 = vadd.f32 %v4113_v51, %v6825_v3 }
0x1dd3   : > { %v5300_v42 = vpop.f32.mrf.mxu0 }
0x1dd4   : > { %v7062_v44 = vadd.f32 %v4826_v39, %v4120_v41 }
0x1dd5   : > { %v4116_v47 = vpop.f32.mrf.mxu0 }
0x1dd6   : > { %v4121_v48 = vadd.f32 %v4116_v47, %v6830_v1  ;;  %v4134_v49 = vsel %vm1237_vm8, %v7062_v44, 0.0 }
0x1dd7   : > { %4135 = vadd.xlane.f32.xlu0 %v4134_v49  ;;  %v5301_v53 = vpop.f32.mrf.mxu0 }
0x1dd8   : > { %v7067_v56 = vadd.f32 %v4826_v39, %v4121_v48 }
0x1dda   : > { %v4137_v57 = vsel %vm1237_vm8, %v7067_v56, 0.0 }
0x1ddb   : > { %4138 = vadd.xlane.f32.xlu1 %v4137_v57 }
0x1e60   : > { %v4136_v59 = vpop.xlane.xlu0 %4135 }
0x1e61   : > { %v4140_v60 = vmul.f32 0.03125, %v4136_v59  ;;  %v4844_v59 = vld [vmem:[#allocation18 + $0x1] ss:$0 sm:$0xff] }
0x1e63   : > { %v4142_v3 = vsub.f32 %v7062_v44, %v4140_v60 }
0x1e64   : > { %v4139_v62 = vpop.xlane.xlu1 %4138 }
0x1e65   : > { %v4141_v63 = vmul.f32 0.03125, %v4139_v62  ;;  %v4144_v7 = vmul.f32 %v4142_v3, %v4142_v3 }
0x1e67   : > { %v4143_v1 = vsub.f32 %v7067_v56, %v4141_v63  ;;  %v4146_v6 = vsel %vm1237_vm8, %v4144_v7, 0.0 }
0x1e68   : > { %4147 = vadd.xlane.f32.xlu0 %v4146_v6 }
0x1e69   : > { %v4145_v40 = vmul.f32 %v4143_v1, %v4143_v1 }
0x1e6b   : > { %v4149_v0 = vsel %vm1237_vm8, %v4145_v40, 0.0 }
0x1e6c   : > { %4150 = vadd.xlane.f32.xlu0 %v4149_v0 }
0x1ef1   : > { %v4148_v36 = vpop.xlane.xlu0 %4147 }
0x1ef2   : > { %v4152_v8 = vmul.f32 0.03125, %v4148_v36 }
0x1ef4   : > { %v4154_v50 = vadd.f32 1e-05, %v4152_v8 }
0x1ef5   : > { %v4151_v13 = vpop.xlane.xlu0 %4150 }
0x1ef6   : > { %5665 = vrsqrt.f32 %v4154_v50  ;;  %v4153_v12 = vmul.f32 0.03125, %v4151_v13 }
0x1ef8   : > { %v4155_v14 = vadd.f32 1e-05, %v4153_v12 }
0x1efa   : > { %5667 = vrsqrt.f32 %v4155_v14 }
0x1f03   : > { %v5666_v5 = vpop.eup %5665 }
0x1f04   : > { %v4158_v58 = vmul.f32 %v5666_v5, %v4142_v3  ;;  %v5572_v5 = vld [vmem:[%s7180_s20] sm:$0xff]  }
0x1f06   : > { %v4164_v46 = vmul.f32 %v4163_v10, %v4158_v58 }
0x1f07   : > { %v5668_v43 = vpop.eup %5667 }
0x1f08   : > { %v4159_v15 = vmul.f32 %v5668_v43, %v4143_v1  ;;  %v4170_v4 = vadd.f32 %v4169_v55, %v4164_v46 }
0x1f0a   : > { %v4165_v16 = vmul.f32 %v4163_v10, %v4159_v15 }
0x1f0c   : > { %v4171_v2 = vadd.f32 %v4169_v55, %v4165_v16 }
0x1f0e   : > { %v4177_v17 = vpack.c.bf16 %v4171_v2, %v4170_v4  ;;  %v4845_v4 = vld [vmem:[#allocation20] ss:$0 sm:$0xff] }
0x1f10   : > { %5307 = vmatmul.mubr.msk.bf16.vlgmr.msra.gmra.mxu1 %vm1237_vm8, %v4177_v17  ;;  %v4846_v17 = vld [vmem:[#allocation20 + $0x1] ss:$0 sm:$0xff] }
0x1f11   : > { %5326 = vmatprep.mubr.msk.bf16.mxu1 %vm6098_vm9, %v6097_v11  ;;  %5323 = vmatpush3.bf16.msra.mxu1 %v5571_v52 }
0x1f12   : > { %5324 = vmatprep.subr.bf16.mxu1 %v6097_v11 }
0x1f15   : > { %5325 = vmatpush3.bf16.msra.mxu1 %v5572_v5 }
0x1fd0   : > { %v4235_v9 = vpop.f32.mrf.mxu1 }
0x1fd1   : > { %v4236_v34 = vadd.f32 %v4827_v20, %v4235_v9 }
0x1fd2   : > { %v5308_v54 = vpop.f32.mrf.mxu1 }
0x1fd3   : > { %v4242_v21 = vmul.f32 %v4236_v34, %v4236_v34 }
0x1fd4   : > { %v4238_v38 = vpop.f32.mrf.mxu1 }
0x1fd5   : > { %v4244_v22 = vmul.f32 %v4242_v21, %v4236_v34  ;;  %v4239_v23 = vadd.f32 %v4827_v20, %v4238_v38 }
0x1fd6   : > { %v5309_v61 = vpop.f32.mrf.mxu1 }
0x1fd7   : > { %v4246_v24 = vmul.f32 0.044715, %v4244_v22  ;;  %v4243_v25 = vmul.f32 %v4239_v23, %v4239_v23 }
0x1fd9   : > { %v4248_v45 = vadd.f32 %v4246_v24, %v4236_v34  ;;  %v4245_v27 = vmul.f32 %v4243_v25, %v4239_v23 }
0x1fdb   : > { %v4250_v28 = vmul.f32 0.7978846, %v4248_v45  ;;  %v4247_v29 = vmul.f32 0.044715, %v4245_v27 }
0x1fdd   : > { %5669 = vtanh.f32 %v4250_v28  ;;  %v4249_v32 = vadd.f32 %v4247_v29, %v4239_v23 }
0x1fdf   : > { %v4251_v33 = vmul.f32 0.7978846, %v4249_v32 }
0x1fe1   : > { %5671 = vtanh.f32 %v4251_v33 }
0x1fea   : > { %v5670_v37 = vpop.eup %5669 }
0x1feb   : > { %v4254_v51 = vadd.f32 1.0, %v5670_v37 }
0x1fed   : > { %v4256_v41 = vmul.f32 0.5, %v4254_v51 }
0x1fee   : > { %v5672_v39 = vpop.eup %5671 }
0x1fef   : > { %v4255_v42 = vadd.f32 1.0, %v5672_v39  ;;  %v4258_v48 = vmul.f32 %v4256_v41, %v4236_v34 }
0x1ff1   : > { %v4257_v47 = vmul.f32 0.5, %v4255_v42 }
0x1ff3   : > { %v4259_v49 = vmul.f32 %v4257_v47, %v4239_v23 }
0x1ff5   : > { %v4269_v53 = vpack.c.bf16 %v4259_v49, %v4258_v48  ;;  %v4847_v48 = vld [vmem:[#allocation21] ss:$0 sm:$0xff] }
0x1ff7   : > { %5319 = vmatmul.mubr.msk.bf16.vlgmr.msra.gmra.mxu0 %vm2858_vm12, %v4269_v53 }
0x20b7   : > { %v4331_v57 = vpop.f32.mrf.mxu0 }
0x20b8   : > { %v4338_v60 = vadd.f32 %v4331_v57, %v7062_v44 }
0x20b9   : > { %v5320_v3 = vpop.f32.mrf.mxu0 }
0x20ba   : > { %v4348_v62 = vadd.f32 %v4844_v59, %v4338_v60 }
0x20bb   : > { %v4334_v63 = vpop.f32.mrf.mxu0 }
0x20bc   : > { %v4339_v7 = vadd.f32 %v4334_v63, %v7067_v56  ;;  %v4352_v1 = vsel %vm1237_vm8, %v4348_v62, 0.0 }
0x20bd   : > { %4353 = vadd.xlane.f32.xlu0 %v4352_v1  ;;  %v5321_v6 = vpop.f32.mrf.mxu0 }
0x20be   : > { %v4349_v40 = vadd.f32 %v4844_v59, %v4339_v7 }
0x20c0   : > { %v4355_v0 = vsel %vm1237_vm8, %v4349_v40, 0.0 }
0x20c1   : > { %4356 = vadd.xlane.f32.xlu1 %v4355_v0 }
0x2146   : > { %v4354_v30 = vpop.xlane.xlu0 %4353 }
0x2147   : > { %v4358_v35 = vmul.f32 0.03125, %v4354_v30 }
0x2149   : > { %v4360_v36 = vsub.f32 %v4348_v62, %v4358_v35 }
0x214a   : > { %v4357_v8 = vpop.xlane.xlu1 %4356 }
0x214b   : > { %v4359_v50 = vmul.f32 0.03125, %v4357_v8  ;;  %v4362_v13 = vmul.f32 %v4360_v36, %v4360_v36 }
0x214d   : > { %v4361_v44 = vsub.f32 %v4349_v40, %v4359_v50  ;;  %v4364_v12 = vsel %vm1237_vm8, %v4362_v13, 0.0 }
0x214e   : > { %4365 = vadd.xlane.f32.xlu0 %v4364_v12 }
0x214f   : > { %v4363_v14 = vmul.f32 %v4361_v44, %v4361_v44 }
0x2151   : > { %v4367_v56 = vsel %vm1237_vm8, %v4363_v14, 0.0 }
0x2152   : > { %4368 = vadd.xlane.f32.xlu1 %v4367_v56 }
0x21d7   : > { %v4366_v58 = vpop.xlane.xlu0 %4365 }
0x21d8   : > { %v4370_v10 = vmul.f32 0.03125, %v4366_v58 }
0x21da   : > { %v4372_v43 = vadd.f32 1e-05, %v4370_v10 }
0x21db   : > { %v4369_v15 = vpop.xlane.xlu1 %4368 }
0x21dc   : > { %5673 = vrsqrt.f32 %v4372_v43  ;;  %v4371_v46 = vmul.f32 0.03125, %v4369_v15 }
0x21de   : > { %v4373_v55 = vadd.f32 1e-05, %v4371_v46 }
0x21e0   : > { %5675 = vrsqrt.f32 %v4373_v55 }
0x21e9   : > { %v5674_v16 = vpop.eup %5673 }
0x21ea   : > { %v4376_v2 = vmul.f32 %v5674_v16, %v4360_v36 }
0x21ec   : > { %v4382_v18 = vmul.f32 %v4845_v4, %v4376_v2 }
0x21ed   : > { %v5676_v26 = vpop.eup %5675 }
0x21ee   : > { %v4388_v31 = vadd.f32 %v4846_v17, %v4382_v18  ;;  %v4377_v19 = vmul.f32 %v5676_v26, %v4361_v44 }
0x21f0   : > { %v4390_v20 = vsel %vm1237_vm8, %v4388_v31, 0.0  ;;  %v4383_v11 = vmul.f32 %v4845_v4, %v4377_v19 }
0x21f1   : > { %v4391_v9 = vrot.slane %v4390_v20, 4 }
0x21f2   : > { %v4389_v34 = vadd.f32 %v4846_v17, %v4383_v11 }
0x21f3   : > { %v4392_v54 = vadd.f32 %v4391_v9, %v4390_v20 }
0x21f4   : > { %v4397_v21 = vsel %vm1237_vm8, %v4389_v34, 0.0 }
0x21f5   : > { %v4398_v38 = vrot.slane %v4397_v21, 4  ;;  %v4393_v22 = vrot.slane %v4392_v54, 2 }
0x21f7   : > { %v4399_v23 = vadd.f32 %v4398_v38, %v4397_v21  ;;  %v4394_v61 = vadd.f32 %v4393_v22, %v4392_v54 }
0x21f9   : > { %v4395_v24 = vrot.slane %v4394_v61, 1  ;;  %v4400_v25 = vrot.slane %v4399_v23, 2 }
0x21fb   : > { %v4396_v45 = vadd.f32 %v4395_v24, %v4394_v61  ;;  %v4401_v27 = vadd.f32 %v4400_v25, %v4399_v23 }
0x21fd   : > { %v4402_v28 = vrot.slane %v4401_v27, 1  ;;  %v4405_v29 = vmul.f32 0.125, %v4396_v45 }
0x21ff   : > { %v4403_v32 = vadd.f32 %v4402_v28, %v4401_v27  ;;  %v4411_v37 = vpack.c.bf16 %v4405_v29, %v4405_v29 }
0x2201   : > { %v4406_v33 = vmul.f32 0.125, %v4403_v32  ;;  %v4422_v39 = vunpack.c.l.b16 %v4411_v37 }
0x2203   : > { %v4412_v51 = vpack.c.bf16 %v4406_v33, %v4406_v33 }
0x2205   : > { %v4423_v41 = vunpack.c.l.b16 %v4412_v51 }
0x2207   : > { %v4425_v42 = vsel %vm4424_vm13, %v4423_v41, %v4422_v39 }
0x2208   : > { %v4426_v47 = vpack.c.b16 %v4425_v42, %v4425_v42 }
0x220a   : > { %5327 = vmatmul.mubr.msk.bf16.vlgmr.msra.gmra.mxu1 %vm1237_vm8, %v4426_v47 }
0x22ca   : > { %v4476_v49 = vpop.f32.mrf.mxu1 }
0x22cb   : > { %v4477_v53 = vadd.f32 %v4847_v48, %v4476_v49 }
0x22cc   : > { %v5328_v57 = vpop.f32.mrf.mxu1 }
0x22cd   : > { %4483 = vst.msk [vmem:[%s846_s6] sm:$0x3] %vm4482_vm14, %v4477_v53 }
0x22ce   : > { %v4479_v59 = vpop.f32.mrf.mxu1 }
0x22cf   : > { %6002 = shalt.err (!%p5999_p3)
}
0x22d0   : > { %s6003_s29 = scalar_lea.hbm %s7119_s30, 32  ;;  %s6007_s25 = scalar_lea.hbm %s7257_s0, 64 }
0x22d1   : > { %p6004_p4 = scmp.ne.s32.totalorder %s7119_s30, %s6003_s29  ;;  %p6008_p11 = scmp.lt.s32.totalorder %s7119_s30, %s7257_s0 }
0x22d2   : > { %p6009_p0 = scmp.lt.s32.totalorder %s6007_s25, %s6003_s29 }
0x22d3   : > { %p6005_p7 = pnand %p6004_p4, %p7258_p9 }
0x22d4   : > { %p6010_p1 = por %p6009_p0, %p6008_p11 }
0x22d5   : > { %p6006_p8 = pneg %p6005_p7 }
0x22d7   : > { %p6011_p13 = pnand %p6010_p1, %p6006_p8 }
0x22d9   : > { %6014 = shalt.err (!%p6011_p13)
}
0x22da   : > { %5381 = dma.vmem_to_hbm [thread:$0]  (%p7258_p9), %s7121_s2, 32, %s7119_s30, %s4485_s11   ;;  %v5329_v60 = vpop.f32.mrf.mxu1 }
0x22db PF: > { %s7259_s27 = sld [smem:[#allocation34_spill]] }
0x22dc   : > { %s7260_s4 = sld [smem:[#allocation32_spill]] }
0x22dd   : > { %s7261_s24 = sld [smem:[#allocation38_spill]] }
0x22e1   : > { %p5448_p5 = scmp.ge.s32.totalorder %s7259_s27, 2 }
0x22e2   : > { %s4510_s26 = sand.u32 1, %s7260_s4  }
0x22e3   : > { %p7262_p6 = scmp.ne.s32.totalorder %s7261_s24, 0  ;;  %s4511_s5 = scalar_lea.sflag [#allocation5], %s4510_s26 }
0x22e5   : > { %p5421_p12 = pnand %p5448_p5, %p7262_p6 }
0x22e7   : > { %p5422_p10 = pneg %p5421_p12 }
0x22e9   : > { %6060 = dma.done.wait (%p5422_p10), %s4511_s5, 32  }
0x22ea   : > { %6062 = vsyncadd (%p5422_p10), %s4511_s5, 4294967264  ;;  %s7263_s30 = sld [smem:[#allocation35_spill]]  ;;  %s7266_s3 = smov %s6069_s28 }
0x22eb   : > { %s7264_s29 = sld [smem:[#allocation33_spill]] }
0x22ec   : > { %s7265_s22 = sld [smem:[#allocation36_spill]] }
0x22f0   : > { %p39_p2 = scmp.ge.s32.totalorder %s7263_s30, 4  }
0x22f1   : > { %s7267_s28 = smov %s7264_s29 }
0x22f2   : > { %s7268_s29 = smov %s7265_s22  ;;  %41 = sbr.rel (!%p39_p2) target bundleno = 21 (0x15), region = 210 }
0x22f7   :  { %4516 = vsyncpa [#allocation4], 1 }
0x22f8   :  { %4518 = vsyncpa [#allocation4 + $0x1], 1 }
0x22f9   :  { %4519 = vsyncpa [#allocation7], 1 }
0x22fa   :  { %4520 = vsyncpa [#allocation10], 1 }
0x22fb   :  { %4521 = vsyncpa [#allocation13], 1 }
0x22fc   :  { %4522 = vsyncpa [#allocation16], 1 }
0x22fd   :  { %4523 = vsyncpa [#allocation19], 1 }
0x22fe   :  { %4524 = vsyncpa [#allocation22], 1 }
0x22ff   :  { %4525 = vsyncpa [#allocation5], 1 }
0x2300   :  { %4527 = vsyncpa [#allocation5 + $0x1], 1 }

</bundles_post_ra>
